<compile_context>
chip_gen: v7x
topology: tpu7x:2x2x1
jax: 0.10.0
libtpu: 0.0.40
codegen_flags: <defaults>
</compile_context>

<pallas_src>
import jax
import jax.numpy as jnp
from jax import lax
from jax.experimental import pallas as pl
from jax.experimental.pallas import tpu as pltpu


# ----------------------------- Pallas kernels ------------------------------ #

def conv_relu_pool_kernel(p_ref, w_ref, b_ref, o_ref):
    """Fused conv (im2col matmul) + 2x2 max-pool + bias + ReLU for one batch element.

    p_ref: (1, K, 4*HW)   im2col patches; 4 pool-phases concatenated on the lane axis
    w_ref: (Cout, K)      conv weight reshaped (cin, kh, kw) contraction order
    b_ref: (Cout, 1)      bias (broadcast over lanes)
    o_ref: (1, Cout, HW)  pooled output, channel-major (torch C,H,W order), lane-dense
    """
    hw = o_ref.shape[2]
    # One MXU matmul covering all 4 pool phases: (Cout, K) x (K, 4*HW).
    y = jnp.dot(w_ref[...], p_ref[0], preferred_element_type=jnp.float32)
    # Max-pool = elementwise max over the 4 phase slices (128-aligned lane slices).
    acc = y[:, 0:hw]
    for ph in range(1, 4):
        acc = jnp.maximum(acc, y[:, ph * hw:(ph + 1) * hw])
    # Bias + ReLU hoisted out of the phase reduction (commutes with the max).
    o_ref[0] = jnp.maximum(acc + b_ref[...], 0.0).astype(o_ref.dtype)


def mlp_kernel(x_ref, w1_ref, b1_ref, w2_ref, b2_ref, o_ref, acc_ref):
    """fc1 (K-chunked bf16 matmul, f32 accumulation) + bias + ReLU + fc2 + bias."""
    k = pl.program_id(0)

    @pl.when(k == 0)
    def _():
        acc_ref[...] = jnp.zeros_like(acc_ref)

    # w1 is stored bf16; cast the (tiny) activation chunk to bf16 in-register so the
    # MXU runs a bf16 x bf16 matmul with an f32 accumulator.
    acc_ref[...] += jnp.dot(x_ref[...].astype(jnp.bfloat16), w1_ref[...],
                            preferred_element_type=jnp.float32)

    @pl.when(k == pl.num_programs(0) - 1)
    def _():
        h = jnp.maximum(acc_ref[...] + b1_ref[...], 0.0)
        # TODO(synk): nn.Dropout(0.5) is identity at inference; training-mode RNG
        # dropout (pltpu.prng_seed / prng_random_bits) is not implemented here.
        o_ref[...] = (jnp.dot(h, w2_ref[...], preferred_element_type=jnp.float32)
                      + b2_ref[...]).astype(o_ref.dtype)


# ------------------------------- JAX glue ---------------------------------- #

def _im2col_pool_phases(x_nchw):
    """(B, C, H, W) -> (B, 9*C, 4*(H//2)*(W//2)) patches (3x3 conv, pad=1, stride 1).

    Contraction dim K = 9*C is ordered (cin, kh, kw) to match w.reshape(Cout, Cin*9).
    The last axis is [phase, hp*Wp+wp]: the 4 positions inside each 2x2 pool window,
    each a lane-dense HW slab.
    """
    B, C, H, W = x_nchw.shape
    xp = jnp.pad(x_nchw, ((0, 0), (0, 0), (1, 1), (1, 1)))
    Hp, Wp = H // 2, W // 2
    # TODO(synk): for larger batches, build conv2's taps in-kernel from the padded
    # conv1 output instead of materializing this 9x-inflated tensor in HBM.
    phases = []
    for pr in range(2):
        for pc in range(2):
            taps = []
            for kh in range(3):
                for kw in range(3):
                    taps.append(
                        xp[:, :, pr + kh: pr + kh + H: 2, pc + kw: pc + kw + W: 2])
            # (B, C, 9, Hp, Wp) -> (B, 9*C, Hp*Wp) with (cin, kh, kw) ordering
            patch = jnp.stack(taps, axis=2).reshape(B, C * 9, Hp * Wp)
            phases.append(patch)
    return jnp.stack(phases, axis=2).reshape(B, C * 9, 4 * Hp * Wp)


def conv_relu_pool_block(x_nchw, w_oihw, b):
    B, Cin, H, W = x_nchw.shape
    Cout = w_oihw.shape[0]
    Hp, Wp = H // 2, W // 2
    HW = Hp * Wp
    K = 9 * Cin

    patches = _im2col_pool_phases(x_nchw)          # (B, K, 4*HW)
    wmat = w_oihw.reshape(Cout, K)                 # (Cout, K), (cin, kh, kw) order
    bcol = b.reshape(Cout, 1)

    out = pl.pallas_call(
        conv_relu_pool_kernel,
        out_shape=jax.ShapeDtypeStruct((B, Cout, HW), jnp.float32),
        grid_spec=pltpu.PrefetchScalarGridSpec(
            num_scalar_prefetch=0,
            grid=(B,),
            in_specs=[
                pl.BlockSpec((1, K, 4 * HW), lambda bi: (bi, 0, 0)),
                pl.BlockSpec((Cout, K), lambda bi: (0, 0)),
                pl.BlockSpec((Cout, 1), lambda bi: (0, 0)),
            ],
            out_specs=pl.BlockSpec((1, Cout, HW), lambda bi: (bi, 0, 0)),
        ),
        compiler_params=pltpu.CompilerParams(
            dimension_semantics=("parallel",)),
    )(patches, wmat, bcol)
    return out.reshape(B, Cout, Hp, Wp)            # channel-major, feeds next stage


def mlp_block(x_flat, w1_bf16, b1, w2, b2, kchunk=8192):
    B, K = x_flat.shape
    Hd = w1_bf16.shape[1]
    Od = w2.shape[1]
    assert K % kchunk == 0

    # TODO(synk): on v7x, add a parallel grid axis (split K or batch across the two
    # TensorCores) with per-core partial accumulators to use both cores for fc1.
    return pl.pallas_call(
        mlp_kernel,
        out_shape=jax.ShapeDtypeStruct((B, Od), jnp.float32),
        grid_spec=pltpu.PrefetchScalarGridSpec(
            num_scalar_prefetch=0,
            grid=(K // kchunk,),
            in_specs=[
                pl.BlockSpec((B, kchunk), lambda k: (0, k)),
                pl.BlockSpec((kchunk, Hd), lambda k: (k, 0)),
                pl.BlockSpec((1, Hd), lambda k: (0, 0)),
                pl.BlockSpec((Hd, Od), lambda k: (0, 0)),
                pl.BlockSpec((1, Od), lambda k: (0, 0)),
            ],
            out_specs=pl.BlockSpec((B, Od), lambda k: (0, 0)),
            scratch_shapes=[pltpu.VMEM((B, Hd), jnp.float32)],
        ),
        compiler_params=pltpu.CompilerParams(
            dimension_semantics=("arbitrary",)),
    )(x_flat, w1_bf16, b1.reshape(1, Hd), w2, b2.reshape(1, Od))


@jax.jit
def simple_cnn_forward(x_nchw, params):
    cw1, cb1, cw2, cb2, fw1, fb1, fw2, fb2 = params
    x = conv_relu_pool_block(x_nchw, cw1, cb1)     # (B, 32, 32, 32)
    x = conv_relu_pool_block(x, cw2, cb2)          # (B, 64, 16, 16)
    B = x.shape[0]
    # Conv outputs are already channel-major -> pure reshape matches torch's
    # x.view(B, -1) on an NCHW tensor (no transpose needed).
    x = x.reshape(B, -1)                           # (B, 64*16*16)
    return mlp_block(x, fw1, fb1, fw2, fb2)        # (B, 40)


def reference_forward(x_nchw, params):
    """Pure XLA reference for numerical cross-check."""
    cw1, cb1, cw2, cb2, fw1, fb1, fw2, fb2 = params
    dn = ('NCHW', 'OIHW', 'NCHW')
    y = lax.conv_general_dilated(x_nchw, cw1, (1, 1), 'SAME', dimension_numbers=dn)
    y = jnp.maximum(y + cb1.reshape(1, -1, 1, 1), 0.0)
    y = lax.reduce_window(y, -jnp.inf, lax.max, (1, 1, 2, 2), (1, 1, 2, 2), 'VALID')
    y = lax.conv_general_dilated(y, cw2, (1, 1), 'SAME', dimension_numbers=dn)
    y = jnp.maximum(y + cb2.reshape(1, -1, 1, 1), 0.0)
    y = lax.reduce_window(y, -jnp.inf, lax.max, (1, 1, 2, 2), (1, 1, 2, 2), 'VALID')
    y = y.reshape(y.shape[0], -1)
    y = jnp.maximum(y @ fw1.astype(jnp.float32) + fb1, 0.0)
    return y @ fw2 + fb2


if __name__ == "__main__":
    key = jax.random.PRNGKey(0)
    ks = jax.random.split(key, 9)
    B = 2
    # forward implies 1-channel 64x64 inputs (fc1 expects 64*16*16 after two 2x2 pools)
    x = jax.random.normal(ks[0], (B, 1, 64, 64), dtype=jnp.float32)

    def init(k, shape, fan_in):
        return jax.random.normal(k, shape, dtype=jnp.float32) / jnp.sqrt(float(fan_in))

    params = (
        init(ks[1], (32, 1, 3, 3), 9),             # conv1.weight (OIHW)
        init(ks[2], (32,), 9),                     # conv1.bias
        init(ks[3], (64, 32, 3, 3), 288),          # conv2.weight (OIHW)
        init(ks[4], (64,), 288),                   # conv2.bias
        # fc1 weight pre-cast to bf16 once at init (halves its HBM stream in fc1);
        # the reference uses the same rounded values upcast to f32.
        init(ks[5], (64 * 16 * 16, 128), 64 * 16 * 16).astype(jnp.bfloat16),
        init(ks[6], (128,), 64 * 16 * 16),         # fc1.bias
        init(ks[7], (128, 40), 128),               # fc2.weight (transposed)
        init(ks[8], (40,), 128),                   # fc2.bias
    )

    out = simple_cnn_forward(x, params)
    out = jax.block_until_ready(out)

    ref = reference_forward(x, params)
    assert out.shape == (B, 40), out.shape
    max_err = float(jnp.max(jnp.abs(out - ref)))
    assert jnp.allclose(out, ref, rtol=5e-2, atol=5e-2), max_err
    print("KERNEL_OK")
</pallas_src>

<mosaic_0001>
module attributes {stable_mosaic.version = 11 : i64} {
  func.func @conv_relu_pool_kernel(%arg0: i32, %arg1: memref<1x9x4096xf32, #tpu.memory_space<vmem>>, %arg2: memref<32x9xf32, #tpu.memory_space<vmem>>, %arg3: memref<32x1xf32, #tpu.memory_space<vmem>>, %arg4: memref<1x32x1024xf32, #tpu.memory_space<vmem>>) attributes {dimension_semantics = [#tpu.dimension_semantics<parallel>], iteration_bounds = array<i64: 2>, scalar_prefetch = 0 : i64, scratch_operands = 0 : i64, tpu.core_type = #tpu.core_type<tc>, window_params = [{transform_indices = @transform_0, window_bounds = array<i64: 1, 9, 4096>}, {pipeline_mode = #tpu.pipeline_mode<synchronous>, transform_indices = @transform_1, window_bounds = array<i64: 32, 9>}, {pipeline_mode = #tpu.pipeline_mode<synchronous>, transform_indices = @transform_2, window_bounds = array<i64: 32, 1>}, {transform_indices = @transform_3, window_bounds = array<i64: 1, 32, 1024>}]} {
    %c0 = arith.constant 0 : index
    %c0_0 = arith.constant 0 : index
    %0 = vector.load %arg2[%c0, %c0_0] : memref<32x9xf32, #tpu.memory_space<vmem>>, vector<32x9xf32>
    %c0_1 = arith.constant 0 : index
    %c0_2 = arith.constant 0 : index
    %c0_3 = arith.constant 0 : index
    %1 = vector.load %arg1[%c0_1, %c0_2, %c0_3] : memref<1x9x4096xf32, #tpu.memory_space<vmem>>, vector<1x9x4096xf32>
    %2 = vector.shape_cast %1 : vector<1x9x4096xf32> to vector<9x4096xf32>
    %cst = arith.constant dense<0.000000e+00> : vector<32x4096xf32>
    %3 = tpu.matmul %0, %2, %cst {dimension_numbers = #tpu.dot_dimension_numbers<[1], [0], [0], [1], [0, 0, 1, 1], [], []>} : vector<32x9xf32>, vector<9x4096xf32>, vector<32x4096xf32> -> vector<32x4096xf32>
    %4 = vector.extract_strided_slice %3 {offsets = [0, 0], sizes = [32, 1024], strides = [1, 1]} : vector<32x4096xf32> to vector<32x1024xf32>
    %5 = vector.extract_strided_slice %3 {offsets = [0, 1024], sizes = [32, 1024], strides = [1, 1]} : vector<32x4096xf32> to vector<32x1024xf32>
    %6 = arith.maximumf %4, %5 : vector<32x1024xf32>
    %7 = vector.extract_strided_slice %3 {offsets = [0, 2048], sizes = [32, 1024], strides = [1, 1]} : vector<32x4096xf32> to vector<32x1024xf32>
    %8 = arith.maximumf %6, %7 : vector<32x1024xf32>
    %9 = vector.extract_strided_slice %3 {offsets = [0, 3072], sizes = [32, 1024], strides = [1, 1]} : vector<32x4096xf32> to vector<32x1024xf32>
    %10 = arith.maximumf %8, %9 : vector<32x1024xf32>
    %c0_4 = arith.constant 0 : index
    %c0_5 = arith.constant 0 : index
    %11 = vector.load %arg3[%c0_4, %c0_5] : memref<32x1xf32, #tpu.memory_space<vmem>>, vector<32x1xf32>
    %12 = vector.broadcast %11 : vector<32x1xf32> to vector<32x1024xf32>
    %13 = arith.addf %10, %12 : vector<32x1024xf32>
    %cst_6 = arith.constant 0.000000e+00 : f32
    %14 = vector.broadcast %cst_6 : f32 to vector<32x1024xf32>
    %15 = arith.maximumf %13, %14 : vector<32x1024xf32>
    %c0_7 = arith.constant 0 : index
    %c0_8 = arith.constant 0 : index
    %c0_9 = arith.constant 0 : index
    %16 = vector.load %arg4[%c0_7, %c0_8, %c0_9] : memref<1x32x1024xf32, #tpu.memory_space<vmem>>, vector<1x32x1024xf32>
    %17 = vector.shape_cast %16 : vector<1x32x1024xf32> to vector<32x1024xf32>
    %18 = vector.shape_cast %15 : vector<32x1024xf32> to vector<1x32x1024xf32>
    tpu.vector_store %arg4[%c0_7, %c0_8, %c0_9], %18 {strides = array<i32>} : memref<1x32x1024xf32, #tpu.memory_space<vmem>>, vector<1x32x1024xf32>,
    return
  }
  func.func @transform_0(%arg0: i32) -> (i32, i32, i32) {
    %c0_i32 = arith.constant 0 : i32
    %c0_i32_0 = arith.constant 0 : i32
    %c0_i32_1 = arith.constant 0 : i32
    return %arg0, %c0_i32, %c0_i32_0 : i32, i32, i32
  }
  func.func @transform_1(%arg0: i32) -> (i32, i32) {
    %c0_i32 = arith.constant 0 : i32
    %c0_i32_0 = arith.constant 0 : i32
    %c0_i32_1 = arith.constant 0 : i32
    return %c0_i32, %c0_i32_0 : i32, i32
  }
  func.func @transform_2(%arg0: i32) -> (i32, i32) {
    %c0_i32 = arith.constant 0 : i32
    %c0_i32_0 = arith.constant 0 : i32
    %c0_i32_1 = arith.constant 0 : i32
    return %c0_i32, %c0_i32_0 : i32, i32
  }
  func.func @transform_3(%arg0: i32) -> (i32, i32, i32) {
    %c0_i32 = arith.constant 0 : i32
    %c0_i32_0 = arith.constant 0 : i32
    %c0_i32_1 = arith.constant 0 : i32
    return %arg0, %c0_i32, %c0_i32_0 : i32, i32, i32
  }
}

module attributes {stable_mosaic.version = 11 : i64} {
  func.func @conv_relu_pool_kernel(%arg0: i32, %arg1: memref<1x288x1024xf32, #tpu.memory_space<vmem>>, %arg2: memref<64x288xf32, #tpu.memory_space<vmem>>, %arg3: memref<64x1xf32, #tpu.memory_space<vmem>>, %arg4: memref<1x64x256xf32, #tpu.memory_space<vmem>>) attributes {dimension_semantics = [#tpu.dimension_semantics<parallel>], iteration_bounds = array<i64: 2>, scalar_prefetch = 0 : i64, scratch_operands = 0 : i64, tpu.core_type = #tpu.core_type<tc>, window_params = [{transform_indices = @transform_0, window_bounds = array<i64: 1, 288, 1024>}, {pipeline_mode = #tpu.pipeline_mode<synchronous>, transform_indices = @transform_1, window_bounds = array<i64: 64, 288>}, {pipeline_mode = #tpu.pipeline_mode<synchronous>, transform_indices = @transform_2, window_bounds = array<i64: 64, 1>}, {transform_indices = @transform_3, window_bounds = array<i64: 1, 64, 256>}]} {
    %c0 = arith.constant 0 : index
    %c0_0 = arith.constant 0 : index
    %0 = vector.load %arg2[%c0, %c0_0] : memref<64x288xf32, #tpu.memory_space<vmem>>, vector<64x288xf32>
    %c0_1 = arith.constant 0 : index
    %c0_2 = arith.constant 0 : index
    %c0_3 = arith.constant 0 : index
    %1 = vector.load %arg1[%c0_1, %c0_2, %c0_3] : memref<1x288x1024xf32, #tpu.memory_space<vmem>>, vector<1x288x1024xf32>
    %2 = vector.shape_cast %1 : vector<1x288x1024xf32> to vector<288x1024xf32>
    %cst = arith.constant dense<0.000000e+00> : vector<64x1024xf32>
    %3 = tpu.matmul %0, %2, %cst {dimension_numbers = #tpu.dot_dimension_numbers<[1], [0], [0], [1], [0, 0, 1, 1], [], []>} : vector<64x288xf32>, vector<288x1024xf32>, vector<64x1024xf32> -> vector<64x1024xf32>
    %4 = vector.extract_strided_slice %3 {offsets = [0, 0], sizes = [64, 256], strides = [1, 1]} : vector<64x1024xf32> to vector<64x256xf32>
    %5 = vector.extract_strided_slice %3 {offsets = [0, 256], sizes = [64, 256], strides = [1, 1]} : vector<64x1024xf32> to vector<64x256xf32>
    %6 = arith.maximumf %4, %5 : vector<64x256xf32>
    %7 = vector.extract_strided_slice %3 {offsets = [0, 512], sizes = [64, 256], strides = [1, 1]} : vector<64x1024xf32> to vector<64x256xf32>
    %8 = arith.maximumf %6, %7 : vector<64x256xf32>
    %9 = vector.extract_strided_slice %3 {offsets = [0, 768], sizes = [64, 256], strides = [1, 1]} : vector<64x1024xf32> to vector<64x256xf32>
    %10 = arith.maximumf %8, %9 : vector<64x256xf32>
    %c0_4 = arith.constant 0 : index
    %c0_5 = arith.constant 0 : index
    %11 = vector.load %arg3[%c0_4, %c0_5] : memref<64x1xf32, #tpu.memory_space<vmem>>, vector<64x1xf32>
    %12 = vector.broadcast %11 : vector<64x1xf32> to vector<64x256xf32>
    %13 = arith.addf %10, %12 : vector<64x256xf32>
    %cst_6 = arith.constant 0.000000e+00 : f32
    %14 = vector.broadcast %cst_6 : f32 to vector<64x256xf32>
    %15 = arith.maximumf %13, %14 : vector<64x256xf32>
    %c0_7 = arith.constant 0 : index
    %c0_8 = arith.constant 0 : index
    %c0_9 = arith.constant 0 : index
    %16 = vector.load %arg4[%c0_7, %c0_8, %c0_9] : memref<1x64x256xf32, #tpu.memory_space<vmem>>, vector<1x64x256xf32>
    %17 = vector.shape_cast %16 : vector<1x64x256xf32> to vector<64x256xf32>
    %18 = vector.shape_cast %15 : vector<64x256xf32> to vector<1x64x256xf32>
    tpu.vector_store %arg4[%c0_7, %c0_8, %c0_9], %18 {strides = array<i32>} : memref<1x64x256xf32, #tpu.memory_space<vmem>>, vector<1x64x256xf32>,
    return
  }
  func.func @transform_0(%arg0: i32) -> (i32, i32, i32) {
    %c0_i32 = arith.constant 0 : i32
    %c0_i32_0 = arith.constant 0 : i32
    %c0_i32_1 = arith.constant 0 : i32
    return %arg0, %c0_i32, %c0_i32_0 : i32, i32, i32
  }
  func.func @transform_1(%arg0: i32) -> (i32, i32) {
    %c0_i32 = arith.constant 0 : i32
    %c0_i32_0 = arith.constant 0 : i32
    %c0_i32_1 = arith.constant 0 : i32
    return %c0_i32, %c0_i32_0 : i32, i32
  }
  func.func @transform_2(%arg0: i32) -> (i32, i32) {
    %c0_i32 = arith.constant 0 : i32
    %c0_i32_0 = arith.constant 0 : i32
    %c0_i32_1 = arith.constant 0 : i32
    return %c0_i32, %c0_i32_0 : i32, i32
  }
  func.func @transform_3(%arg0: i32) -> (i32, i32, i32) {
    %c0_i32 = arith.constant 0 : i32
    %c0_i32_0 = arith.constant 0 : i32
    %c0_i32_1 = arith.constant 0 : i32
    return %arg0, %c0_i32, %c0_i32_0 : i32, i32, i32
  }
}

module attributes {stable_mosaic.version = 11 : i64} {
  func.func @mlp_kernel(%arg0: i32, %arg1: memref<2x8192xf32, #tpu.memory_space<vmem>>, %arg2: memref<8192x128xbf16, #tpu.memory_space<vmem>>, %arg3: memref<1x128xf32, #tpu.memory_space<vmem>>, %arg4: memref<128x40xf32, #tpu.memory_space<vmem>>, %arg5: memref<1x40xf32, #tpu.memory_space<vmem>>, %arg6: memref<2x40xf32, #tpu.memory_space<vmem>>, %arg7: memref<2x128xf32, #tpu.memory_space<vmem>>) attributes {dimension_semantics = [#tpu.dimension_semantics<arbitrary>], iteration_bounds = array<i64: 2>, scalar_prefetch = 0 : i64, scratch_operands = 1 : i64, tpu.core_type = #tpu.core_type<tc>, window_params = [{transform_indices = @transform_0, window_bounds = array<i64: 2, 8192>}, {transform_indices = @transform_1, window_bounds = array<i64: 8192, 128>}, {pipeline_mode = #tpu.pipeline_mode<synchronous>, transform_indices = @transform_2, window_bounds = array<i64: 1, 128>}, {pipeline_mode = #tpu.pipeline_mode<synchronous>, transform_indices = @transform_3, window_bounds = array<i64: 128, 40>}, {pipeline_mode = #tpu.pipeline_mode<synchronous>, transform_indices = @transform_4, window_bounds = array<i64: 1, 40>}, {pipeline_mode = #tpu.pipeline_mode<synchronous>, transform_indices = @transform_5, window_bounds = array<i64: 2, 40>}]} {
    %c0_i32 = arith.constant 0 : i32
    %0 = arith.cmpi eq, %arg0, %c0_i32 : i32
    %1 = arith.extui %0 : i1 to i32
    %c0_i32_0 = arith.constant 0 : i32
    %2 = arith.cmpi ne, %1, %c0_i32_0 : i32
    scf.if %2 {
      %cst_9 = arith.constant 0.000000e+00 : f32
      %13 = vector.broadcast %cst_9 : f32 to vector<2x128xf32>
      %c0_10 = arith.constant 0 : index
      %c0_11 = arith.constant 0 : index
      %14 = vector.load %arg7[%c0_10, %c0_11] : memref<2x128xf32, #tpu.memory_space<vmem>>, vector<2x128xf32>
      tpu.vector_store %arg7[%c0_10, %c0_11], %13 {strides = array<i32>} : memref<2x128xf32, #tpu.memory_space<vmem>>, vector<2x128xf32>,
    } else {
    }
    %c0 = arith.constant 0 : index
    %c0_1 = arith.constant 0 : index
    %3 = vector.load %arg7[%c0, %c0_1] : memref<2x128xf32, #tpu.memory_space<vmem>>, vector<2x128xf32>
    %c0_2 = arith.constant 0 : index
    %c0_3 = arith.constant 0 : index
    %4 = vector.load %arg1[%c0_2, %c0_3] : memref<2x8192xf32, #tpu.memory_space<vmem>>, vector<2x8192xf32>
    %5 = arith.truncf %4 : vector<2x8192xf32> to vector<2x8192xbf16>
    %c0_4 = arith.constant 0 : index
    %c0_5 = arith.constant 0 : index
    %6 = vector.load %arg2[%c0_4, %c0_5] : memref<8192x128xbf16, #tpu.memory_space<vmem>>, vector<8192x128xbf16>
    %cst = arith.constant dense<0.000000e+00> : vector<2x128xf32>
    %7 = tpu.matmul %5, %6, %cst {dimension_numbers = #tpu.dot_dimension_numbers<[1], [0], [0], [1], [0, 0, 1, 1], [], []>} : vector<2x8192xbf16>, vector<8192x128xbf16>, vector<2x128xf32> -> vector<2x128xf32>
    %8 = arith.addf %3, %7 : vector<2x128xf32>
    %c0_6 = arith.constant 0 : index
    %c0_7 = arith.constant 0 : index
    %9 = vector.load %arg7[%c0_6, %c0_7] : memref<2x128xf32, #tpu.memory_space<vmem>>, vector<2x128xf32>
    tpu.vector_store %arg7[%c0_6, %c0_7], %8 {strides = array<i32>} : memref<2x128xf32, #tpu.memory_space<vmem>>, vector<2x128xf32>,
    %c1_i32 = arith.constant 1 : i32
    %10 = arith.cmpi eq, %arg0, %c1_i32 : i32
    %11 = arith.extui %10 : i1 to i32
    %c0_i32_8 = arith.constant 0 : i32
    %12 = arith.cmpi ne, %11, %c0_i32_8 : i32
    scf.if %12 {
      %c0_9 = arith.constant 0 : index
      %c0_10 = arith.constant 0 : index
      %13 = vector.load %arg7[%c0_9, %c0_10] : memref<2x128xf32, #tpu.memory_space<vmem>>, vector<2x128xf32>
      %c0_11 = arith.constant 0 : index
      %c0_12 = arith.constant 0 : index
      %14 = vector.load %arg3[%c0_11, %c0_12] : memref<1x128xf32, #tpu.memory_space<vmem>>, vector<1x128xf32>
      %15 = vector.broadcast %14 : vector<1x128xf32> to vector<2x128xf32>
      %16 = arith.addf %13, %15 : vector<2x128xf32>
      %cst_13 = arith.constant 0.000000e+00 : f32
      %17 = vector.broadcast %cst_13 : f32 to vector<2x128xf32>
      %18 = arith.maximumf %16, %17 : vector<2x128xf32>
      %c0_14 = arith.constant 0 : index
      %c0_15 = arith.constant 0 : index
      %19 = vector.load %arg4[%c0_14, %c0_15] : memref<128x40xf32, #tpu.memory_space<vmem>>, vector<128x40xf32>
      %cst_16 = arith.constant dense<0.000000e+00> : vector<2x40xf32>
      %20 = tpu.matmul %18, %19, %cst_16 {dimension_numbers = #tpu.dot_dimension_numbers<[1], [0], [0], [1], [0, 0, 1, 1], [], []>} : vector<2x128xf32>, vector<128x40xf32>, vector<2x40xf32> -> vector<2x40xf32>
      %c0_17 = arith.constant 0 : index
      %c0_18 = arith.constant 0 : index
      %21 = vector.load %arg5[%c0_17, %c0_18] : memref<1x40xf32, #tpu.memory_space<vmem>>, vector<1x40xf32>
      %22 = vector.broadcast %21 : vector<1x40xf32> to vector<2x40xf32>
      %23 = arith.addf %20, %22 : vector<2x40xf32>
      %c0_19 = arith.constant 0 : index
      %c0_20 = arith.constant 0 : index
      %24 = vector.load %arg6[%c0_19, %c0_20] : memref<2x40xf32, #tpu.memory_space<vmem>>, vector<2x40xf32>
      tpu.vector_store %arg6[%c0_19, %c0_20], %23 {strides = array<i32>} : memref<2x40xf32, #tpu.memory_space<vmem>>, vector<2x40xf32>,
    } else {
    }
    return
  }
  func.func @transform_0(%arg0: i32) -> (i32, i32) {
    %c0_i32 = arith.constant 0 : i32
    %c0_i32_0 = arith.constant 0 : i32
    return %c0_i32, %arg0 : i32, i32
  }
  func.func @transform_1(%arg0: i32) -> (i32, i32) {
    %c0_i32 = arith.constant 0 : i32
    %c0_i32_0 = arith.constant 0 : i32
    return %arg0, %c0_i32 : i32, i32
  }
  func.func @transform_2(%arg0: i32) -> (i32, i32) {
    %c0_i32 = arith.constant 0 : i32
    %c0_i32_0 = arith.constant 0 : i32
    %c0_i32_1 = arith.constant 0 : i32
    return %c0_i32, %c0_i32_0 : i32, i32
  }
  func.func @transform_3(%arg0: i32) -> (i32, i32) {
    %c0_i32 = arith.constant 0 : i32
    %c0_i32_0 = arith.constant 0 : i32
    %c0_i32_1 = arith.constant 0 : i32
    return %c0_i32, %c0_i32_0 : i32, i32
  }
  func.func @transform_4(%arg0: i32) -> (i32, i32) {
    %c0_i32 = arith.constant 0 : i32
    %c0_i32_0 = arith.constant 0 : i32
    %c0_i32_1 = arith.constant 0 : i32
    return %c0_i32, %c0_i32_0 : i32, i32
  }
  func.func @transform_5(%arg0: i32) -> (i32, i32) {
    %c0_i32 = arith.constant 0 : i32
    %c0_i32_0 = arith.constant 0 : i32
    %c0_i32_1 = arith.constant 0 : i32
    return %c0_i32, %c0_i32_0 : i32, i32
  }
}

</mosaic_0001>

<bundles_post_ra>
// kernel: simple_cnn_forward.3
= control target key start
LH: loop header
LB: loop body
LE: loop exit
PB: predicated region body
PF: predicated region fallthrough
CT: control target
= control target key end

     0   :  { %s2293_s12 = smov 0   ;;  %s3130_s0 = inlined_call_operand.vmem [shape: f32[2,9,4096], index: 0, kind: input, shape index: {}]   ;;  %s3131_s1 = inlined_call_operand.vmem [shape: f32[32,9], index: 1, kind: input, shape index: {}]   ;;  %s3132_s2 = inlined_call_operand.vmem [shape: f32[32,1], index: 2, kind: input, shape index: {}]   ;;  %s3133_s3 = inlined_call_operand.vmem [shape: f32[2,32,1024], index: 3, kind: output, shape index: {}]  }
   0x1 LB: > { %s2044_s13 = sadd.s32 4294967295, %s2268_s12   ;;  %p2048_p0 = scmp.ge.s32.totalorder %s2268_s12, 1  ;;  %s2268_s12 = sphi %s2293_s12, %s13_s12  }
   0x2   : > { %p137_p1 = scmp.lt.s32.totalorder %s2268_s12, 3 }
   0x4   : > { %p138_p2 = pnand %p2048_p0, %p137_p1 }
   0x6   : > { %141 = sbr.rel (%p138_p2) target bundleno = 371 (0x173), region = 32 }
   0xd   : > { %p161_p3 = scmp.lt.s32.totalorder %s2044_s13, 1  ;;  %v2270_v0 = vmov 0.0   ;;  %vm252_vm0 = vcmask 1040384   ;;  %vm2271_vm1 = vmmov 1   ;;  %v2326_v13 = vld [vmem:[%s3131_s1] sm:$0xff]  ;;  %vm239_vm3 = vcmask 72704  }
   0xe   : > { %413 = vmatprep.mubr.f32.mxu0 %v2270_v0  ;;  %502 = vmatprep.mubr.f32.mxu1 %v2270_v0  ;;  %vm2311_vm2 = vmpackc.low %vm252_vm0, %vm2271_vm1  ;;  %v2272_v28 = vmov 0   ;;  %v2361_v34 = vld [vmem:[%s3131_s1 + $0x8] sm:$0xff]  ;;  %v2379_v35 = vld [vmem:[%s3131_s1 + $0x10] sm:$0xff] }
   0xf   : > { %s3205_s13 = smov (!%p161_p3, %s2044_s13), 1  ;;  %2260 = vset.pattern.permute.xlu0 %v2272_v28  ;;  %2261 = vset.pattern.permute.xlu1 %v2272_v28  ;;  %v2390_v36 = vld [vmem:[%s3131_s1 + $0x18] sm:$0xff]  ;;  %v1869_v47 = vld [vmem:[%s3132_s2] sm:$0xff]  ;;  %v1871_v49 = vld [vmem:[%s3132_s2 + $0x10] sm:$0xff] }
  0x10   : > { %s2151_s14 = sshll.u32 %s3205_s13, 9  ;;  %1875 = vperm.xlu0 %2260, %v1869_v47   ;;  %1885 = vperm.xlu1 %2261, %v1871_v49   ;;  %v1870_v51 = vld [vmem:[%s3132_s2 + $0x8] sm:$0xff]  ;;  %v1872_v52 = vld [vmem:[%s3132_s2 + $0x18] sm:$0xff]  ;;  %s2152_s7 = sshll.u32 %s3205_s13, 8 }
  0x11   : > { %s2309_s17 = scalar_lea.vmem %s3130_s0, %s2151_s14  ;;  %s3028_s10 = scalar_lea.vmem %s3133_s3, %s2152_s7 }
  0x12   : > { %v176_v2 = vld [vmem:[%s2309_s17 + $0x8] sm:$0xff]  ;;  %v178_v4 = vld [vmem:[%s2309_s17 + $0x18] sm:$0xff]  ;;  %v175_v7 = vld [vmem:[%s2309_s17] sm:$0xff] }
  0x13   : > { %v208_v3 = vld [vmem:[%s2309_s17 + $0x108] sm:$0x1]  ;;  %v210_v6 = vld [vmem:[%s2309_s17 + $0x118] sm:$0x1]  ;;  %v207_v8 = vld [vmem:[%s2309_s17 + $0x100] sm:$0x1] }
  0x14   : > { %v2153_v5 = vpack.c.bf16 %v208_v3, %v176_v2  ;;  %v2159_v9 = vpack.c.bf16 %v210_v6, %v178_v4  ;;  %v2156_v10 = vpack.c.bf16 %v207_v8, %v175_v7  ;;  %v177_v11 = vld [vmem:[%s2309_s17 + $0x10] sm:$0xff]  ;;  %v180_v14 = vld [vmem:[%s2309_s17 + $0x28] sm:$0xff]  ;;  %v182_v17 = vld [vmem:[%s2309_s17 + $0x38] sm:$0xff]  ;;  %1880 = vperm.xlu0 %2260, %v1870_v51   ;;  %1890 = vperm.xlu1 %2261, %v1872_v52  }
  0x15   : > { %v209_v12 = vld [vmem:[%s2309_s17 + $0x110] sm:$0x1]  ;;  %v212_v16 = vld [vmem:[%s2309_s17 + $0x128] sm:$0x1]  ;;  %v214_v18 = vld [vmem:[%s2309_s17 + $0x138] sm:$0x1] }
  0x16   : > { %2155 = vmatprep.subr.msk.bf16.mxu0 %vm2311_vm2, %v2153_v5  ;;  %v2162_v15 = vpack.c.bf16 %v209_v12, %v177_v11  ;;  %2161 = vmatprep.subr.msk.bf16.mxu1 %vm2311_vm2, %v2159_v9  ;;  %v2165_v19 = vpack.c.bf16 %v212_v16, %v180_v14  ;;  %v2171_v20 = vpack.c.bf16 %v214_v18, %v182_v17  ;;  %v179_v21 = vld [vmem:[%s2309_s17 + $0x20] sm:$0xff]  ;;  %v181_v23 = vld [vmem:[%s2309_s17 + $0x30] sm:$0xff]  ;;  %v184_v26 = vld [vmem:[%s2309_s17 + $0x48] sm:$0xff] }
  0x17   : > { %2158 = vmatpush1.bf16.msk.msra.mxu0 %vm2311_vm2, %v2156_v10  ;;  %v211_v22 = vld [vmem:[%s2309_s17 + $0x120] sm:$0x1]  ;;  %v213_v25 = vld [vmem:[%s2309_s17 + $0x130] sm:$0x1]  ;;  %v216_v27 = vld [vmem:[%s2309_s17 + $0x148] sm:$0x1] }
  0x18   : > { %2164 = vmatpush1.bf16.msk.msra.mxu1 %vm2311_vm2, %v2162_v15  ;;  %v2168_v24 = vpack.c.bf16 %v211_v22, %v179_v21  ;;  %2167 = vmatprep.subr.msk.bf16.mxu0 %vm2311_vm2, %v2165_v19  ;;  %v2174_v29 = vpack.c.bf16 %v213_v25, %v181_v23  ;;  %v2177_v30 = vpack.c.bf16 %v216_v27, %v184_v26  ;;  %v186_v31 = vld [vmem:[%s2309_s17 + $0x58] sm:$0xff]  ;;  %v183_v37 = vld [vmem:[%s2309_s17 + $0x40] sm:$0xff]  ;;  %v185_v39 = vld [vmem:[%s2309_s17 + $0x50] sm:$0xff] }
  0x19   : > { %2173 = vmatprep.subr.msk.bf16.mxu1 %vm2311_vm2, %v2171_v20  ;;  %v218_v32 = vld [vmem:[%s2309_s17 + $0x158] sm:$0x1]  ;;  %v215_v38 = vld [vmem:[%s2309_s17 + $0x140] sm:$0x1]  ;;  %v217_v40 = vld [vmem:[%s2309_s17 + $0x150] sm:$0x1] }
  0x1a   : > { %2055 = vmatmul.mubr.msk.f32.vlgmr.msra.gmra.mrb[0].mxu0 %vm239_vm3, %v2326_v13  ;;  %v2183_v33 = vpack.c.bf16 %v218_v32, %v186_v31  ;;  %v188_v41 = vld [vmem:[%s2309_s17 + $0x68] sm:$0xff]  ;;  %v2180_v43 = vpack.c.bf16 %v215_v38, %v183_v37  ;;  %v190_v44 = vld [vmem:[%s2309_s17 + $0x78] sm:$0xff]  ;;  %v2186_v46 = vpack.c.bf16 %v217_v40, %v185_v39  ;;  %v187_v53 = vld [vmem:[%s2309_s17 + $0x60] sm:$0xff] }
  0x1b   : > { %2061 = vmatmul.mubr.msk.f32.vlgmr.msra.gmra.mrb[0].mxu1 %vm239_vm3, %v2326_v13  ;;  %2170 = vmatpush1.bf16.msk.msra.mxu0 %vm2311_vm2, %v2168_v24  ;;  %v220_v42 = vld [vmem:[%s2309_s17 + $0x168] sm:$0x1]  ;;  %v222_v45 = vld [vmem:[%s2309_s17 + $0x178] sm:$0x1]  ;;  %v219_v54 = vld [vmem:[%s2309_s17 + $0x160] sm:$0x1] }
  0x1c   : > { %2176 = vmatpush1.bf16.msk.msra.mxu1 %vm2311_vm2, %v2174_v29  ;;  %419 = vmatprep.mubr.f32.mxu0 %v2270_v0  ;;  %v2189_v48 = vpack.c.bf16 %v220_v42, %v188_v41  ;;  %v2195_v50 = vpack.c.bf16 %v222_v45, %v190_v44  ;;  %v189_v55 = vld [vmem:[%s2309_s17 + $0x70] sm:$0xff]  ;;  %v192_v57 = vld [vmem:[%s2309_s17 + $0x88] sm:$0xff]  ;;  %v2192_v59 = vpack.c.bf16 %v219_v54, %v187_v53  ;;  %v194_v60 = vld [vmem:[%s2309_s17 + $0x98] sm:$0xff] }
  0x1d   : > { %508 = vmatprep.mubr.f32.mxu1 %v2270_v0  ;;  %2179 = vmatprep.subr.msk.bf16.mxu0 %vm2311_vm2, %v2177_v30  ;;  %v221_v56 = vld [vmem:[%s2309_s17 + $0x170] sm:$0x1]  ;;  %v224_v58 = vld [vmem:[%s2309_s17 + $0x188] sm:$0x1]  ;;  %v226_v61 = vld [vmem:[%s2309_s17 + $0x198] sm:$0x1] }
  0x1e   : > { %2056 = vmatmul.mubr.msk.f32.gmra.mrb[2].mxu0 %vm239_vm3, %v2361_v34  ;;  %2185 = vmatprep.subr.msk.bf16.mxu1 %vm2311_vm2, %v2183_v33  ;;  %v2198_v62 = vpack.c.bf16 %v221_v56, %v189_v55  ;;  %v2201_v63 = vpack.c.bf16 %v224_v58, %v192_v57  ;;  %v2207_v2 = vpack.c.bf16 %v226_v61, %v194_v60  ;;  %v191_v3 = vld [vmem:[%s2309_s17 + $0x80] sm:$0xff]  ;;  %v193_v5 = vld [vmem:[%s2309_s17 + $0x90] sm:$0xff]  ;;  %v196_v7 = vld [vmem:[%s2309_s17 + $0xa8] sm:$0xff] }
  0x1f   : > { %2062 = vmatmul.mubr.msk.f32.gmra.mrb[2].mxu1 %vm239_vm3, %v2361_v34  ;;  %425 = vmatprep.mubr.f32.mxu0 %v2270_v0  ;;  %v223_v4 = vld [vmem:[%s2309_s17 + $0x180] sm:$0x1]  ;;  %v225_v6 = vld [vmem:[%s2309_s17 + $0x190] sm:$0x1]  ;;  %v228_v8 = vld [vmem:[%s2309_s17 + $0x1a8] sm:$0x1] }
  0x20   : > { %514 = vmatprep.mubr.f32.mxu1 %v2270_v0  ;;  %v2204_v9 = vpack.c.bf16 %v223_v4, %v191_v3  ;;  %v198_v10 = vld [vmem:[%s2309_s17 + $0xb8] sm:$0xff]  ;;  %v2210_v12 = vpack.c.bf16 %v225_v6, %v193_v5  ;;  %v2213_v14 = vpack.c.bf16 %v228_v8, %v196_v7  ;;  %v195_v16 = vld [vmem:[%s2309_s17 + $0xa0] sm:$0xff]  ;;  %v197_v18 = vld [vmem:[%s2309_s17 + $0xb0] sm:$0xff] }
  0x21   : > { %v230_v11 = vld [vmem:[%s2309_s17 + $0x1b8] sm:$0x1]  ;;  %v227_v17 = vld [vmem:[%s2309_s17 + $0x1a0] sm:$0x1]  ;;  %v229_v19 = vld [vmem:[%s2309_s17 + $0x1b0] sm:$0x1] }
  0x22   : > { %2057 = vmatmul.mubr.msk.f32.gmra.mrb[4].mxu0 %vm239_vm3, %v2379_v35  ;;  %v2219_v15 = vpack.c.bf16 %v230_v11, %v198_v10  ;;  %v200_v20 = vld [vmem:[%s2309_s17 + $0xc8] sm:$0xff]  ;;  %v2216_v22 = vpack.c.bf16 %v227_v17, %v195_v16  ;;  %v202_v23 = vld [vmem:[%s2309_s17 + $0xd8] sm:$0xff]  ;;  %v2222_v25 = vpack.c.bf16 %v229_v19, %v197_v18  ;;  %v199_v28 = vld [vmem:[%s2309_s17 + $0xc0] sm:$0xff] }
  0x23   : > { %2063 = vmatmul.mubr.msk.f32.gmra.mrb[4].mxu1 %vm239_vm3, %v2379_v35  ;;  %431 = vmatprep.mubr.f32.mxu0 %v2270_v0  ;;  %v232_v21 = vld [vmem:[%s2309_s17 + $0x1c8] sm:$0x1]  ;;  %v234_v24 = vld [vmem:[%s2309_s17 + $0x1d8] sm:$0x1]  ;;  %v231_v29 = vld [vmem:[%s2309_s17 + $0x1c0] sm:$0x1] }
  0x24   : > { %520 = vmatprep.mubr.f32.mxu1 %v2270_v0  ;;  %v2225_v26 = vpack.c.bf16 %v232_v21, %v200_v20  ;;  %v2231_v27 = vpack.c.bf16 %v234_v24, %v202_v23  ;;  %v201_v30 = vld [vmem:[%s2309_s17 + $0xd0] sm:$0xff]  ;;  %v204_v32 = vld [vmem:[%s2309_s17 + $0xe8] sm:$0xff]  ;;  %v2228_v37 = vpack.c.bf16 %v231_v29, %v199_v28  ;;  %v206_v38 = vld [vmem:[%s2309_s17 + $0xf8] sm:$0xff] }
  0x25   : > { %v233_v31 = vld [vmem:[%s2309_s17 + $0x1d0] sm:$0x1]  ;;  %v236_v33 = vld [vmem:[%s2309_s17 + $0x1e8] sm:$0x1]  ;;  %v238_v39 = vld [vmem:[%s2309_s17 + $0x1f8] sm:$0x1] }
  0x26   : > { %2058 = vmatmul.mubr.msk.f32.gmra.mrb[6].mxu0 %vm239_vm3, %v2390_v36  ;;  %v2234_v40 = vpack.c.bf16 %v233_v31, %v201_v30  ;;  %v2237_v41 = vpack.c.bf16 %v236_v33, %v204_v32  ;;  %v2243_v42 = vpack.c.bf16 %v238_v39, %v206_v38  ;;  %v235_v44 = vld [vmem:[%s2309_s17 + $0x1e0] sm:$0x1]  ;;  %v205_v45 = vld [vmem:[%s2309_s17 + $0xf0] sm:$0xff] }
  0x27   : > { %2064 = vmatmul.mubr.msk.f32.gmra.mrb[6].mxu1 %vm239_vm3, %v2390_v36  ;;  %591 = vmatprep.mubr.f32.mxu0 %v2270_v0 }
  0x28   : > { %680 = vmatprep.mubr.f32.mxu1 %v2270_v0 }
  0x2a   : > { %2067 = vmatmul.mubr.msk.f32.vlgmr.msra.gmra.mrb[8].mxu0 %vm239_vm3, %v2326_v13 }
  0x2b   : > { %2073 = vmatmul.mubr.msk.f32.vlgmr.msra.gmra.mrb[8].mxu1 %vm239_vm3, %v2326_v13  ;;  %2182 = vmatpush1.bf16.msk.msra.mxu0 %vm2311_vm2, %v2180_v43  ;;  %v203_v43 = vld [vmem:[%s2309_s17 + $0xe0] sm:$0xff] }
  0x2c   : > { %2188 = vmatpush1.bf16.msk.msra.mxu1 %vm2311_vm2, %v2186_v46  ;;  %597 = vmatprep.mubr.f32.mxu0 %v2270_v0  ;;  %v237_v46 = vld [vmem:[%s2309_s17 + $0x1f0] sm:$0x1]  ;;  %v2240_v47 = vpack.c.bf16 %v235_v44, %v203_v43 }
  0x2d   : > { %686 = vmatprep.mubr.f32.mxu1 %v2270_v0  ;;  %2191 = vmatprep.subr.msk.bf16.mxu0 %vm2311_vm2, %v2189_v48  ;;  %v2246_v48 = vpack.c.bf16 %v237_v46, %v205_v45 }
  0x2e   : > { %2068 = vmatmul.mubr.msk.f32.gmra.mrb[10].mxu0 %vm239_vm3, %v2361_v34  ;;  %2197 = vmatprep.subr.msk.bf16.mxu1 %vm2311_vm2, %v2195_v50 }
  0x2f   : > { %2074 = vmatmul.mubr.msk.f32.gmra.mrb[10].mxu1 %vm239_vm3, %v2361_v34  ;;  %603 = vmatprep.mubr.f32.mxu0 %v2270_v0 }
  0x30   : > { %692 = vmatprep.mubr.f32.mxu1 %v2270_v0 }
  0x32   : > { %2069 = vmatmul.mubr.msk.f32.gmra.mrb[12].mxu0 %vm239_vm3, %v2379_v35 }
  0x33   : > { %2075 = vmatmul.mubr.msk.f32.gmra.mrb[12].mxu1 %vm239_vm3, %v2379_v35  ;;  %609 = vmatprep.mubr.f32.mxu0 %v2270_v0 }
  0x34   : > { %698 = vmatprep.mubr.f32.mxu1 %v2270_v0 }
  0x36   : > { %2070 = vmatmul.mubr.msk.f32.gmra.mrb[14].mxu0 %vm239_vm3, %v2390_v36 }
  0x37   : > { %2076 = vmatmul.mubr.msk.f32.gmra.mrb[14].mxu1 %vm239_vm3, %v2390_v36  ;;  %769 = vmatprep.mubr.f32.mxu0 %v2270_v0 }
  0x38   : > { %858 = vmatprep.mubr.f32.mxu1 %v2270_v0 }
  0x3a   : > { %2079 = vmatmul.mubr.msk.f32.vlgmr.msra.gmra.mrb[16].mxu0 %vm239_vm3, %v2326_v13 }
  0x3b   : > { %2085 = vmatmul.mubr.msk.f32.vlgmr.msra.gmra.mrb[16].mxu1 %vm239_vm3, %v2326_v13  ;;  %2194 = vmatpush1.bf16.msk.msra.mxu0 %vm2311_vm2, %v2192_v59 }
  0x3c   : > { %2200 = vmatpush1.bf16.msk.msra.mxu1 %vm2311_vm2, %v2198_v62  ;;  %775 = vmatprep.mubr.f32.mxu0 %v2270_v0 }
  0x3d   : > { %864 = vmatprep.mubr.f32.mxu1 %v2270_v0  ;;  %2203 = vmatprep.subr.msk.bf16.mxu0 %vm2311_vm2, %v2201_v63 }
  0x3e   : > { %2080 = vmatmul.mubr.msk.f32.gmra.mrb[18].mxu0 %vm239_vm3, %v2361_v34  ;;  %2209 = vmatprep.subr.msk.bf16.mxu1 %vm2311_vm2, %v2207_v2 }
  0x3f   : > { %2086 = vmatmul.mubr.msk.f32.gmra.mrb[18].mxu1 %vm239_vm3, %v2361_v34  ;;  %781 = vmatprep.mubr.f32.mxu0 %v2270_v0 }
  0x40   : > { %870 = vmatprep.mubr.f32.mxu1 %v2270_v0 }
  0x42   : > { %2081 = vmatmul.mubr.msk.f32.gmra.mrb[20].mxu0 %vm239_vm3, %v2379_v35 }
  0x43   : > { %2087 = vmatmul.mubr.msk.f32.gmra.mrb[20].mxu1 %vm239_vm3, %v2379_v35  ;;  %787 = vmatprep.mubr.f32.mxu0 %v2270_v0 }
  0x44   : > { %876 = vmatprep.mubr.f32.mxu1 %v2270_v0 }
  0x46   : > { %2082 = vmatmul.mubr.msk.f32.gmra.mrb[22].mxu0 %vm239_vm3, %v2390_v36 }
  0x47   : > { %2088 = vmatmul.mubr.msk.f32.gmra.mrb[22].mxu1 %vm239_vm3, %v2390_v36  ;;  %947 = vmatprep.mubr.f32.mxu0 %v2270_v0 }
  0x48   : > { %1036 = vmatprep.mubr.f32.mxu1 %v2270_v0 }
  0x4a   : > { %2091 = vmatmul.mubr.msk.f32.vlgmr.msra.gmra.mrb[24].mxu0 %vm239_vm3, %v2326_v13 }
  0x4b   : > { %2097 = vmatmul.mubr.msk.f32.vlgmr.msra.gmra.mrb[24].mxu1 %vm239_vm3, %v2326_v13  ;;  %2206 = vmatpush1.bf16.msk.msra.mxu0 %vm2311_vm2, %v2204_v9 }
  0x4c   : > { %2212 = vmatpush1.bf16.msk.msra.mxu1 %vm2311_vm2, %v2210_v12  ;;  %953 = vmatprep.mubr.f32.mxu0 %v2270_v0 }
  0x4d   : > { %1042 = vmatprep.mubr.f32.mxu1 %v2270_v0  ;;  %2215 = vmatprep.subr.msk.bf16.mxu0 %vm2311_vm2, %v2213_v14 }
  0x4e   : > { %2092 = vmatmul.mubr.msk.f32.gmra.mrb[26].mxu0 %vm239_vm3, %v2361_v34  ;;  %2221 = vmatprep.subr.msk.bf16.mxu1 %vm2311_vm2, %v2219_v15 }
  0x4f   : > { %2098 = vmatmul.mubr.msk.f32.gmra.mrb[26].mxu1 %vm239_vm3, %v2361_v34  ;;  %959 = vmatprep.mubr.f32.mxu0 %v2270_v0 }
  0x50   : > { %1048 = vmatprep.mubr.f32.mxu1 %v2270_v0 }
  0x52   : > { %2093 = vmatmul.mubr.msk.f32.gmra.mrb[28].mxu0 %vm239_vm3, %v2379_v35 }
  0x53   : > { %2099 = vmatmul.mubr.msk.f32.gmra.mrb[28].mxu1 %vm239_vm3, %v2379_v35  ;;  %965 = vmatprep.mubr.f32.mxu0 %v2270_v0 }
  0x54   : > { %1054 = vmatprep.mubr.f32.mxu1 %v2270_v0 }
  0x56   : > { %2094 = vmatmul.mubr.msk.f32.gmra.mrb[30].mxu0 %vm239_vm3, %v2390_v36 }
  0x57   : > { %2100 = vmatmul.mubr.msk.f32.gmra.mrb[30].mxu1 %vm239_vm3, %v2390_v36  ;;  %1125 = vmatprep.mubr.f32.mxu0 %v2270_v0 }
  0x58   : > { %1214 = vmatprep.mubr.f32.mxu1 %v2270_v0 }
  0x5a   : > { %2103 = vmatmul.mubr.msk.f32.vlgmr.msra.gmra.mrb[32].mxu0 %vm239_vm3, %v2326_v13 }
  0x5b   : > { %2109 = vmatmul.mubr.msk.f32.vlgmr.msra.gmra.mrb[32].mxu1 %vm239_vm3, %v2326_v13  ;;  %2218 = vmatpush1.bf16.msk.msra.mxu0 %vm2311_vm2, %v2216_v22 }
  0x5c   : > { %2224 = vmatpush1.bf16.msk.msra.mxu1 %vm2311_vm2, %v2222_v25  ;;  %1131 = vmatprep.mubr.f32.mxu0 %v2270_v0 }
  0x5d   : > { %1220 = vmatprep.mubr.f32.mxu1 %v2270_v0  ;;  %2227 = vmatprep.subr.msk.bf16.mxu0 %vm2311_vm2, %v2225_v26 }
  0x5e   : > { %2104 = vmatmul.mubr.msk.f32.gmra.mrb[34].mxu0 %vm239_vm3, %v2361_v34  ;;  %2233 = vmatprep.subr.msk.bf16.mxu1 %vm2311_vm2, %v2231_v27 }
  0x5f   : > { %2110 = vmatmul.mubr.msk.f32.gmra.mrb[34].mxu1 %vm239_vm3, %v2361_v34  ;;  %1137 = vmatprep.mubr.f32.mxu0 %v2270_v0 }
  0x60   : > { %1226 = vmatprep.mubr.f32.mxu1 %v2270_v0 }
  0x62   : > { %2105 = vmatmul.mubr.msk.f32.gmra.mrb[36].mxu0 %vm239_vm3, %v2379_v35 }
  0x63   : > { %2111 = vmatmul.mubr.msk.f32.gmra.mrb[36].mxu1 %vm239_vm3, %v2379_v35  ;;  %1143 = vmatprep.mubr.f32.mxu0 %v2270_v0 }
  0x64   : > { %1232 = vmatprep.mubr.f32.mxu1 %v2270_v0 }
  0x66   : > { %2106 = vmatmul.mubr.msk.f32.gmra.mrb[38].mxu0 %vm239_vm3, %v2390_v36 }
  0x67   : > { %2112 = vmatmul.mubr.msk.f32.gmra.mrb[38].mxu1 %vm239_vm3, %v2390_v36  ;;  %1303 = vmatprep.mubr.f32.mxu0 %v2270_v0 }
  0x68   : > { %1392 = vmatprep.mubr.f32.mxu1 %v2270_v0 }
  0x6a   : > { %2115 = vmatmul.mubr.msk.f32.vlgmr.msra.gmra.mrb[40].mxu0 %vm239_vm3, %v2326_v13 }
  0x6b   : > { %2121 = vmatmul.mubr.msk.f32.vlgmr.msra.gmra.mrb[40].mxu1 %vm239_vm3, %v2326_v13  ;;  %2230 = vmatpush1.bf16.msk.msra.mxu0 %vm2311_vm2, %v2228_v37 }
  0x6c   : > { %2236 = vmatpush1.bf16.msk.msra.mxu1 %vm2311_vm2, %v2234_v40  ;;  %1309 = vmatprep.mubr.f32.mxu0 %v2270_v0 }
  0x6d   : > { %1398 = vmatprep.mubr.f32.mxu1 %v2270_v0  ;;  %2239 = vmatprep.subr.msk.bf16.mxu0 %vm2311_vm2, %v2237_v41 }
  0x6e   : > { %2116 = vmatmul.mubr.msk.f32.gmra.mrb[42].mxu0 %vm239_vm3, %v2361_v34  ;;  %2245 = vmatprep.subr.msk.bf16.mxu1 %vm2311_vm2, %v2243_v42 }
  0x6f   : > { %2122 = vmatmul.mubr.msk.f32.gmra.mrb[42].mxu1 %vm239_vm3, %v2361_v34  ;;  %1315 = vmatprep.mubr.f32.mxu0 %v2270_v0 }
  0x70   : > { %1404 = vmatprep.mubr.f32.mxu1 %v2270_v0 }
  0x72   : > { %2117 = vmatmul.mubr.msk.f32.gmra.mrb[44].mxu0 %vm239_vm3, %v2379_v35 }
  0x73   : > { %2123 = vmatmul.mubr.msk.f32.gmra.mrb[44].mxu1 %vm239_vm3, %v2379_v35  ;;  %1321 = vmatprep.mubr.f32.mxu0 %v2270_v0 }
  0x74   : > { %1410 = vmatprep.mubr.f32.mxu1 %v2270_v0 }
  0x76   : > { %2118 = vmatmul.mubr.msk.f32.gmra.mrb[46].mxu0 %vm239_vm3, %v2390_v36 }
  0x77   : > { %2124 = vmatmul.mubr.msk.f32.gmra.mrb[46].mxu1 %vm239_vm3, %v2390_v36  ;;  %1481 = vmatprep.mubr.f32.mxu0 %v2270_v0 }
  0x78   : > { %1570 = vmatprep.mubr.f32.mxu1 %v2270_v0 }
  0x7a   : > { %2127 = vmatmul.mubr.msk.f32.vlgmr.msra.gmra.mrb[48].mxu0 %vm239_vm3, %v2326_v13 }
  0x7b   : > { %2133 = vmatmul.mubr.msk.f32.vlgmr.msra.gmra.mrb[48].mxu1 %vm239_vm3, %v2326_v13  ;;  %2242 = vmatpush1.bf16.msk.msra.mxu0 %vm2311_vm2, %v2240_v47 }
  0x7c   : > { %2248 = vmatpush1.bf16.msk.msra.mxu1 %vm2311_vm2, %v2246_v48  ;;  %1487 = vmatprep.mubr.f32.mxu0 %v2270_v0 }
  0x7d   : > { %1576 = vmatprep.mubr.f32.mxu1 %v2270_v0 }
  0x7e   : > { %2128 = vmatmul.mubr.msk.f32.gmra.mrb[50].mxu0 %vm239_vm3, %v2361_v34 }
  0x7f   : > { %2134 = vmatmul.mubr.msk.f32.gmra.mrb[50].mxu1 %vm239_vm3, %v2361_v34  ;;  %1493 = vmatprep.mubr.f32.mxu0 %v2270_v0 }
  0x80   : > { %1582 = vmatprep.mubr.f32.mxu1 %v2270_v0 }
  0x82   : > { %2129 = vmatmul.mubr.msk.f32.gmra.mrb[52].mxu0 %vm239_vm3, %v2379_v35 }
  0x83   : > { %2135 = vmatmul.mubr.msk.f32.gmra.mrb[52].mxu1 %vm239_vm3, %v2379_v35  ;;  %1499 = vmatprep.mubr.f32.mxu0 %v2270_v0 }
  0x84   : > { %1588 = vmatprep.mubr.f32.mxu1 %v2270_v0 }
  0x86   : > { %2130 = vmatmul.mubr.msk.f32.gmra.mrb[54].mxu0 %vm239_vm3, %v2390_v36 }
  0x87   : > { %2136 = vmatmul.mubr.msk.f32.gmra.mrb[54].mxu1 %vm239_vm3, %v2390_v36  ;;  %1659 = vmatprep.mubr.f32.mxu0 %v2270_v0 }
  0x88   : > { %1748 = vmatprep.mubr.f32.mxu1 %v2270_v0 }
  0x8a   : > { %2139 = vmatmul.mubr.msk.f32.vlgmr.msra.gmra.mrb[56].mxu0 %vm239_vm3, %v2326_v13 }
  0x8b   : > { %2145 = vmatmul.mubr.msk.f32.vlgmr.msra.gmra.mrb[56].mxu1 %vm239_vm3, %v2326_v13  ;;  %1665 = vmatprep.mubr.f32.mxu0 %v2270_v0 }
  0x8c   : > { %1754 = vmatprep.mubr.f32.mxu1 %v2270_v0 }
  0x8e   : > { %2140 = vmatmul.mubr.msk.f32.gmra.mrb[58].mxu0 %vm239_vm3, %v2361_v34 }
  0x8f   : > { %2146 = vmatmul.mubr.msk.f32.gmra.mrb[58].mxu1 %vm239_vm3, %v2361_v34  ;;  %1671 = vmatprep.mubr.f32.mxu0 %v2270_v0 }
  0x90   : > { %1760 = vmatprep.mubr.f32.mxu1 %v2270_v0 }
  0x92   : > { %2141 = vmatmul.mubr.msk.f32.gmra.mrb[60].mxu0 %vm239_vm3, %v2379_v35 }
  0x93   : > { %2147 = vmatmul.mubr.msk.f32.gmra.mrb[60].mxu1 %vm239_vm3, %v2379_v35  ;;  %1677 = vmatprep.mubr.f32.mxu0 %v2270_v0 }
  0x94   : > { %1766 = vmatprep.mubr.f32.mxu1 %v2270_v0 }
  0x96   : > { %2142 = vmatmul.mubr.msk.f32.gmra.mrb[62].mxu0 %vm239_vm3, %v2390_v36 }
  0x97   : > { %2148 = vmatmul.mubr.msk.f32.gmra.mrb[62].mxu1 %vm239_vm3, %v2390_v36 }
  0xed   : > { %v2665_v1 = vpop.f32.mrb[0].mxu0 }
  0xee   : > { %v2667_v13 = vpop.f32.mrb[0].mxu1  ;;  %v2669_v34 = vpop.f32.mrb[1].mxu0 }
  0xef   : > { %v2671_v49 = vpop.f32.mrb[1].mxu1 }
  0xf1   : > { %v2673_v50 = vpop.f32.mrb[2].mxu0 }
  0xf2   : > { %v2675_v35 = vpop.f32.mrb[2].mxu1  ;;  %v2677_v51 = vpop.f32.mrb[3].mxu0 }
  0xf3   : > { %v2679_v0 = vpop.f32.mrb[3].mxu1 }
  0xf5   : > { %v2681_v52 = vpop.f32.mrb[4].mxu0 }
  0xf6   : > { %v2683_v53 = vpop.f32.mrb[4].mxu1  ;;  %v2685_v36 = vpop.f32.mrb[5].mxu0 }
  0xf7   : > { %v2687_v54 = vpop.f32.mrb[5].mxu1 }
  0xf9   : > { %v2689_v55 = vpop.f32.mrb[6].mxu0 }
  0xfa   : > { %v2691_v56 = vpop.f32.mrb[6].mxu1  ;;  %v2693_v57 = vpop.f32.mrb[7].mxu0 }
  0xfb   : > { %v2695_v58 = vpop.f32.mrb[7].mxu1 }
  0xfd   : > { %v2697_v59 = vpop.f32.mrb[8].mxu0 }
  0xfe   : > { %v2699_v60 = vpop.f32.mrb[8].mxu1  ;;  %v2701_v61 = vpop.f32.mrb[9].mxu0 }
  0xff   : > { %v2703_v62 = vpop.f32.mrb[9].mxu1 }
 0x101   : > { %v2705_v63 = vpop.f32.mrb[10].mxu0 }
 0x102   : > { %v2707_v2 = vpop.f32.mrb[10].mxu1  ;;  %v2709_v3 = vpop.f32.mrb[11].mxu0 }
 0x103   : > { %v2711_v4 = vpop.f32.mrb[11].mxu1 }
 0x105   : > { %v2713_v5 = vpop.f32.mrb[12].mxu0 }
 0x106   : > { %3148 = vst [vmem:[#allocation2_spill] sm:$0xff] %v2713_v5  ;;  %v2715_v6 = vpop.f32.mrb[12].mxu1  ;;  %v2717_v7 = vpop.f32.mrb[13].mxu0 }
 0x107   : > { %3149 = vst [vmem:[#allocation3_spill] sm:$0xff] %v2717_v7  ;;  %v2719_v8 = vpop.f32.mrb[13].mxu1 }
 0x108   : > { %3150 = vst [vmem:[#allocation4_spill] sm:$0xff] %v2719_v8 }
 0x109   : > { %v2721_v9 = vpop.f32.mrb[14].mxu0 }
 0x10a   : > { %3151 = vst [vmem:[#allocation5_spill] sm:$0xff] %v2721_v9  ;;  %v2723_v10 = vpop.f32.mrb[14].mxu1  ;;  %v2725_v11 = vpop.f32.mrb[15].mxu0 }
 0x10b   : > { %3152 = vst [vmem:[#allocation6_spill] sm:$0xff] %v2725_v11  ;;  %v2727_v12 = vpop.f32.mrb[15].mxu1 }
 0x10d   : > { %v2729_v14 = vpop.f32.mrb[16].mxu0 }
 0x10e   : > { %v2733_v16 = vpop.f32.mrb[16].mxu1  ;;  %v2735_v17 = vpop.f32.mrb[17].mxu0  ;;  %v3160_v8 = vmax.f32 %v2665_v1, %v2729_v14 }
 0x10f   : > { %v2741_v20 = vpop.f32.mrb[17].mxu1  ;;  %v3161_v7 = vmax.f32 %v2667_v13, %v2733_v16  ;;  %v3162_v46 = vmax.f32 %v2669_v34, %v2735_v17 }
 0x110   : > { %v3163_v48 = vmax.f32 %v2671_v49, %v2741_v20 }
 0x111   : > { %v2745_v22 = vpop.f32.mrb[18].mxu0 }
 0x112   : > { %v2749_v24 = vpop.f32.mrb[18].mxu1  ;;  %v2751_v25 = vpop.f32.mrb[19].mxu0 }
 0x113   : > { %v2757_v28 = vpop.f32.mrb[19].mxu1 }
 0x115   : > { %v2761_v30 = vpop.f32.mrb[20].mxu0 }
 0x116   : > { %v2765_v32 = vpop.f32.mrb[20].mxu1  ;;  %v2767_v33 = vpop.f32.mrb[21].mxu0  ;;  %v3168_v20 = vmax.f32 %v2681_v52, %v2761_v30 }
 0x117   : > { %v2773_v39 = vpop.f32.mrb[21].mxu1 }
 0x119   : > { %v2777_v41 = vpop.f32.mrb[22].mxu0 }
 0x11a   : > { %v2781_v43 = vpop.f32.mrb[22].mxu1  ;;  %v2783_v44 = vpop.f32.mrb[23].mxu0  ;;  %v3172_v30 = vmax.f32 %v2689_v55, %v2777_v41 }
 0x11b   : > { %v2789_v47 = vpop.f32.mrb[23].mxu1 }
 0x11d   : > { %v2793_v40 = vpop.f32.mrb[24].mxu0 }
 0x11e   : > { %v2797_v38 = vpop.f32.mrb[24].mxu1  ;;  %v2799_v37 = vpop.f32.mrb[25].mxu0  ;;  %v3176_v41 = vmax.f32 %v2697_v59, %v2793_v40 }
 0x11f   : > { %v2805_v31 = vpop.f32.mrb[25].mxu1 }
 0x121   : > { %v2809_v29 = vpop.f32.mrb[26].mxu0 }
 0x122   : > { %v2813_v27 = vpop.f32.mrb[26].mxu1  ;;  %v2815_v26 = vpop.f32.mrb[27].mxu0  ;;  %v3180_v40 = vmax.f32 %v2705_v63, %v2809_v29  ;;  %v3185_v29 = vld [vmem:[#allocation2_spill] sm:$0xff] }
 0x123   : > { %v2821_v23 = vpop.f32.mrb[27].mxu1 }
 0x124   : > { %3153 = vst [vmem:[#allocation7_spill] sm:$0xff] %v2821_v23 }
 0x125   : > { %v2825_v21 = vpop.f32.mrb[28].mxu0 }
 0x126   : > { %3154 = vst [vmem:[#allocation8_spill] sm:$0xff] %v2825_v21  ;;  %v2829_v19 = vpop.f32.mrb[28].mxu1  ;;  %v2831_v18 = vpop.f32.mrb[29].mxu0 }
 0x127   : > { %3155 = vst [vmem:[#allocation9_spill] sm:$0xff] %v2831_v18  ;;  %v2837_v15 = vpop.f32.mrb[29].mxu1 }
 0x128   : > { %3156 = vst [vmem:[#allocation10_spill] sm:$0xff] %v2837_v15 }
 0x129   : > { %v2841_v23 = vpop.f32.mrb[30].mxu0 }
 0x12a   : > { %3157 = vst [vmem:[#allocation11_spill] sm:$0xff] %v2841_v23  ;;  %v2845_v21 = vpop.f32.mrb[30].mxu1  ;;  %v2847_v5 = vpop.f32.mrb[31].mxu0 }
 0x12b   : > { %3158 = vst [vmem:[#allocation12_spill] sm:$0xff] %v2847_v5  ;;  %v2853_v18 = vpop.f32.mrb[31].mxu1 }
 0x12c   : > { %3159 = vst [vmem:[#allocation13_spill] sm:$0xff] %v2853_v18 }
 0x12d   : > { %v1127_v15 = vpop.f32.mrb[32].mxu0 }
 0x12e   : > { %v2860_v42 = vmax.f32 %v3160_v8, %v1127_v15  ;;  %v1216_v23 = vpop.f32.mrb[32].mxu1  ;;  %v1129_v9 = vpop.f32.mrb[33].mxu0  ;;  %v3164_v8 = vmax.f32 %v2673_v50, %v2745_v22  ;;  %v3165_v15 = vmax.f32 %v2675_v35, %v2749_v24  ;;  %v3169_v24 = vmax.f32 %v2683_v53, %v2765_v32 }
 0x12f   : > { %v2865_v45 = vmax.f32 %v3161_v7, %v1216_v23  ;;  %v2870_v5 = vmax.f32 %v3162_v46, %v1129_v9  ;;  %v1218_v11 = vpop.f32.mrb[33].mxu1  ;;  %v3166_v9 = vmax.f32 %v2677_v51, %v2751_v25  ;;  %v3170_v25 = vmax.f32 %v2685_v36, %v2767_v33 }
 0x130   : > { %v2875_v18 = vmax.f32 %v3163_v48, %v1218_v11  ;;  %v3167_v11 = vmax.f32 %v2679_v0, %v2757_v28  ;;  %v3171_v28 = vmax.f32 %v2687_v54, %v2773_v39  ;;  %v3174_v33 = vmax.f32 %v2693_v57, %v2783_v44 }
 0x131   : > { %v1133_v1 = vpop.f32.mrb[34].mxu0  ;;  %v3175_v39 = vmax.f32 %v2695_v58, %v2789_v47  ;;  %v3178_v44 = vmax.f32 %v2701_v61, %v2799_v37  ;;  %v3179_v47 = vmax.f32 %v2703_v62, %v2805_v31  ;;  %v3182_v37 = vmax.f32 %v2709_v3, %v2815_v26  ;;  %v3183_v31 = vld [vmem:[#allocation7_spill] sm:$0xff] }
 0x132   : > { %v2880_v14 = vmax.f32 %v3164_v8, %v1133_v1  ;;  %v1222_v13 = vpop.f32.mrb[34].mxu1  ;;  %v1135_v7 = vpop.f32.mrb[35].mxu0  ;;  %v3173_v8 = vmax.f32 %v2691_v56, %v2781_v43  ;;  %v3189_v26 = vld [vmem:[#allocation3_spill] sm:$0xff] }
 0x133   : > { %v2885_v34 = vmax.f32 %v3165_v15, %v1222_v13  ;;  %v2890_v16 = vmax.f32 %v3166_v9, %v1135_v7  ;;  %v1224_v49 = vpop.f32.mrb[35].mxu1  ;;  %v3177_v9 = vmax.f32 %v2699_v60, %v2797_v38 }
 0x134   : > { %v2895_v17 = vmax.f32 %v3167_v11, %v1224_v49 }
 0x135   : > { %v1139_v50 = vpop.f32.mrb[36].mxu0 }
 0x136   : > { %v2900_v22 = vmax.f32 %v3168_v20, %v1139_v50  ;;  %v1228_v35 = vpop.f32.mrb[36].mxu1  ;;  %v1141_v23 = vpop.f32.mrb[37].mxu0  ;;  %v3181_v20 = vmax.f32 %v2707_v2, %v2813_v27 }
 0x137   : > { %v2905_v51 = vmax.f32 %v3169_v24, %v1228_v35  ;;  %v2910_v46 = vmax.f32 %v3170_v25, %v1141_v23  ;;  %v1230_v0 = vpop.f32.mrb[37].mxu1  ;;  %v3184_v23 = vmax.f32 %v2711_v4, %v3183_v31  ;;  %v3186_v25 = vld [vmem:[#allocation8_spill] sm:$0xff] }
 0x138   : > { %v2915_v48 = vmax.f32 %v3171_v28, %v1230_v0  ;;  %v3187_v0 = vmax.f32 %v3185_v29, %v3186_v25 }
 0x139   : > { %v1145_v52 = vpop.f32.mrb[38].mxu0 }
 0x13a   : > { %v2920_v1 = vmax.f32 %v3172_v30, %v1145_v52  ;;  %v1234_v53 = vpop.f32.mrb[38].mxu1  ;;  %v1147_v32 = vpop.f32.mrb[39].mxu0  ;;  %v3188_v52 = vmax.f32 %v2715_v6, %v2829_v19  ;;  %v3190_v30 = vld [vmem:[#allocation9_spill] sm:$0xff] }
 0x13b   : > { %v2925_v36 = vmax.f32 %v3173_v8, %v1234_v53  ;;  %v2930_v13 = vmax.f32 %v3174_v33, %v1147_v32  ;;  %v1236_v54 = vpop.f32.mrb[39].mxu1  ;;  %v3191_v53 = vmax.f32 %v3189_v26, %v3190_v30  ;;  %v3192_v8 = vld [vmem:[#allocation4_spill] sm:$0xff]  ;;  %v3193_v33 = vld [vmem:[#allocation10_spill] sm:$0xff] }
 0x13c   : > { %v2935_v7 = vmax.f32 %v3175_v39, %v1236_v54  ;;  %v3194_v54 = vmax.f32 %v3192_v8, %v3193_v33 }
 0x13d   : > { %v1305_v55 = vpop.f32.mrb[40].mxu0 }
 0x13e   : > { %v2940_v15 = vmax.f32 %v3176_v41, %v1305_v55  ;;  %v1394_v56 = vpop.f32.mrb[40].mxu1  ;;  %v1307_v43 = vpop.f32.mrb[41].mxu0  ;;  %v3195_v41 = vld [vmem:[#allocation5_spill] sm:$0xff] }
 0x13f   : > { %v2945_v57 = vmax.f32 %v3177_v9, %v1394_v56  ;;  %v2950_v49 = vmax.f32 %v3178_v44, %v1307_v43  ;;  %v1396_v58 = vpop.f32.mrb[41].mxu1  ;;  %v3196_v56 = vld [vmem:[#allocation11_spill] sm:$0xff]  ;;  %v3198_v44 = vmax.f32 %v2723_v10, %v2845_v21 }
 0x140   : > { %v2955_v11 = vmax.f32 %v3179_v47, %v1396_v58  ;;  %v3197_v43 = vmax.f32 %v3195_v41, %v3196_v56  ;;  %v3199_v47 = vld [vmem:[#allocation6_spill] sm:$0xff]  ;;  %v3038_v41 = vpop.permute.xlu1 %1885 }
 0x141   : > { %v1311_v59 = vpop.f32.mrb[42].mxu0 }
 0x142   : > { %v2960_v50 = vmax.f32 %v3180_v40, %v1311_v59  ;;  %v1400_v60 = vpop.f32.mrb[42].mxu1  ;;  %v1313_v38 = vpop.f32.mrb[43].mxu0  ;;  %v3200_v59 = vld [vmem:[#allocation12_spill] sm:$0xff] }
 0x143   : > { %v2965_v61 = vmax.f32 %v3181_v20, %v1400_v60  ;;  %v2970_v35 = vmax.f32 %v3182_v37, %v1313_v38  ;;  %v1402_v62 = vpop.f32.mrb[43].mxu1  ;;  %v3201_v40 = vmax.f32 %v3199_v47, %v3200_v59  ;;  %v3012_v20 = vpop.permute.xlu0 %1875  ;;  %v3202_v37 = vld [vmem:[#allocation13_spill] sm:$0xff] }
 0x144   : > { %v2975_v24 = vmax.f32 %v3184_v23, %v1402_v62  ;;  %v3203_v62 = vmax.f32 %v2727_v12, %v3202_v37 }
 0x145   : > { %v1317_v63 = vpop.f32.mrb[44].mxu0 }
 0x146   : > { %v2980_v28 = vmax.f32 %v3187_v0, %v1317_v63  ;;  %v1406_v2 = vpop.f32.mrb[44].mxu1  ;;  %v1319_v27 = vpop.f32.mrb[45].mxu0 }
 0x147   : > { %v2985_v3 = vmax.f32 %v3188_v52, %v1406_v2  ;;  %v2990_v32 = vmax.f32 %v3191_v53, %v1319_v27  ;;  %v1408_v4 = vpop.f32.mrb[45].mxu1  ;;  %v3032_v26 = vpop.permute.xlu0 %1880 }
 0x148   : > { %v2995_v39 = vmax.f32 %v3194_v54, %v1408_v4 }
 0x149   : > { %v1323_v55 = vpop.f32.mrb[46].mxu0 }
 0x14a   : > { %v3000_v9 = vmax.f32 %v3197_v43, %v1323_v55  ;;  %v1412_v6 = vpop.f32.mrb[46].mxu1  ;;  %v1325_v19 = vpop.f32.mrb[47].mxu0 }
 0x14b   : > { %v3005_v58 = vmax.f32 %v3198_v44, %v1412_v6  ;;  %v3010_v60 = vmax.f32 %v3201_v40, %v1325_v19  ;;  %v1414_v38 = vpop.f32.mrb[47].mxu1 }
 0x14c   : > { %v3017_v31 = vmax.f32 %v3203_v62, %v1414_v38 }
 0x14d   : > { %v1483_v23 = vpop.f32.mrb[48].mxu0 }
 0x14e   : > { %v1837_v63 = vmax.f32 %v2860_v42, %v1483_v23  ;;  %v1572_v29 = vpop.f32.mrb[48].mxu1  ;;  %v1485_v10 = vpop.f32.mrb[49].mxu0 }
 0x14f   : > { %v1839_v21 = vmax.f32 %v2865_v45, %v1572_v29  ;;  %v1838_v25 = vmax.f32 %v2870_v5, %v1485_v10  ;;  %v1574_v0 = vpop.f32.mrb[49].mxu1 }
 0x150   : > { %v1840_v2 = vmax.f32 %v2875_v18, %v1574_v0  ;;  %v1893_v27 = vadd.f32 %v3012_v20, %v1837_v63  ;;  %v3059_v0 = vpop.permute.xlu1 %1890 }
 0x151   : > { %v1894_v12 = vadd.f32 %v3012_v20, %v1838_v25  ;;  %v1895_v42 = vadd.f32 %v3012_v20, %v1839_v21  ;;  %v1489_v52 = vpop.f32.mrb[50].mxu0 }
 0x152   : > { %v1896_v5 = vadd.f32 %v3012_v20, %v1840_v2  ;;  %v1925_v18 = vmax.f32 %v1893_v27, 0.0  ;;  %v1845_v45 = vmax.f32 %v2880_v14, %v1489_v52  ;;  %v1578_v30 = vpop.f32.mrb[50].mxu1  ;;  %v1491_v53 = vpop.f32.mrb[51].mxu0 }
 0x153   : > { %v1926_v4 = vmax.f32 %v1894_v12, 0.0  ;;  %v1927_v8 = vmax.f32 %v1895_v42, 0.0  ;;  %v1847_v33 = vmax.f32 %v2885_v34, %v1578_v30  ;;  %v1846_v54 = vmax.f32 %v2890_v16, %v1491_v53  ;;  %v1580_v55 = vpop.f32.mrb[51].mxu1 }
 0x154   : > { %v1928_v56 = vmax.f32 %v1896_v5, 0.0  ;;  %1957 = vst [vmem:[%s3028_s10] sm:$0xff] %v1925_v18  ;;  %v1848_v43 = vmax.f32 %v2895_v17, %v1580_v55  ;;  %v1901_v6 = vadd.f32 %v3032_v26, %v1845_v45 }
 0x155   : > { %1958 = vst [vmem:[%s3028_s10 + $0x8] sm:$0xff] %v1926_v4  ;;  %1959 = vst [vmem:[%s3028_s10 + $0x10] sm:$0xff] %v1927_v8  ;;  %v1902_v14 = vadd.f32 %v3032_v26, %v1846_v54  ;;  %v1903_v19 = vadd.f32 %v3032_v26, %v1847_v33  ;;  %v1495_v44 = vpop.f32.mrb[52].mxu0 }
 0x156   : > { %1960 = vst [vmem:[%s3028_s10 + $0x18] sm:$0xff] %v1928_v56  ;;  %v1904_v34 = vadd.f32 %v3032_v26, %v1848_v43  ;;  %v1933_v16 = vmax.f32 %v1901_v6, 0.0  ;;  %v1853_v47 = vmax.f32 %v2900_v22, %v1495_v44  ;;  %v1584_v59 = vpop.f32.mrb[52].mxu1  ;;  %v1497_v17 = vpop.f32.mrb[53].mxu0 }
 0x157   : > { %v1934_v40 = vmax.f32 %v1902_v14, 0.0  ;;  %v1935_v38 = vmax.f32 %v1903_v19, 0.0  ;;  %v1855_v37 = vmax.f32 %v2905_v51, %v1584_v59  ;;  %v1854_v62 = vmax.f32 %v2910_v46, %v1497_v17  ;;  %v1586_v23 = vpop.f32.mrb[53].mxu1 }
 0x158   : > { %v1936_v63 = vmax.f32 %v1904_v34, 0.0  ;;  %1965 = vst [vmem:[%s3028_s10 + $0x40] sm:$0xff] %v1933_v16  ;;  %v1856_v29 = vmax.f32 %v2915_v48, %v1586_v23  ;;  %v1909_v10 = vadd.f32 %v3038_v41, %v1853_v47 }
 0x159   : > { %1966 = vst [vmem:[%s3028_s10 + $0x48] sm:$0xff] %v1934_v40  ;;  %1967 = vst [vmem:[%s3028_s10 + $0x50] sm:$0xff] %v1935_v38  ;;  %v1910_v22 = vadd.f32 %v3038_v41, %v1854_v62  ;;  %v1911_v21 = vadd.f32 %v3038_v41, %v1855_v37  ;;  %v1501_v25 = vpop.f32.mrb[54].mxu0 }
 0x15a   : > { %1968 = vst [vmem:[%s3028_s10 + $0x58] sm:$0xff] %v1936_v63  ;;  %v1912_v51 = vadd.f32 %v3038_v41, %v1856_v29  ;;  %v1941_v46 = vmax.f32 %v1909_v10, 0.0  ;;  %v1861_v48 = vmax.f32 %v2920_v1, %v1501_v25  ;;  %v1590_v2 = vpop.f32.mrb[54].mxu1  ;;  %v1503_v27 = vpop.f32.mrb[55].mxu0 }
 0x15b   : > { %v1942_v12 = vmax.f32 %v1910_v22, 0.0  ;;  %v1943_v42 = vmax.f32 %v1911_v21, 0.0  ;;  %v1863_v52 = vmax.f32 %v2925_v36, %v1590_v2  ;;  %v1862_v5 = vmax.f32 %v2930_v13, %v1503_v27  ;;  %v1592_v18 = vpop.f32.mrb[55].mxu1 }
 0x15c   : > { %v1944_v45 = vmax.f32 %v1912_v51, 0.0  ;;  %1973 = vst [vmem:[%s3028_s10 + $0x80] sm:$0xff] %v1941_v46  ;;  %v1864_v30 = vmax.f32 %v2935_v7, %v1592_v18  ;;  %v1917_v53 = vadd.f32 %v3059_v0, %v1861_v48 }
 0x15d   : > { %1974 = vst [vmem:[%s3028_s10 + $0x88] sm:$0xff] %v1942_v12  ;;  %1975 = vst [vmem:[%s3028_s10 + $0x90] sm:$0xff] %v1943_v42  ;;  %v1918_v1 = vadd.f32 %v3059_v0, %v1862_v5  ;;  %v1919_v4 = vadd.f32 %v3059_v0, %v1863_v52  ;;  %v1661_v8 = vpop.f32.mrb[56].mxu0 }
 0x15e   : > { %1976 = vst [vmem:[%s3028_s10 + $0x98] sm:$0xff] %v1944_v45  ;;  %v1920_v36 = vadd.f32 %v3059_v0, %v1864_v30  ;;  %v1949_v13 = vmax.f32 %v1917_v53, 0.0  ;;  %v1841_v33 = vmax.f32 %v2940_v15, %v1661_v8  ;;  %v1750_v54 = vpop.f32.mrb[56].mxu1  ;;  %v1663_v7 = vpop.f32.mrb[57].mxu0 }
 0x15f   : > { %v1950_v55 = vmax.f32 %v1918_v1, 0.0  ;;  %v1951_v56 = vmax.f32 %v1919_v4, 0.0  ;;  %v1843_v43 = vmax.f32 %v2945_v57, %v1750_v54  ;;  %v1842_v6 = vmax.f32 %v2950_v49, %v1663_v7  ;;  %v1752_v14 = vpop.f32.mrb[57].mxu1 }
 0x160   : > { %v1952_v19 = vmax.f32 %v1920_v36, 0.0  ;;  %1981 = vst [vmem:[%s3028_s10 + $0xc0] sm:$0xff] %v1949_v13  ;;  %v1897_v44 = vadd.f32 %v3012_v20, %v1841_v33  ;;  %v1844_v34 = vmax.f32 %v2955_v11, %v1752_v14 }
 0x161   : > { %1982 = vst [vmem:[%s3028_s10 + $0xc8] sm:$0xff] %v1950_v55  ;;  %1983 = vst [vmem:[%s3028_s10 + $0xd0] sm:$0xff] %v1951_v56  ;;  %v1899_v15 = vadd.f32 %v3012_v20, %v1843_v43  ;;  %v1898_v16 = vadd.f32 %v3012_v20, %v1842_v6  ;;  %v1667_v47 = vpop.f32.mrb[58].mxu0 }
 0x162   : > { %1984 = vst [vmem:[%s3028_s10 + $0xd8] sm:$0xff] %v1952_v19  ;;  %v1929_v57 = vmax.f32 %v1897_v44, 0.0  ;;  %v1900_v49 = vadd.f32 %v3012_v20, %v1844_v34  ;;  %v1849_v59 = vmax.f32 %v2960_v50, %v1667_v47  ;;  %v1756_v17 = vpop.f32.mrb[58].mxu1  ;;  %v1669_v40 = vpop.f32.mrb[59].mxu0 }
 0x163   : > { %v1931_v11 = vmax.f32 %v1899_v15, 0.0  ;;  %v1930_v38 = vmax.f32 %v1898_v16, 0.0  ;;  %v1851_v37 = vmax.f32 %v2965_v61, %v1756_v17  ;;  %v1850_v62 = vmax.f32 %v2970_v35, %v1669_v40  ;;  %v1758_v23 = vpop.f32.mrb[59].mxu1 }
 0x164   : > { %1961 = vst [vmem:[%s3028_s10 + $0x20] sm:$0xff] %v1929_v57  ;;  %v1932_v63 = vmax.f32 %v1900_v49, 0.0  ;;  %v1905_v29 = vadd.f32 %v3032_v26, %v1849_v59  ;;  %v1852_v10 = vmax.f32 %v2975_v24, %v1758_v23 }
 0x165   : > { %1963 = vst [vmem:[%s3028_s10 + $0x30] sm:$0xff] %v1931_v11  ;;  %1962 = vst [vmem:[%s3028_s10 + $0x28] sm:$0xff] %v1930_v38  ;;  %v1907_v50 = vadd.f32 %v3032_v26, %v1851_v37  ;;  %v1906_v20 = vadd.f32 %v3032_v26, %v1850_v62  ;;  %v1673_v22 = vpop.f32.mrb[60].mxu0 }
 0x166   : > { %1964 = vst [vmem:[%s3028_s10 + $0x38] sm:$0xff] %v1932_v63  ;;  %v1937_v61 = vmax.f32 %v1905_v29, 0.0  ;;  %v1908_v35 = vadd.f32 %v3032_v26, %v1852_v10  ;;  %v1857_v21 = vmax.f32 %v2980_v28, %v1673_v22  ;;  %v1762_v25 = vpop.f32.mrb[60].mxu1  ;;  %v1675_v51 = vpop.f32.mrb[61].mxu0 }
 0x167   : > { %v1939_v24 = vmax.f32 %v1907_v50, 0.0  ;;  %v1938_v46 = vmax.f32 %v1906_v20, 0.0  ;;  %v1859_v48 = vmax.f32 %v2985_v3, %v1762_v25  ;;  %v1858_v2 = vmax.f32 %v2990_v32, %v1675_v51  ;;  %v1764_v27 = vpop.f32.mrb[61].mxu1 }
 0x168   : > { %1969 = vst [vmem:[%s3028_s10 + $0x60] sm:$0xff] %v1937_v61  ;;  %v1940_v12 = vmax.f32 %v1908_v35, 0.0  ;;  %v1913_v42 = vadd.f32 %v3038_v41, %v1857_v21  ;;  %v1860_v52 = vmax.f32 %v2995_v39, %v1764_v27 }
 0x169   : > { %1971 = vst [vmem:[%s3028_s10 + $0x70] sm:$0xff] %v1939_v24  ;;  %1970 = vst [vmem:[%s3028_s10 + $0x68] sm:$0xff] %v1938_v46  ;;  %v1915_v28 = vadd.f32 %v3038_v41, %v1859_v48  ;;  %v1914_v26 = vadd.f32 %v3038_v41, %v1858_v2  ;;  %v1679_v5 = vpop.f32.mrb[62].mxu0 }
 0x16a   : > { %1972 = vst [vmem:[%s3028_s10 + $0x78] sm:$0xff] %v1940_v12  ;;  %v1945_v3 = vmax.f32 %v1913_v42, 0.0  ;;  %v1916_v32 = vadd.f32 %v3038_v41, %v1860_v52  ;;  %v1865_v18 = vmax.f32 %v3000_v9, %v1679_v5  ;;  %v1768_v45 = vpop.f32.mrb[62].mxu1  ;;  %v1681_v30 = vpop.f32.mrb[63].mxu0 }
 0x16b   : > { %v1947_v39 = vmax.f32 %v1915_v28, 0.0  ;;  %v1946_v53 = vmax.f32 %v1914_v26, 0.0  ;;  %v1867_v1 = vmax.f32 %v3005_v58, %v1768_v45  ;;  %v1866_v4 = vmax.f32 %v3010_v60, %v1681_v30  ;;  %v1770_v8 = vpop.f32.mrb[63].mxu1 }
 0x16c   : > { %1977 = vst [vmem:[%s3028_s10 + $0xa0] sm:$0xff] %v1945_v3  ;;  %v1948_v36 = vmax.f32 %v1916_v32, 0.0  ;;  %v1921_v41 = vadd.f32 %v3059_v0, %v1865_v18  ;;  %v1868_v9 = vmax.f32 %v3017_v31, %v1770_v8 }
 0x16d   : > { %1979 = vst [vmem:[%s3028_s10 + $0xb0] sm:$0xff] %v1947_v39  ;;  %1978 = vst [vmem:[%s3028_s10 + $0xa8] sm:$0xff] %v1946_v53  ;;  %v1923_v13 = vadd.f32 %v3059_v0, %v1867_v1  ;;  %v1922_v33 = vadd.f32 %v3059_v0, %v1866_v4 }
 0x16e   : > { %1980 = vst [vmem:[%s3028_s10 + $0xb8] sm:$0xff] %v1948_v36  ;;  %v1953_v58 = vmax.f32 %v1921_v41, 0.0  ;;  %v1924_v60 = vadd.f32 %v3059_v0, %v1868_v9 }
 0x16f   : > { %v1955_v54 = vmax.f32 %v1923_v13, 0.0  ;;  %v1954_v7 = vmax.f32 %v1922_v33, 0.0 }
 0x170   : > { %1985 = vst [vmem:[%s3028_s10 + $0xe0] sm:$0xff] %v1953_v58  ;;  %v1956_v55 = vmax.f32 %v1924_v60, 0.0 }
 0x171   : > { %1987 = vst [vmem:[%s3028_s10 + $0xf0] sm:$0xff] %v1955_v54  ;;  %1986 = vst [vmem:[%s3028_s10 + $0xe8] sm:$0xff] %v1954_v7 }
 0x172   : > { %1988 = vst [vmem:[%s3028_s10 + $0xf8] sm:$0xff] %v1956_v55 }
 0x173 PF: > { %s13_s12 = sadd.s32 1, %s2268_s12  }
 0x174   : > { %p10_p4 = scmp.ge.s32.totalorder %s13_s12, 4  }
 0x176   :  { %12 = sbr.rel (!%p10_p4) target bundleno = 1 (0x1), region = 62 }

// kernel: simple_cnn_forward.4
= control target key start
LH: loop header
LB: loop body
LE: loop exit
PB: predicated region body
PF: predicated region fallthrough
CT: control target
= control target key end

     0   :  { %s2050_s12 = smov 0   ;;  %s2785_s0 = inlined_call_operand.vmem [shape: f32[2,288,1024], index: 0, kind: input, shape index: {}]   ;;  %s2786_s1 = inlined_call_operand.vmem [shape: f32[64,288], index: 1, kind: input, shape index: {}]   ;;  %s2787_s2 = inlined_call_operand.vmem [shape: f32[64,1], index: 2, kind: input, shape index: {}]   ;;  %s2788_s3 = inlined_call_operand.vmem [shape: f32[2,64,256], index: 3, kind: output, shape index: {}]  }
   0x1 LB: > { %s1611_s13 = sadd.s32 4294967295, %s2026_s12   ;;  %p1615_p0 = scmp.ge.s32.totalorder %s2026_s12, 1  ;;  %s2026_s12 = sphi %s2050_s12, %s13_s12  }
   0x2   : > { %p137_p1 = scmp.lt.s32.totalorder %s2026_s12, 3 }
   0x4   : > { %p138_p2 = pnand %p1615_p0, %p137_p1 }
   0x5   : > { %p161_p3 = scmp.lt.s32.totalorder (!%p138_p2), %s1611_s13, 1  ;;  %v172_v0 = vld [vmem:[%s2786_s1 + $0x8] sm:$0xff] (!%p138_p2)  ;;  %vm483_vm0 = vcmask (!%p138_p2), 261120  }
   0x6   : > { %141 = sbr.rel (%p138_p2) target bundleno = 463 (0x1cf), region = 32  ;;  %572 = vmatprep.mubr.f32.mxu0 (!%p138_p2), %v172_v0  ;;  %798 = vmatprep.mubr.f32.mxu1 (!%p138_p2), %v172_v0 }
   0xd   : > { %s2790_s13 = smov (!%p161_p3, %s1611_s13), 1 }
   0xe   : > { %s2006_s16 = smul.u32 2304, %s2790_s13 }
  0x10   : > { %s2067_s19 = scalar_lea.vmem %s2785_s0, %s2006_s16 }
  0x11   : > { %v196_v1 = vld [vmem:[%s2067_s19 + $0x8] sm:$0xff]  ;;  %v198_v3 = vld [vmem:[%s2067_s19 + $0x18] sm:$0xff]  ;;  %v195_v6 = vld [vmem:[%s2067_s19] sm:$0xff] }
  0x12   : > { %v204_v2 = vld [vmem:[%s2067_s19 + $0x48] sm:$0xff]  ;;  %v206_v5 = vld [vmem:[%s2067_s19 + $0x58] sm:$0xff]  ;;  %v203_v7 = vld [vmem:[%s2067_s19 + $0x40] sm:$0xff] }
  0x13   : > { %v1654_v4 = vpack.c.bf16 %v204_v2, %v196_v1  ;;  %v1726_v8 = vpack.c.bf16 %v206_v5, %v198_v3  ;;  %v1656_v9 = vpack.c.bf16 %v203_v7, %v195_v6  ;;  %v197_v10 = vld [vmem:[%s2067_s19 + $0x10] sm:$0xff]  ;;  %v212_v12 = vld [vmem:[%s2067_s19 + $0x88] sm:$0xff]  ;;  %v214_v15 = vld [vmem:[%s2067_s19 + $0x98] sm:$0xff] }
  0x14   : > { %v205_v11 = vld [vmem:[%s2067_s19 + $0x50] sm:$0xff]  ;;  %v220_v14 = vld [vmem:[%s2067_s19 + $0xc8] sm:$0xff]  ;;  %v222_v16 = vld [vmem:[%s2067_s19 + $0xd8] sm:$0xff] }
  0x15   : > { %1655 = vmatprep.subr.bf16.mxu0 %v1654_v4  ;;  %v1728_v13 = vpack.c.bf16 %v205_v11, %v197_v10  ;;  %1727 = vmatprep.subr.bf16.mxu1 %v1726_v8  ;;  %v1658_v17 = vpack.c.bf16 %v220_v14, %v212_v12  ;;  %v1730_v18 = vpack.c.bf16 %v222_v16, %v214_v15  ;;  %v211_v19 = vld [vmem:[%s2067_s19 + $0x80] sm:$0xff]  ;;  %v213_v21 = vld [vmem:[%s2067_s19 + $0x90] sm:$0xff]  ;;  %v228_v24 = vld [vmem:[%s2067_s19 + $0x108] sm:$0xff] }
  0x16   : > { %1657 = vmatpush1.bf16.msra.mxu0 %v1656_v9  ;;  %v219_v20 = vld [vmem:[%s2067_s19 + $0xc0] sm:$0xff]  ;;  %v221_v23 = vld [vmem:[%s2067_s19 + $0xd0] sm:$0xff]  ;;  %v236_v25 = vld [vmem:[%s2067_s19 + $0x148] sm:$0xff] }
  0x17   : > { %1729 = vmatpush1.bf16.msra.mxu1 %v1728_v13  ;;  %v1660_v22 = vpack.c.bf16 %v219_v20, %v211_v19  ;;  %1659 = vmatprep.subr.bf16.mxu0 %v1658_v17  ;;  %v1732_v26 = vpack.c.bf16 %v221_v23, %v213_v21  ;;  %v1662_v27 = vpack.c.bf16 %v236_v25, %v228_v24  ;;  %v230_v28 = vld [vmem:[%s2067_s19 + $0x118] sm:$0xff]  ;;  %v227_v30 = vld [vmem:[%s2067_s19 + $0x100] sm:$0xff]  ;;  %v229_v33 = vld [vmem:[%s2067_s19 + $0x110] sm:$0xff] }
  0x18   : > { %1731 = vmatprep.subr.bf16.mxu1 %v1730_v18  ;;  %v238_v29 = vld [vmem:[%s2067_s19 + $0x158] sm:$0xff]  ;;  %v235_v32 = vld [vmem:[%s2067_s19 + $0x140] sm:$0xff]  ;;  %v237_v34 = vld [vmem:[%s2067_s19 + $0x150] sm:$0xff] }
  0x19   : > { %v1734_v31 = vpack.c.bf16 %v238_v29, %v230_v28  ;;  %v1664_v35 = vpack.c.bf16 %v235_v32, %v227_v30  ;;  %v244_v36 = vld [vmem:[%s2067_s19 + $0x188] sm:$0xff]  ;;  %v246_v38 = vld [vmem:[%s2067_s19 + $0x198] sm:$0xff]  ;;  %v1736_v39 = vpack.c.bf16 %v237_v34, %v229_v33  ;;  %v243_v42 = vld [vmem:[%s2067_s19 + $0x180] sm:$0xff] }
  0x1a   : > { %1661 = vmatpush1.bf16.msra.mxu0 %v1660_v22  ;;  %v252_v37 = vld [vmem:[%s2067_s19 + $0x1c8] sm:$0xff]  ;;  %v254_v41 = vld [vmem:[%s2067_s19 + $0x1d8] sm:$0xff]  ;;  %v251_v43 = vld [vmem:[%s2067_s19 + $0x1c0] sm:$0xff] }
  0x1b   : > { %1733 = vmatpush1.bf16.msra.mxu1 %v1732_v26  ;;  %1663 = vmatprep.subr.bf16.mxu0 %v1662_v27  ;;  %v1666_v40 = vpack.c.bf16 %v252_v37, %v244_v36  ;;  %v1738_v44 = vpack.c.bf16 %v254_v41, %v246_v38  ;;  %v245_v45 = vld [vmem:[%s2067_s19 + $0x190] sm:$0xff]  ;;  %v260_v47 = vld [vmem:[%s2067_s19 + $0x208] sm:$0xff]  ;;  %v262_v49 = vld [vmem:[%s2067_s19 + $0x218] sm:$0xff]  ;;  %v1668_v51 = vpack.c.bf16 %v251_v43, %v243_v42 }
  0x1c   : > { %1735 = vmatprep.subr.bf16.mxu1 %v1734_v31  ;;  %v253_v46 = vld [vmem:[%s2067_s19 + $0x1d0] sm:$0xff]  ;;  %v268_v48 = vld [vmem:[%s2067_s19 + $0x248] sm:$0xff]  ;;  %v270_v50 = vld [vmem:[%s2067_s19 + $0x258] sm:$0xff] }
  0x1d   : > { %v1740_v52 = vpack.c.bf16 %v253_v46, %v245_v45  ;;  %v1670_v53 = vpack.c.bf16 %v268_v48, %v260_v47  ;;  %v259_v54 = vld [vmem:[%s2067_s19 + $0x200] sm:$0xff]  ;;  %v261_v56 = vld [vmem:[%s2067_s19 + $0x210] sm:$0xff]  ;;  %v1742_v57 = vpack.c.bf16 %v270_v50, %v262_v49  ;;  %v276_v59 = vld [vmem:[%s2067_s19 + $0x288] sm:$0xff] }
  0x1e   : > { %1665 = vmatpush1.bf16.msra.mxu0 %v1664_v35  ;;  %v267_v55 = vld [vmem:[%s2067_s19 + $0x240] sm:$0xff]  ;;  %v269_v58 = vld [vmem:[%s2067_s19 + $0x250] sm:$0xff]  ;;  %v284_v60 = vld [vmem:[%s2067_s19 + $0x2c8] sm:$0xff] }
  0x1f   : > { %1737 = vmatpush1.bf16.msra.mxu1 %v1736_v39  ;;  %1667 = vmatprep.subr.bf16.mxu0 %v1666_v40  ;;  %v278_v61 = vld [vmem:[%s2067_s19 + $0x298] sm:$0xff]  ;;  %v1672_v63 = vpack.c.bf16 %v267_v55, %v259_v54  ;;  %v1744_v0 = vpack.c.bf16 %v269_v58, %v261_v56  ;;  %v1674_v1 = vpack.c.bf16 %v284_v60, %v276_v59  ;;  %v275_v2 = vld [vmem:[%s2067_s19 + $0x280] sm:$0xff]  ;;  %v277_v4 = vld [vmem:[%s2067_s19 + $0x290] sm:$0xff] }
  0x20   : > { %1739 = vmatprep.subr.bf16.mxu1 %v1738_v44  ;;  %v286_v62 = vld [vmem:[%s2067_s19 + $0x2d8] sm:$0xff]  ;;  %v283_v3 = vld [vmem:[%s2067_s19 + $0x2c0] sm:$0xff]  ;;  %v285_v6 = vld [vmem:[%s2067_s19 + $0x2d0] sm:$0xff] }
  0x21   : > { %v1746_v5 = vpack.c.bf16 %v286_v62, %v278_v61  ;;  %v292_v7 = vld [vmem:[%s2067_s19 + $0x308] sm:$0xff]  ;;  %v294_v9 = vld [vmem:[%s2067_s19 + $0x318] sm:$0xff]  ;;  %v1676_v11 = vpack.c.bf16 %v283_v3, %v275_v2  ;;  %v1748_v12 = vpack.c.bf16 %v285_v6, %v277_v4  ;;  %v291_v14 = vld [vmem:[%s2067_s19 + $0x300] sm:$0xff] }
  0x22   : > { %1669 = vmatpush1.bf16.msra.mxu0 %v1668_v51  ;;  %v300_v8 = vld [vmem:[%s2067_s19 + $0x348] sm:$0xff]  ;;  %v302_v10 = vld [vmem:[%s2067_s19 + $0x358] sm:$0xff]  ;;  %v299_v15 = vld [vmem:[%s2067_s19 + $0x340] sm:$0xff] }
  0x23   : > { %1741 = vmatpush1.bf16.msra.mxu1 %v1740_v52  ;;  %1671 = vmatprep.subr.bf16.mxu0 %v1670_v53  ;;  %v1678_v13 = vpack.c.bf16 %v300_v8, %v292_v7  ;;  %v293_v16 = vld [vmem:[%s2067_s19 + $0x310] sm:$0xff]  ;;  %v1750_v17 = vpack.c.bf16 %v302_v10, %v294_v9  ;;  %v308_v19 = vld [vmem:[%s2067_s19 + $0x388] sm:$0xff]  ;;  %v310_v21 = vld [vmem:[%s2067_s19 + $0x398] sm:$0xff]  ;;  %v1680_v23 = vpack.c.bf16 %v299_v15, %v291_v14 }
  0x24   : > { %1743 = vmatprep.subr.bf16.mxu1 %v1742_v57  ;;  %v301_v18 = vld [vmem:[%s2067_s19 + $0x350] sm:$0xff]  ;;  %v316_v20 = vld [vmem:[%s2067_s19 + $0x3c8] sm:$0xff]  ;;  %v318_v22 = vld [vmem:[%s2067_s19 + $0x3d8] sm:$0xff] }
  0x25   : > { %v1752_v24 = vpack.c.bf16 %v301_v18, %v293_v16  ;;  %v1682_v25 = vpack.c.bf16 %v316_v20, %v308_v19  ;;  %v307_v26 = vld [vmem:[%s2067_s19 + $0x380] sm:$0xff]  ;;  %v309_v28 = vld [vmem:[%s2067_s19 + $0x390] sm:$0xff]  ;;  %v1754_v29 = vpack.c.bf16 %v318_v22, %v310_v21  ;;  %v324_v31 = vld [vmem:[%s2067_s19 + $0x408] sm:$0xff] }
  0x26   : > { %1673 = vmatpush1.bf16.msra.mxu0 %v1672_v63  ;;  %v315_v27 = vld [vmem:[%s2067_s19 + $0x3c0] sm:$0xff]  ;;  %v317_v30 = vld [vmem:[%s2067_s19 + $0x3d0] sm:$0xff]  ;;  %v332_v32 = vld [vmem:[%s2067_s19 + $0x448] sm:$0xff] }
  0x27   : > { %1745 = vmatpush1.bf16.msra.mxu1 %v1744_v0  ;;  %1675 = vmatprep.subr.bf16.mxu0 %v1674_v1  ;;  %v326_v33 = vld [vmem:[%s2067_s19 + $0x418] sm:$0xff]  ;;  %v1684_v35 = vpack.c.bf16 %v315_v27, %v307_v26  ;;  %v1756_v36 = vpack.c.bf16 %v317_v30, %v309_v28  ;;  %v1686_v37 = vpack.c.bf16 %v332_v32, %v324_v31  ;;  %v323_v38 = vld [vmem:[%s2067_s19 + $0x400] sm:$0xff]  ;;  %v325_v40 = vld [vmem:[%s2067_s19 + $0x410] sm:$0xff] }
  0x28   : > { %1747 = vmatprep.subr.bf16.mxu1 %v1746_v5  ;;  %v334_v34 = vld [vmem:[%s2067_s19 + $0x458] sm:$0xff]  ;;  %v331_v39 = vld [vmem:[%s2067_s19 + $0x440] sm:$0xff]  ;;  %v333_v42 = vld [vmem:[%s2067_s19 + $0x450] sm:$0xff] }
  0x29   : > { %v1758_v41 = vpack.c.bf16 %v334_v34, %v326_v33  ;;  %v340_v43 = vld [vmem:[%s2067_s19 + $0x488] sm:$0xff]  ;;  %v342_v45 = vld [vmem:[%s2067_s19 + $0x498] sm:$0xff]  ;;  %v1688_v47 = vpack.c.bf16 %v331_v39, %v323_v38  ;;  %v1760_v48 = vpack.c.bf16 %v333_v42, %v325_v40  ;;  %v339_v50 = vld [vmem:[%s2067_s19 + $0x480] sm:$0xff] }
  0x2a   : > { %1677 = vmatpush1.bf16.msra.mxu0 %v1676_v11  ;;  %v348_v44 = vld [vmem:[%s2067_s19 + $0x4c8] sm:$0xff]  ;;  %v350_v46 = vld [vmem:[%s2067_s19 + $0x4d8] sm:$0xff]  ;;  %v347_v51 = vld [vmem:[%s2067_s19 + $0x4c0] sm:$0xff] }
  0x2b   : > { %1749 = vmatpush1.bf16.msra.mxu1 %v1748_v12  ;;  %1679 = vmatprep.subr.bf16.mxu0 %v1678_v13  ;;  %v1690_v49 = vpack.c.bf16 %v348_v44, %v340_v43  ;;  %v341_v52 = vld [vmem:[%s2067_s19 + $0x490] sm:$0xff]  ;;  %v1762_v53 = vpack.c.bf16 %v350_v46, %v342_v45  ;;  %v356_v55 = vld [vmem:[%s2067_s19 + $0x508] sm:$0xff]  ;;  %v358_v57 = vld [vmem:[%s2067_s19 + $0x518] sm:$0xff]  ;;  %v1692_v59 = vpack.c.bf16 %v347_v51, %v339_v50 }
  0x2c   : > { %1751 = vmatprep.subr.bf16.mxu1 %v1750_v17  ;;  %v349_v54 = vld [vmem:[%s2067_s19 + $0x4d0] sm:$0xff]  ;;  %v364_v56 = vld [vmem:[%s2067_s19 + $0x548] sm:$0xff]  ;;  %v366_v58 = vld [vmem:[%s2067_s19 + $0x558] sm:$0xff] }
  0x2d   : > { %v1764_v60 = vpack.c.bf16 %v349_v54, %v341_v52  ;;  %v1694_v61 = vpack.c.bf16 %v364_v56, %v356_v55  ;;  %v355_v62 = vld [vmem:[%s2067_s19 + $0x500] sm:$0xff]  ;;  %v357_v0 = vld [vmem:[%s2067_s19 + $0x510] sm:$0xff]  ;;  %v1766_v1 = vpack.c.bf16 %v366_v58, %v358_v57  ;;  %v372_v3 = vld [vmem:[%s2067_s19 + $0x588] sm:$0xff] }
  0x2e   : > { %1681 = vmatpush1.bf16.msra.mxu0 %v1680_v23  ;;  %v363_v63 = vld [vmem:[%s2067_s19 + $0x540] sm:$0xff]  ;;  %v365_v2 = vld [vmem:[%s2067_s19 + $0x550] sm:$0xff]  ;;  %v380_v4 = vld [vmem:[%s2067_s19 + $0x5c8] sm:$0xff] }
  0x2f   : > { %1753 = vmatpush1.bf16.msra.mxu1 %v1752_v24  ;;  %1683 = vmatprep.subr.bf16.mxu0 %v1682_v25  ;;  %v374_v5 = vld [vmem:[%s2067_s19 + $0x598] sm:$0xff]  ;;  %v1696_v7 = vpack.c.bf16 %v363_v63, %v355_v62  ;;  %v1768_v8 = vpack.c.bf16 %v365_v2, %v357_v0  ;;  %v1698_v9 = vpack.c.bf16 %v380_v4, %v372_v3  ;;  %v371_v10 = vld [vmem:[%s2067_s19 + $0x580] sm:$0xff]  ;;  %v373_v12 = vld [vmem:[%s2067_s19 + $0x590] sm:$0xff] }
  0x30   : > { %1755 = vmatprep.subr.bf16.mxu1 %v1754_v29  ;;  %v382_v6 = vld [vmem:[%s2067_s19 + $0x5d8] sm:$0xff]  ;;  %v379_v11 = vld [vmem:[%s2067_s19 + $0x5c0] sm:$0xff]  ;;  %v381_v14 = vld [vmem:[%s2067_s19 + $0x5d0] sm:$0xff] }
  0x31   : > { %v1770_v13 = vpack.c.bf16 %v382_v6, %v374_v5  ;;  %v388_v15 = vld [vmem:[%s2067_s19 + $0x608] sm:$0xff]  ;;  %v390_v17 = vld [vmem:[%s2067_s19 + $0x618] sm:$0xff]  ;;  %v1700_v19 = vpack.c.bf16 %v379_v11, %v371_v10  ;;  %v1772_v20 = vpack.c.bf16 %v381_v14, %v373_v12  ;;  %v387_v22 = vld [vmem:[%s2067_s19 + $0x600] sm:$0xff] }
  0x32   : > { %1685 = vmatpush1.bf16.msra.mxu0 %v1684_v35  ;;  %v396_v16 = vld [vmem:[%s2067_s19 + $0x648] sm:$0xff]  ;;  %v398_v18 = vld [vmem:[%s2067_s19 + $0x658] sm:$0xff]  ;;  %v395_v23 = vld [vmem:[%s2067_s19 + $0x640] sm:$0xff] }
  0x33   : > { %1757 = vmatpush1.bf16.msra.mxu1 %v1756_v36  ;;  %1687 = vmatprep.subr.bf16.mxu0 %v1686_v37  ;;  %v1702_v21 = vpack.c.bf16 %v396_v16, %v388_v15  ;;  %v389_v24 = vld [vmem:[%s2067_s19 + $0x610] sm:$0xff]  ;;  %v1774_v25 = vpack.c.bf16 %v398_v18, %v390_v17  ;;  %v404_v27 = vld [vmem:[%s2067_s19 + $0x688] sm:$0xff]  ;;  %v406_v29 = vld [vmem:[%s2067_s19 + $0x698] sm:$0xff]  ;;  %v1704_v31 = vpack.c.bf16 %v395_v23, %v387_v22 }
  0x34   : > { %1759 = vmatprep.subr.bf16.mxu1 %v1758_v41  ;;  %v397_v26 = vld [vmem:[%s2067_s19 + $0x650] sm:$0xff]  ;;  %v412_v28 = vld [vmem:[%s2067_s19 + $0x6c8] sm:$0xff]  ;;  %v414_v30 = vld [vmem:[%s2067_s19 + $0x6d8] sm:$0xff] }
  0x35   : > { %v1776_v32 = vpack.c.bf16 %v397_v26, %v389_v24  ;;  %v1706_v33 = vpack.c.bf16 %v412_v28, %v404_v27  ;;  %v403_v34 = vld [vmem:[%s2067_s19 + $0x680] sm:$0xff]  ;;  %v405_v36 = vld [vmem:[%s2067_s19 + $0x690] sm:$0xff]  ;;  %v1778_v37 = vpack.c.bf16 %v414_v30, %v406_v29  ;;  %v420_v39 = vld [vmem:[%s2067_s19 + $0x708] sm:$0xff] }
  0x36   : > { %1689 = vmatpush1.bf16.msra.mxu0 %v1688_v47  ;;  %v411_v35 = vld [vmem:[%s2067_s19 + $0x6c0] sm:$0xff]  ;;  %v413_v38 = vld [vmem:[%s2067_s19 + $0x6d0] sm:$0xff]  ;;  %v428_v40 = vld [vmem:[%s2067_s19 + $0x748] sm:$0xff] }
  0x37   : > { %1761 = vmatpush1.bf16.msra.mxu1 %v1760_v48  ;;  %1691 = vmatprep.subr.bf16.mxu0 %v1690_v49  ;;  %v422_v41 = vld [vmem:[%s2067_s19 + $0x718] sm:$0xff]  ;;  %v1708_v43 = vpack.c.bf16 %v411_v35, %v403_v34  ;;  %v1780_v44 = vpack.c.bf16 %v413_v38, %v405_v36  ;;  %v1710_v45 = vpack.c.bf16 %v428_v40, %v420_v39  ;;  %v419_v46 = vld [vmem:[%s2067_s19 + $0x700] sm:$0xff]  ;;  %v421_v48 = vld [vmem:[%s2067_s19 + $0x710] sm:$0xff] }
  0x38   : > { %1763 = vmatprep.subr.bf16.mxu1 %v1762_v53  ;;  %v430_v42 = vld [vmem:[%s2067_s19 + $0x758] sm:$0xff]  ;;  %v427_v47 = vld [vmem:[%s2067_s19 + $0x740] sm:$0xff]  ;;  %v429_v50 = vld [vmem:[%s2067_s19 + $0x750] sm:$0xff] }
  0x39   : > { %v1782_v49 = vpack.c.bf16 %v430_v42, %v422_v41  ;;  %v436_v51 = vld [vmem:[%s2067_s19 + $0x788] sm:$0xff]  ;;  %v438_v53 = vld [vmem:[%s2067_s19 + $0x798] sm:$0xff]  ;;  %v1712_v55 = vpack.c.bf16 %v427_v47, %v419_v46  ;;  %v1784_v56 = vpack.c.bf16 %v429_v50, %v421_v48  ;;  %v435_v58 = vld [vmem:[%s2067_s19 + $0x780] sm:$0xff] }
  0x3a   : > { %1693 = vmatpush1.bf16.msra.mxu0 %v1692_v59  ;;  %v444_v52 = vld [vmem:[%s2067_s19 + $0x7c8] sm:$0xff]  ;;  %v446_v54 = vld [vmem:[%s2067_s19 + $0x7d8] sm:$0xff]  ;;  %v443_v59 = vld [vmem:[%s2067_s19 + $0x7c0] sm:$0xff] }
  0x3b   : > { %1765 = vmatpush1.bf16.msra.mxu1 %v1764_v60  ;;  %1695 = vmatprep.subr.bf16.mxu0 %v1694_v61  ;;  %v1714_v57 = vpack.c.bf16 %v444_v52, %v436_v51  ;;  %v437_v60 = vld [vmem:[%s2067_s19 + $0x790] sm:$0xff]  ;;  %v1786_v61 = vpack.c.bf16 %v446_v54, %v438_v53  ;;  %v452_v63 = vld [vmem:[%s2067_s19 + $0x808] sm:$0xff]  ;;  %v462_v2 = vld [vmem:[%s2067_s19 + $0x858] sm:$0xff]  ;;  %v1716_v3 = vpack.c.bf16 %v443_v59, %v435_v58  ;;  %v2028_v53 = vmov 0.0  }
  0x3c   : > { %1767 = vmatprep.subr.bf16.mxu1 %v1766_v1  ;;  %v445_v62 = vld [vmem:[%s2067_s19 + $0x7d0] sm:$0xff]  ;;  %v460_v0 = vld [vmem:[%s2067_s19 + $0x848] sm:$0xff]  ;;  %v454_v1 = vld [vmem:[%s2067_s19 + $0x818] sm:$0xff] }
  0x3d   : > { %v1788_v4 = vpack.c.bf16 %v445_v62, %v437_v60  ;;  %v1718_v5 = vpack.c.bf16 %v460_v0, %v452_v63  ;;  %v451_v6 = vld [vmem:[%s2067_s19 + $0x800] sm:$0xff]  ;;  %v461_v10 = vld [vmem:[%s2067_s19 + $0x850] sm:$0xff]  ;;  %v468_v11 = vld [vmem:[%s2067_s19 + $0x888] sm:$0xff]  ;;  %v2029_v60 = vmov 0  }
  0x3e   : > { %1697 = vmatpush1.bf16.msra.mxu0 %v1696_v7  ;;  %v459_v7 = vld [vmem:[%s2067_s19 + $0x840] sm:$0xff]  ;;  %v476_v12 = vld [vmem:[%s2067_s19 + $0x8c8] sm:$0xff]  ;;  %v470_v15 = vld [vmem:[%s2067_s19 + $0x898] sm:$0xff]  ;;  %2017 = vset.pattern.permute.xlu0 %v2029_v60 }
  0x3f   : > { %1769 = vmatpush1.bf16.msra.mxu1 %v1768_v8  ;;  %1699 = vmatprep.subr.bf16.mxu0 %v1698_v9  ;;  %v1790_v8 = vpack.c.bf16 %v462_v2, %v454_v1  ;;  %v453_v9 = vld [vmem:[%s2067_s19 + $0x810] sm:$0xff]  ;;  %v1720_v14 = vpack.c.bf16 %v459_v7, %v451_v6  ;;  %v478_v16 = vld [vmem:[%s2067_s19 + $0x8d8] sm:$0xff]  ;;  %v2217_v17 = vld [vmem:[%s2786_s1 + $0x20] sm:$0xff] }
  0x40   : > { %1771 = vmatprep.subr.bf16.mxu1 %v1770_v13  ;;  %v2210_v13 = vld [vmem:[%s2786_s1] sm:$0xff]  ;;  %v1792_v18 = vpack.c.bf16 %v461_v10, %v453_v9  ;;  %v469_v22 = vld [vmem:[%s2067_s19 + $0x890] sm:$0xff]  ;;  %v1794_v23 = vpack.c.bf16 %v478_v16, %v470_v15  ;;  %v208_v26 = vld [vmem:[%s2067_s19 + $0x68] sm:$0xff]  ;;  %2018 = vset.pattern.permute.xlu1 %v2029_v60 }
  0x41   : > { %v477_v24 = vld [vmem:[%s2067_s19 + $0x8d0] sm:$0xff]  ;;  %v2230_v27 = vld [vmem:[%s2786_s1 + $0x18] sm:$0xff]  ;;  %v2267_v38 = vld [vmem:[%s2786_s1 + $0x68] sm:$0xff] }
  0x42   : > { %1701 = vmatpush1.bf16.msra.mxu0 %v1700_v19  ;;  %v1722_v19 = vpack.c.bf16 %v476_v12, %v468_v11  ;;  %v202_v28 = vld [vmem:[%s2067_s19 + $0x38] sm:$0xff]  ;;  %v2247_v35 = vld [vmem:[%s2786_s1 + $0x30] sm:$0xff]  ;;  %v2275_v39 = vld [vmem:[%s2786_s1 + $0x60] sm:$0xff] }
  0x43   : > { %1773 = vmatpush1.bf16.msra.mxu1 %v1772_v20  ;;  %1703 = vmatprep.subr.bf16.mxu0 %v1702_v21  ;;  %v467_v20 = vld [vmem:[%s2067_s19 + $0x880] sm:$0xff]  ;;  %v210_v29 = vld [vmem:[%s2067_s19 + $0x78] sm:$0xff]  ;;  %v2253_v36 = vld [vmem:[%s2786_s1 + $0x50] sm:$0xff] }
  0x44   : > { %1775 = vmatprep.subr.bf16.mxu1 %v1774_v25  ;;  %v475_v21 = vld [vmem:[%s2067_s19 + $0x8c0] sm:$0xff]  ;;  %v200_v25 = vld [vmem:[%s2067_s19 + $0x28] sm:$0xff]  ;;  %v2239_v30 = vld [vmem:[%s2786_s1 + $0x38] sm:$0xff]  ;;  %v1870_v34 = vpack.c.bf16 %v210_v29, %v202_v28 }
  0x45   : > { %v2281_v40 = vld [vmem:[%s2786_s1 + $0x80] sm:$0xff]  ;;  %v2289_v41 = vld [vmem:[%s2786_s1 + $0x78] sm:$0xff]  ;;  %v201_v48 = vld [vmem:[%s2067_s19 + $0x30] sm:$0xff] }
  0x46   : > { %1705 = vmatpush1.bf16.msra.mxu0 %v1704_v31  ;;  %v1724_v31 = vpack.c.bf16 %v475_v21, %v467_v20  ;;  %v2295_v42 = vld [vmem:[%s2786_s1 + $0x98] sm:$0xff]  ;;  %v199_v46 = vld [vmem:[%s2067_s19 + $0x20] sm:$0xff]  ;;  %v2328_v50 = vld [vmem:[%s2786_s1 + $0x10] sm:$0xff] }
  0x47   : > { %1777 = vmatpush1.bf16.msra.mxu1 %v1776_v32  ;;  %1707 = vmatprep.subr.bf16.mxu0 %v1706_v33  ;;  %v1796_v32 = vpack.c.bf16 %v477_v24, %v469_v22  ;;  %v1798_v33 = vpack.c.bf16 %v208_v26, %v200_v25  ;;  %v207_v47 = vld [vmem:[%s2067_s19 + $0x60] sm:$0xff]  ;;  %v216_v51 = vld [vmem:[%s2067_s19 + $0xa8] sm:$0xff]  ;;  %v1462_v62 = vld [vmem:[%s2787_s2 + $0x10] sm:$0xff] }
  0x48   : > { %1779 = vmatprep.subr.bf16.mxu1 %v1778_v37  ;;  %v2261_v37 = vld [vmem:[%s2786_s1 + $0x48] sm:$0xff]  ;;  %v1800_v54 = vpack.c.bf16 %v207_v47, %v199_v46  ;;  %v223_v59 = vld [vmem:[%s2067_s19 + $0xe0] sm:$0xff]  ;;  %v217_v0 = vld [vmem:[%s2067_s19 + $0xb0] sm:$0xff]  ;;  %1480 = vperm.xlu1 %2018, %v1462_v62  }
  0x49   : > { %v224_v52 = vld [vmem:[%s2067_s19 + $0xe8] sm:$0xff]  ;;  %v225_v1 = vld [vmem:[%s2067_s19 + $0xf0] sm:$0xff]  ;;  %v234_v7 = vld [vmem:[%s2067_s19 + $0x138] sm:$0xff] }
  0x4a   : > { %1709 = vmatpush1.bf16.msra.mxu0 %v1708_v43  ;;  %v2303_v43 = vld [vmem:[%s2786_s1 + $0x90] sm:$0xff]  ;;  %v1802_v63 = vpack.c.bf16 %v224_v52, %v216_v51  ;;  %v1876_v9 = vpack.c.bf16 %v225_v1, %v217_v0  ;;  %v231_v10 = vld [vmem:[%s2067_s19 + $0x120] sm:$0xff]  ;;  %v250_v22 = vld [vmem:[%s2067_s19 + $0x1b8] sm:$0xff] }
  0x4b   : > { %1781 = vmatpush1.bf16.msra.mxu1 %v1780_v44  ;;  %1711 = vmatprep.subr.bf16.mxu0 %v1710_v45  ;;  %v2309_v44 = vld [vmem:[%s2786_s1 + $0xb0] sm:$0xff]  ;;  %v2317_v45 = vld [vmem:[%s2786_s1 + $0xa8] sm:$0xff]  ;;  %v239_v11 = vld [vmem:[%s2067_s19 + $0x160] sm:$0xff] }
  0x4c   : > { %1783 = vmatprep.subr.bf16.mxu1 %v1782_v49  ;;  %v209_v49 = vld [vmem:[%s2067_s19 + $0x70] sm:$0xff]  ;;  %v2375_v20 = vld [vmem:[%s2786_s1 + $0x40] sm:$0xff]  ;;  %v1808_v21 = vpack.c.bf16 %v239_v11, %v231_v10  ;;  %v2394_v46 = vld [vmem:[%s2786_s1 + $0x58] sm:$0xff] }
  0x4d   : > { %v1872_v58 = vpack.c.bf16 %v209_v49, %v201_v48  ;;  %v241_v15 = vld [vmem:[%s2067_s19 + $0x170] sm:$0xff]  ;;  %v247_v25 = vld [vmem:[%s2067_s19 + $0x1a0] sm:$0xff]  ;;  %v266_v48 = vld [vmem:[%s2067_s19 + $0x238] sm:$0xff] }
  0x4e   : > { %1713 = vmatpush1.bf16.msra.mxu0 %v1712_v55  ;;  %v218_v55 = vld [vmem:[%s2067_s19 + $0xb8] sm:$0xff]  ;;  %v255_v26 = vld [vmem:[%s2067_s19 + $0x1e0] sm:$0xff]  ;;  %v249_v29 = vld [vmem:[%s2067_s19 + $0x1b0] sm:$0xff] }
  0x4f   : > { %1785 = vmatpush1.bf16.msra.mxu1 %v1784_v56  ;;  %1715 = vmatprep.subr.bf16.mxu0 %v1714_v57  ;;  %v226_v56 = vld [vmem:[%s2067_s19 + $0xf8] sm:$0xff]  ;;  %v215_v57 = vld [vmem:[%s2067_s19 + $0xa0] sm:$0xff]  ;;  %v1812_v47 = vpack.c.bf16 %v255_v26, %v247_v25  ;;  %v288_v60 = vld [vmem:[%s2067_s19 + $0x2e8] sm:$0xff] }
  0x50   : > { %1787 = vmatprep.subr.bf16.mxu1 %v1786_v61  ;;  %v1460_v61 = vld [vmem:[%s2787_s2] sm:$0xff]  ;;  %v1874_v2 = vpack.c.bf16 %v226_v56, %v218_v55  ;;  %v1804_v6 = vpack.c.bf16 %v223_v59, %v215_v57  ;;  %v274_v49 = vld [vmem:[%s2067_s19 + $0x278] sm:$0xff]  ;;  %v265_v56 = vld [vmem:[%s2067_s19 + $0x230] sm:$0xff] }
  0x51   : > { %1470 = vperm.xlu0 %2017, %v1460_v61   ;;  %v263_v52 = vld [vmem:[%s2067_s19 + $0x220] sm:$0xff]  ;;  %v273_v57 = vld [vmem:[%s2067_s19 + $0x270] sm:$0xff]  ;;  %v280_v59 = vld [vmem:[%s2067_s19 + $0x2a8] sm:$0xff] }
  0x52   : > { %1717 = vmatpush1.bf16.msra.mxu0 %v1716_v3  ;;  %v232_v3 = vld [vmem:[%s2067_s19 + $0x128] sm:$0xff]  ;;  %v2413_v61 = vld [vmem:[%s2786_s1 + $0x70] sm:$0xff]  ;;  %v290_v0 = vld [vmem:[%s2067_s19 + $0x2f8] sm:$0xff]  ;;  %v1888_v1 = vpack.c.bf16 %v273_v57, %v265_v56 }
  0x53   : > { %1789 = vmatpush1.bf16.msra.mxu1 %v1788_v4  ;;  %1719 = vmatprep.subr.bf16.mxu0 %v1718_v5  ;;  %v240_v4 = vld [vmem:[%s2067_s19 + $0x168] sm:$0xff]  ;;  %v330_v56 = vld [vmem:[%s2067_s19 + $0x438] sm:$0xff] }
  0x54   : > { %1791 = vmatprep.subr.bf16.mxu1 %v1790_v8  ;;  %v2356_v5 = vld [vmem:[%s2786_s1 + $0x28] sm:$0xff]  ;;  %v242_v8 = vld [vmem:[%s2067_s19 + $0x178] sm:$0xff]  ;;  %v1806_v12 = vpack.c.bf16 %v240_v4, %v232_v3  ;;  %v287_v3 = vld [vmem:[%s2067_s19 + $0x2e0] sm:$0xff]  ;;  %v1818_v4 = vpack.c.bf16 %v288_v60, %v280_v59 }
  0x55   : > { %573 = vmatmul.mubr.f32.vlgmr.msra.gmra.mrb[0].mxu0 %v2210_v13  ;;  %v1878_v16 = vpack.c.bf16 %v242_v8, %v234_v7  ;;  %v289_v7 = vld [vmem:[%s2067_s19 + $0x2f0] sm:$0xff]  ;;  %v304_v10 = vld [vmem:[%s2067_s19 + $0x368] sm:$0xff]  ;;  %v338_v57 = vld [vmem:[%s2067_s19 + $0x478] sm:$0xff] }
  0x56   : > { %799 = vmatmul.mubr.f32.vlgmr.msra.gmra.mrb[0].mxu1 %v2210_v13  ;;  %1721 = vmatpush1.bf16.msra.mxu0 %v1720_v14  ;;  %v233_v14 = vld [vmem:[%s2067_s19 + $0x130] sm:$0xff]  ;;  %v2432_v11 = vld [vmem:[%s2786_s1 + $0x88] sm:$0xff] }
  0x57   : > { %578 = vmatprep.mubr.f32.mxu0 %v2217_v17  ;;  %804 = vmatprep.mubr.f32.mxu1 %v2217_v17  ;;  %v1880_v24 = vpack.c.bf16 %v241_v15, %v233_v14  ;;  %v298_v14 = vld [vmem:[%s2067_s19 + $0x338] sm:$0xff]  ;;  %v312_v25 = vld [vmem:[%s2067_s19 + $0x3a8] sm:$0xff] }
  0x58   : > { %1793 = vmatpush1.bf16.msra.mxu1 %v1792_v18  ;;  %1723 = vmatprep.subr.bf16.mxu0 %v1722_v19  ;;  %v248_v18 = vld [vmem:[%s2067_s19 + $0x1a8] sm:$0xff]  ;;  %v306_v15 = vld [vmem:[%s2067_s19 + $0x378] sm:$0xff] }
  0x59   : > { %579 = vmatmul.mubr.f32.gmra.mrb[2].mxu0 %v2230_v27  ;;  %1795 = vmatprep.subr.bf16.mxu1 %v1794_v23  ;;  %v256_v19 = vld [vmem:[%s2067_s19 + $0x1e8] sm:$0xff]  ;;  %v258_v23 = vld [vmem:[%s2067_s19 + $0x1f8] sm:$0xff] }
  0x5a   : > { %805 = vmatmul.mubr.f32.gmra.mrb[2].mxu1 %v2230_v27  ;;  %584 = vmatprep.mubr.f32.mxu0 %v2239_v30  ;;  %v1810_v28 = vpack.c.bf16 %v256_v19, %v248_v18  ;;  %v295_v18 = vld [vmem:[%s2067_s19 + $0x320] sm:$0xff]  ;;  %v320_v26 = vld [vmem:[%s2067_s19 + $0x3e8] sm:$0xff] }
  0x5b   : > { %810 = vmatprep.mubr.f32.mxu1 %v2239_v30  ;;  %1725 = vmatpush1.bf16.msra.mxu0 %v1724_v31  ;;  %v257_v31 = vld [vmem:[%s2067_s19 + $0x1f0] sm:$0xff]  ;;  %v303_v19 = vld [vmem:[%s2067_s19 + $0x360] sm:$0xff] }
  0x5c   : > { %1797 = vmatpush1.bf16.msra.mxu1 %v1796_v32  ;;  %1799 = vmatprep.subr.bf16.mxu0 %v1798_v33  ;;  %v1882_v32 = vpack.c.bf16 %v258_v23, %v250_v22  ;;  %v264_v33 = vld [vmem:[%s2067_s19 + $0x228] sm:$0xff]  ;;  %v1884_v51 = vpack.c.bf16 %v257_v31, %v249_v29  ;;  %v297_v22 = vld [vmem:[%s2067_s19 + $0x330] sm:$0xff]  ;;  %v1824_v29 = vpack.c.bf16 %v303_v19, %v295_v18  ;;  %v314_v31 = vld [vmem:[%s2067_s19 + $0x3b8] sm:$0xff] }
  0x5d   : > { %585 = vmatmul.mubr.f32.gmra.mrb[4].mxu0 %v2247_v35  ;;  %1871 = vmatprep.subr.bf16.mxu1 %v1870_v34  ;;  %v272_v34 = vld [vmem:[%s2067_s19 + $0x268] sm:$0xff]  ;;  %v305_v23 = vld [vmem:[%s2067_s19 + $0x370] sm:$0xff]  ;;  %v1463_v19 = vld [vmem:[%s2787_s2 + $0x18] sm:$0xff] }
  0x5e   : > { %811 = vmatmul.mubr.f32.gmra.mrb[4].mxu1 %v2247_v35  ;;  %590 = vmatprep.mubr.f32.mxu0 %v2253_v36  ;;  %v1814_v55 = vpack.c.bf16 %v272_v34, %v264_v33  ;;  %v1896_v33 = vpack.c.bf16 %v305_v23, %v297_v22  ;;  %v311_v34 = vld [vmem:[%s2067_s19 + $0x3a0] sm:$0xff]  ;;  %v345_v18 = vld [vmem:[%s2067_s19 + $0x4b0] sm:$0xff]  ;;  %v360_v23 = vld [vmem:[%s2067_s19 + $0x528] sm:$0xff] }
  0x5f   : > { %816 = vmatprep.mubr.f32.mxu1 %v2253_v36  ;;  %v353_v22 = vld [vmem:[%s2067_s19 + $0x4f0] sm:$0xff]  ;;  %1485 = vperm.xlu1 %2018, %v1463_v19   ;;  %v399_v19 = vld [vmem:[%s2067_s19 + $0x660] sm:$0xff] }
  0x61   : > { %591 = vmatmul.mubr.f32.gmra.mrb[6].mxu0 %v2261_v37 }
  0x62   : > { %817 = vmatmul.mubr.f32.gmra.mrb[6].mxu1 %v2261_v37  ;;  %596 = vmatprep.mubr.f32.mxu0 %v2267_v38 }
  0x63   : > { %822 = vmatprep.mubr.f32.mxu1 %v2267_v38 }
  0x65   : > { %597 = vmatmul.mubr.f32.gmra.mrb[8].mxu0 %v2275_v39 }
  0x66   : > { %823 = vmatmul.mubr.f32.gmra.mrb[8].mxu1 %v2275_v39  ;;  %602 = vmatprep.mubr.f32.mxu0 %v2281_v40 }
  0x67   : > { %828 = vmatprep.mubr.f32.mxu1 %v2281_v40 }
  0x69   : > { %603 = vmatmul.mubr.f32.gmra.mrb[10].mxu0 %v2289_v41 }
  0x6a   : > { %829 = vmatmul.mubr.f32.gmra.mrb[10].mxu1 %v2289_v41  ;;  %608 = vmatprep.mubr.f32.mxu0 %v2295_v42 }
  0x6b   : > { %834 = vmatprep.mubr.f32.mxu1 %v2295_v42 }
  0x6d   : > { %609 = vmatmul.mubr.f32.gmra.mrb[12].mxu0 %v2303_v43 }
  0x6e   : > { %835 = vmatmul.mubr.f32.gmra.mrb[12].mxu1 %v2303_v43  ;;  %614 = vmatprep.mubr.f32.mxu0 %v2309_v44 }
  0x6f   : > { %840 = vmatprep.mubr.f32.mxu1 %v2309_v44 }
  0x71   : > { %615 = vmatmul.mubr.f32.gmra.mrb[14].mxu0 %v2317_v45 }
  0x72   : > { %841 = vmatmul.mubr.f32.gmra.mrb[14].mxu1 %v2317_v45  ;;  %685 = vmatprep.mubr.f32.mxu0 %v2028_v53 }
  0x73   : > { %911 = vmatprep.mubr.f32.mxu1 %v2028_v53 }
  0x75   : > { %1619 = vmatmul.mubr.msk.f32.vlgmr.msra.gmra.mrb[0].mxu0 %vm483_vm0, %v2328_v50 }
  0x76   : > { %1627 = vmatmul.mubr.msk.f32.vlgmr.msra.gmra.mrb[0].mxu1 %vm483_vm0, %v2328_v50  ;;  %1801 = vmatpush1.bf16.msra.mxu0 %v1800_v54  ;;  %v271_v54 = vld [vmem:[%s2067_s19 + $0x260] sm:$0xff] }
  0x77   : > { %1873 = vmatpush1.bf16.msra.mxu1 %v1872_v58  ;;  %691 = vmatprep.mubr.f32.mxu0 %v2028_v53  ;;  %v1886_v58 = vpack.c.bf16 %v274_v49, %v266_v48  ;;  %v1816_v62 = vpack.c.bf16 %v271_v54, %v263_v52  ;;  %v313_v48 = vld [vmem:[%s2067_s19 + $0x3b0] sm:$0xff]  ;;  %v1826_v49 = vpack.c.bf16 %v320_v26, %v312_v25  ;;  %v328_v52 = vld [vmem:[%s2067_s19 + $0x428] sm:$0xff]  ;;  %v362_v26 = vld [vmem:[%s2067_s19 + $0x538] sm:$0xff] }
  0x78   : > { %917 = vmatprep.mubr.f32.mxu1 %v2028_v53  ;;  %1803 = vmatprep.subr.bf16.mxu0 %v1802_v63  ;;  %v282_v63 = vld [vmem:[%s2067_s19 + $0x2b8] sm:$0xff]  ;;  %v336_v54 = vld [vmem:[%s2067_s19 + $0x468] sm:$0xff] }
  0x79   : > { %1875 = vmatprep.subr.bf16.mxu1 %v1874_v2  ;;  %1620 = vmatmul.mubr.msk.f32.gmra.mrb[2].mxu0 %vm483_vm0, %v2356_v5  ;;  %v279_v2 = vld [vmem:[%s2067_s19 + $0x2a0] sm:$0xff]  ;;  %v1890_v8 = vpack.c.bf16 %v290_v0, %v282_v63  ;;  %v2019_v25 = vld [vmem:[%s2786_s1 + $0x8] sm:$0xff] }
  0x7a   : > { %1628 = vmatmul.mubr.msk.f32.gmra.mrb[2].mxu1 %vm483_vm0, %v2356_v5  ;;  %1805 = vmatpush1.bf16.msra.mxu0 %v1804_v6  ;;  %v281_v6 = vld [vmem:[%s2067_s19 + $0x2b0] sm:$0xff]  ;;  %v327_v63 = vld [vmem:[%s2067_s19 + $0x420] sm:$0xff] }
  0x7b   : > { %1877 = vmatpush1.bf16.msra.mxu1 %v1876_v9  ;;  %697 = vmatprep.mubr.f32.mxu0 %v2028_v53  ;;  %v296_v9 = vld [vmem:[%s2067_s19 + $0x328] sm:$0xff]  ;;  %v335_v0 = vld [vmem:[%s2067_s19 + $0x460] sm:$0xff] }
  0x7c   : > { %923 = vmatprep.mubr.f32.mxu1 %v2028_v53  ;;  %1807 = vmatprep.subr.bf16.mxu0 %v1806_v12  ;;  %v1820_v12 = vpack.c.bf16 %v287_v3, %v279_v2  ;;  %v1902_v2 = vpack.c.bf16 %v338_v57, %v330_v56  ;;  %v337_v3 = vld [vmem:[%s2067_s19 + $0x470] sm:$0xff]  ;;  %v384_v56 = vld [vmem:[%s2067_s19 + $0x5e8] sm:$0xff]  ;;  %v378_v57 = vld [vmem:[%s2067_s19 + $0x5b8] sm:$0xff] }
  0x7d   : > { %1879 = vmatprep.subr.bf16.mxu1 %v1878_v16  ;;  %1621 = vmatmul.mubr.msk.f32.gmra.mrb[4].mxu0 %vm483_vm0, %v2375_v20  ;;  %v1892_v16 = vpack.c.bf16 %v289_v7, %v281_v6  ;;  %v352_v6 = vld [vmem:[%s2067_s19 + $0x4e8] sm:$0xff]  ;;  %v346_v7 = vld [vmem:[%s2067_s19 + $0x4b8] sm:$0xff] }
  0x7e   : > { %1629 = vmatmul.mubr.msk.f32.gmra.mrb[4].mxu1 %vm483_vm0, %v2375_v20  ;;  %1809 = vmatpush1.bf16.msra.mxu0 %v1808_v21  ;;  %v1822_v21 = vpack.c.bf16 %v304_v10, %v296_v9  ;;  %v1832_v9 = vpack.c.bf16 %v335_v0, %v327_v63  ;;  %v343_v10 = vld [vmem:[%s2067_s19 + $0x4a0] sm:$0xff]  ;;  %v1466_v63 = vld [vmem:[%s2787_s2 + $0x30] sm:$0xff] }
  0x7f   : > { %1881 = vmatpush1.bf16.msra.mxu1 %v1880_v24  ;;  %703 = vmatprep.mubr.f32.mxu0 %v2028_v53  ;;  %v1894_v24 = vpack.c.bf16 %v306_v15, %v298_v14 }
  0x80   : > { %929 = vmatprep.mubr.f32.mxu1 %v2028_v53  ;;  %1811 = vmatprep.subr.bf16.mxu0 %v1810_v28  ;;  %v2451_v28 = vld [vmem:[%s2786_s1 + $0xa0] sm:$0xff] }
  0x81   : > { %1883 = vmatprep.subr.bf16.mxu1 %v1882_v32  ;;  %1622 = vmatmul.mubr.msk.f32.gmra.mrb[6].mxu0 %vm483_vm0, %v2394_v46  ;;  %v322_v32 = vld [vmem:[%s2067_s19 + $0x3f8] sm:$0xff] }
  0x82   : > { %1630 = vmatmul.mubr.msk.f32.gmra.mrb[6].mxu1 %vm483_vm0, %v2394_v46  ;;  %1813 = vmatpush1.bf16.msra.mxu0 %v1812_v47  ;;  %v319_v47 = vld [vmem:[%s2067_s19 + $0x3e0] sm:$0xff] }
  0x83   : > { %1885 = vmatpush1.bf16.msra.mxu1 %v1884_v51  ;;  %709 = vmatprep.mubr.f32.mxu0 %v2028_v53  ;;  %v321_v51 = vld [vmem:[%s2067_s19 + $0x3f0] sm:$0xff]  ;;  %v1828_v59 = vpack.c.bf16 %v319_v47, %v311_v34  ;;  %v1908_v34 = vpack.c.bf16 %v353_v22, %v345_v18  ;;  %v391_v18 = vld [vmem:[%s2067_s19 + $0x620] sm:$0xff] }
  0x84   : > { %935 = vmatprep.mubr.f32.mxu1 %v2028_v53  ;;  %1815 = vmatprep.subr.bf16.mxu0 %v1814_v55  ;;  %v1898_v55 = vpack.c.bf16 %v322_v32, %v314_v31  ;;  %v1900_v60 = vpack.c.bf16 %v321_v51, %v313_v48  ;;  %v359_v32 = vld [vmem:[%s2067_s19 + $0x520] sm:$0xff]  ;;  %v1465_v51 = vld [vmem:[%s2787_s2 + $0x28] sm:$0xff] }
  0x85   : > { %1887 = vmatprep.subr.bf16.mxu1 %v1886_v58  ;;  %1623 = vmatmul.mubr.msk.f32.gmra.mrb[8].mxu0 %vm483_vm0, %v2413_v61  ;;  %v2472_v58 = vld [vmem:[%s2786_s1 + $0xb8] sm:$0xff]  ;;  %v367_v48 = vld [vmem:[%s2067_s19 + $0x560] sm:$0xff] }
  0x86   : > { %1631 = vmatmul.mubr.msk.f32.gmra.mrb[8].mxu1 %vm483_vm0, %v2413_v61  ;;  %1817 = vmatpush1.bf16.msra.mxu0 %v1816_v62  ;;  %v1830_v62 = vpack.c.bf16 %v336_v54, %v328_v52  ;;  %v369_v54 = vld [vmem:[%s2067_s19 + $0x570] sm:$0xff] }
  0x87   : > { %1889 = vmatpush1.bf16.msra.mxu1 %v1888_v1  ;;  %715 = vmatprep.mubr.f32.mxu0 %v2028_v53  ;;  %v329_v1 = vld [vmem:[%s2067_s19 + $0x430] sm:$0xff] }
  0x88   : > { %941 = vmatprep.mubr.f32.mxu1 %v2028_v53  ;;  %1819 = vmatprep.subr.bf16.mxu0 %v1818_v4  ;;  %v344_v4 = vld [vmem:[%s2067_s19 + $0x4a8] sm:$0xff]  ;;  %v1904_v14 = vpack.c.bf16 %v337_v3, %v329_v1  ;;  %v377_v3 = vld [vmem:[%s2067_s19 + $0x5b0] sm:$0xff] }
  0x89   : > { %1891 = vmatprep.subr.bf16.mxu1 %v1890_v8  ;;  %1624 = vmatmul.mubr.msk.f32.gmra.mrb[10].mxu0 %vm483_vm0, %v2432_v11  ;;  %v354_v8 = vld [vmem:[%s2067_s19 + $0x4f8] sm:$0xff]  ;;  %v1834_v15 = vpack.c.bf16 %v352_v6, %v344_v4 }
  0x8a   : > { %1632 = vmatmul.mubr.msk.f32.gmra.mrb[10].mxu1 %vm483_vm0, %v2432_v11  ;;  %1821 = vmatpush1.bf16.msra.mxu0 %v1820_v12  ;;  %v1461_v12 = vld [vmem:[%s2787_s2 + $0x8] sm:$0xff]  ;;  %v1467_v4 = vld [vmem:[%s2787_s2 + $0x38] sm:$0xff] }
  0x8b   : > { %1893 = vmatpush1.bf16.msra.mxu1 %v1892_v16  ;;  %721 = vmatprep.mubr.f32.mxu0 %v2028_v53  ;;  %v351_v16 = vld [vmem:[%s2067_s19 + $0x4e0] sm:$0xff] }
  0x8c   : > { %947 = vmatprep.mubr.f32.mxu1 %v2028_v53  ;;  %1823 = vmatprep.subr.bf16.mxu0 %v1822_v21  ;;  %v1906_v21 = vpack.c.bf16 %v354_v8, %v346_v7  ;;  %v1836_v31 = vpack.c.bf16 %v351_v16, %v343_v10  ;;  %v385_v7 = vld [vmem:[%s2067_s19 + $0x5f0] sm:$0xff]  ;;  %v392_v8 = vld [vmem:[%s2067_s19 + $0x628] sm:$0xff]  ;;  %v394_v10 = vld [vmem:[%s2067_s19 + $0x638] sm:$0xff] }
  0x8d   : > { %1895 = vmatprep.subr.bf16.mxu1 %v1894_v24  ;;  %1625 = vmatmul.mubr.msk.f32.gmra.mrb[12].mxu0 %vm483_vm0, %v2451_v28  ;;  %v368_v24 = vld [vmem:[%s2067_s19 + $0x568] sm:$0xff] }
  0x8e   : > { %1633 = vmatmul.mubr.msk.f32.gmra.mrb[12].mxu1 %vm483_vm0, %v2451_v28  ;;  %1825 = vmatpush1.bf16.msra.mxu0 %v1824_v29  ;;  %v370_v29 = vld [vmem:[%s2067_s19 + $0x578] sm:$0xff]  ;;  %v1838_v47 = vpack.c.bf16 %v368_v24, %v360_v23  ;;  %v401_v23 = vld [vmem:[%s2067_s19 + $0x670] sm:$0xff]  ;;  %v408_v24 = vld [vmem:[%s2067_s19 + $0x6a8] sm:$0xff] }
  0x8f   : > { %1897 = vmatpush1.bf16.msra.mxu1 %v1896_v33  ;;  %727 = vmatprep.mubr.f32.mxu0 %v2028_v53  ;;  %v1464_v33 = vld [vmem:[%s2787_s2 + $0x20] sm:$0xff]  ;;  %v1910_v52 = vpack.c.bf16 %v370_v29, %v362_v26  ;;  %v410_v26 = vld [vmem:[%s2067_s19 + $0x6b8] sm:$0xff] }
  0x90   : > { %953 = vmatprep.mubr.f32.mxu1 %v2028_v53  ;;  %1827 = vmatprep.subr.bf16.mxu0 %v1826_v49  ;;  %v361_v49 = vld [vmem:[%s2067_s19 + $0x530] sm:$0xff]  ;;  %v418_v29 = vld [vmem:[%s2067_s19 + $0x6f8] sm:$0xff] }
  0x91   : > { %1899 = vmatprep.subr.bf16.mxu1 %v1898_v55  ;;  %1626 = vmatmul.mubr.msk.f32.gmra.mrb[14].mxu0 %vm483_vm0, %v2472_v58  ;;  %v376_v55 = vld [vmem:[%s2067_s19 + $0x5a8] sm:$0xff]  ;;  %v1912_v0 = vpack.c.bf16 %v369_v54, %v361_v49  ;;  %v1922_v49 = vpack.c.bf16 %v418_v29, %v410_v26  ;;  %v455_v29 = vld [vmem:[%s2067_s19 + $0x820] sm:$0xff] }
  0x92   : > { %1634 = vmatmul.mubr.msk.f32.gmra.mrb[14].mxu1 %vm483_vm0, %v2472_v58  ;;  %1829 = vmatpush1.bf16.msra.mxu0 %v1828_v59  ;;  %v386_v59 = vld [vmem:[%s2067_s19 + $0x5f8] sm:$0xff]  ;;  %v1842_v1 = vpack.c.bf16 %v384_v56, %v376_v55  ;;  %v432_v54 = vld [vmem:[%s2067_s19 + $0x768] sm:$0xff] }
  0x93   : > { %1901 = vmatpush1.bf16.msra.mxu1 %v1900_v60  ;;  %1831 = vmatprep.subr.bf16.mxu0 %v1830_v62  ;;  %v1840_v60 = vpack.c.bf16 %v367_v48, %v359_v32  ;;  %v375_v62 = vld [vmem:[%s2067_s19 + $0x5a0] sm:$0xff]  ;;  %v1914_v6 = vpack.c.bf16 %v386_v59, %v378_v57  ;;  %v409_v48 = vld [vmem:[%s2067_s19 + $0x6b0] sm:$0xff]  ;;  %v426_v55 = vld [vmem:[%s2067_s19 + $0x738] sm:$0xff] }
  0x94   : > { %1903 = vmatprep.subr.bf16.mxu1 %v1902_v2  ;;  %1024 = vmatprep.mubr.f32.mxu0 %v2019_v25  ;;  %v383_v2 = vld [vmem:[%s2067_s19 + $0x5e0] sm:$0xff]  ;;  %v434_v56 = vld [vmem:[%s2067_s19 + $0x778] sm:$0xff] }
  0x95   : > { %1250 = vmatprep.mubr.f32.mxu1 %v2019_v25  ;;  %1475 = vperm.xlu0 %2017, %v1461_v12   ;;  %v402_v12 = vld [vmem:[%s2067_s19 + $0x678] sm:$0xff]  ;;  %v416_v25 = vld [vmem:[%s2067_s19 + $0x6e8] sm:$0xff] }
  0x96   : > { %1833 = vmatpush1.bf16.msra.mxu0 %v1832_v9  ;;  %1495 = vperm.xlu1 %2018, %v1465_v51   ;;  %v400_v9 = vld [vmem:[%s2067_s19 + $0x668] sm:$0xff]  ;;  %v1918_v22 = vpack.c.bf16 %v402_v12, %v394_v10  ;;  %v417_v51 = vld [vmem:[%s2067_s19 + $0x6f0] sm:$0xff]  ;;  %v439_v12 = vld [vmem:[%s2067_s19 + $0x7a0] sm:$0xff] }
  0x97   : > { %1905 = vmatpush1.bf16.msra.mxu1 %v1904_v14  ;;  %1835 = vmatprep.subr.bf16.mxu0 %v1834_v15  ;;  %v1844_v14 = vpack.c.bf16 %v383_v2, %v375_v62  ;;  %v1916_v15 = vpack.c.bf16 %v385_v7, %v377_v3  ;;  %v1846_v16 = vpack.c.bf16 %v400_v9, %v392_v8  ;;  %v423_v62 = vld [vmem:[%s2067_s19 + $0x720] sm:$0xff]  ;;  %v433_v2 = vld [vmem:[%s2067_s19 + $0x770] sm:$0xff]  ;;  %v440_v3 = vld [vmem:[%s2067_s19 + $0x7a8] sm:$0xff] }
  0x98   : > { %1907 = vmatprep.subr.bf16.mxu1 %v1906_v21  ;;  %v393_v21 = vld [vmem:[%s2067_s19 + $0x630] sm:$0xff]  ;;  %v1924_v59 = vpack.c.bf16 %v417_v51, %v409_v48  ;;  %v450_v7 = vld [vmem:[%s2067_s19 + $0x7f8] sm:$0xff]  ;;  %v480_v48 = vld [vmem:[%s2067_s19 + $0x8e8] sm:$0xff] }
  0x99   : > { %1490 = vperm.xlu0 %2017, %v1464_v33   ;;  %v1920_v32 = vpack.c.bf16 %v401_v23, %v393_v21  ;;  %v1850_v33 = vpack.c.bf16 %v416_v25, %v408_v24  ;;  %v464_v21 = vld [vmem:[%s2067_s19 + $0x868] sm:$0xff]  ;;  %v466_v23 = vld [vmem:[%s2067_s19 + $0x878] sm:$0xff] }
  0x9a   : > { %1837 = vmatpush1.bf16.msra.mxu0 %v1836_v31  ;;  %1505 = vperm.xlu1 %2018, %v1467_v4   ;;  %v1848_v31 = vpack.c.bf16 %v399_v19, %v391_v18  ;;  %v448_v4 = vld [vmem:[%s2067_s19 + $0x7e8] sm:$0xff]  ;;  %v449_v18 = vld [vmem:[%s2067_s19 + $0x7f0] sm:$0xff]  ;;  %v474_v51 = vld [vmem:[%s2067_s19 + $0x8b8] sm:$0xff] }
  0x9b   : > { %1909 = vmatpush1.bf16.msra.mxu1 %v1908_v34  ;;  %1839 = vmatprep.subr.bf16.mxu0 %v1838_v47  ;;  %v407_v34 = vld [vmem:[%s2067_s19 + $0x6a0] sm:$0xff]  ;;  %v1858_v10 = vpack.c.bf16 %v448_v4, %v440_v3  ;;  %v456_v19 = vld [vmem:[%s2067_s19 + $0x828] sm:$0xff] }
  0x9c   : > { %1911 = vmatprep.subr.bf16.mxu1 %v1910_v52  ;;  %v415_v47 = vld [vmem:[%s2067_s19 + $0x6e0] sm:$0xff]  ;;  %v424_v52 = vld [vmem:[%s2067_s19 + $0x728] sm:$0xff]  ;;  %v1862_v26 = vpack.c.bf16 %v464_v21, %v456_v19 }
  0x9d   : > { %1500 = vperm.xlu0 %2017, %v1466_v63   ;;  %v1852_v57 = vpack.c.bf16 %v415_v47, %v407_v34  ;;  %v431_v63 = vld [vmem:[%s2067_s19 + $0x760] sm:$0xff]  ;;  %v465_v34 = vld [vmem:[%s2067_s19 + $0x870] sm:$0xff]  ;;  %v472_v47 = vld [vmem:[%s2067_s19 + $0x8a8] sm:$0xff] }
  0x9e   : > { %1841 = vmatpush1.bf16.msra.mxu0 %v1840_v60  ;;  %v1854_v60 = vpack.c.bf16 %v432_v54, %v424_v52  ;;  %v1856_v8 = vpack.c.bf16 %v431_v63, %v423_v62  ;;  %v482_v52 = vld [vmem:[%s2067_s19 + $0x8f8] sm:$0xff]  ;;  %v481_v62 = vld [vmem:[%s2067_s19 + $0x8f0] sm:$0xff] }
  0x9f   : > { %1913 = vmatpush1.bf16.msra.mxu1 %v1912_v0  ;;  %1843 = vmatprep.subr.bf16.mxu0 %v1842_v1  ;;  %v425_v0 = vld [vmem:[%s2067_s19 + $0x730] sm:$0xff]  ;;  %v1926_v1 = vpack.c.bf16 %v434_v56, %v426_v55  ;;  %v1866_v55 = vpack.c.bf16 %v480_v48, %v472_v47  ;;  %v471_v56 = vld [vmem:[%s2067_s19 + $0x8a0] sm:$0xff] }
  0xa0   : > { %1915 = vmatprep.subr.bf16.mxu1 %v1914_v6  ;;  %v442_v6 = vld [vmem:[%s2067_s19 + $0x7b8] sm:$0xff]  ;;  %v1928_v9 = vpack.c.bf16 %v433_v2, %v425_v0 }
  0xa2   : > { %1845 = vmatpush1.bf16.msra.mxu0 %v1844_v14  ;;  %v447_v14 = vld [vmem:[%s2067_s19 + $0x7e0] sm:$0xff] }
  0xa3   : > { %1917 = vmatpush1.bf16.msra.mxu1 %v1916_v15  ;;  %1847 = vmatprep.subr.bf16.mxu0 %v1846_v16  ;;  %v441_v15 = vld [vmem:[%s2067_s19 + $0x7b0] sm:$0xff]  ;;  %v1930_v16 = vpack.c.bf16 %v450_v7, %v442_v6  ;;  %v1860_v24 = vpack.c.bf16 %v447_v14, %v439_v12 }
  0xa4   : > { %1919 = vmatprep.subr.bf16.mxu1 %v1918_v22  ;;  %v458_v22 = vld [vmem:[%s2067_s19 + $0x838] sm:$0xff]  ;;  %v1932_v25 = vpack.c.bf16 %v449_v18, %v441_v15 }
  0xa6   : > { %1849 = vmatpush1.bf16.msra.mxu0 %v1848_v31  ;;  %v463_v31 = vld [vmem:[%s2067_s19 + $0x860] sm:$0xff] }
  0xa7   : > { %1921 = vmatpush1.bf16.msra.mxu1 %v1920_v32  ;;  %1851 = vmatprep.subr.bf16.mxu0 %v1850_v33  ;;  %v1934_v32 = vpack.c.bf16 %v466_v23, %v458_v22  ;;  %v457_v33 = vld [vmem:[%s2067_s19 + $0x830] sm:$0xff] }
  0xa8   : > { %1923 = vmatprep.subr.bf16.mxu1 %v1922_v49  ;;  %v1864_v49 = vpack.c.bf16 %v463_v31, %v455_v29  ;;  %v1936_v54 = vpack.c.bf16 %v465_v34, %v457_v33 }
  0xaa   : > { %1853 = vmatpush1.bf16.msra.mxu0 %v1852_v57  ;;  %v479_v57 = vld [vmem:[%s2067_s19 + $0x8e0] sm:$0xff] }
  0xab   : > { %1925 = vmatpush1.bf16.msra.mxu1 %v1924_v59  ;;  %1855 = vmatprep.subr.bf16.mxu0 %v1854_v60  ;;  %v1938_v59 = vpack.c.bf16 %v482_v52, %v474_v51  ;;  %v473_v60 = vld [vmem:[%s2067_s19 + $0x8b0] sm:$0xff]  ;;  %v1868_v63 = vpack.c.bf16 %v479_v57, %v471_v56  ;;  %s1653_s19 = sshll.u32 %s2790_s13, 7 }
  0xac   : > { %1927 = vmatprep.subr.bf16.mxu1 %v1926_v1  ;;  %v1940_v0 = vpack.c.bf16 %v481_v62, %v473_v60  ;;  %s2731_s11 = scalar_lea.vmem %s2788_s3, %s1653_s19 }
  0xae   : > { %1857 = vmatpush1.bf16.msra.mxu0 %v1856_v8 }
  0xaf   : > { %1929 = vmatpush1.bf16.msra.mxu1 %v1928_v9  ;;  %1859 = vmatprep.subr.bf16.mxu0 %v1858_v10 }
  0xb0   : > { %1931 = vmatprep.subr.bf16.mxu1 %v1930_v16 }
  0xb2   : > { %1861 = vmatpush1.bf16.msra.mxu0 %v1860_v24 }
  0xb3   : > { %1933 = vmatpush1.bf16.msra.mxu1 %v1932_v25  ;;  %1863 = vmatprep.subr.bf16.mxu0 %v1862_v26 }
  0xb4   : > { %1935 = vmatprep.subr.bf16.mxu1 %v1934_v32 }
  0xb5   : > { %1025 = vmatmul.mubr.f32.vlgmr.msra.gmra.mrb[16].mxu0 %v2210_v13 }
  0xb6   : > { %1251 = vmatmul.mubr.f32.vlgmr.msra.gmra.mrb[16].mxu1 %v2210_v13  ;;  %1865 = vmatpush1.bf16.msra.mxu0 %v1864_v49 }
  0xb7   : > { %1030 = vmatprep.mubr.f32.mxu0 %v2217_v17  ;;  %1256 = vmatprep.mubr.f32.mxu1 %v2217_v17 }
  0xb8   : > { %1937 = vmatpush1.bf16.msra.mxu1 %v1936_v54  ;;  %1867 = vmatprep.subr.bf16.mxu0 %v1866_v55 }
  0xb9   : > { %1031 = vmatmul.mubr.f32.gmra.mrb[18].mxu0 %v2230_v27  ;;  %1939 = vmatprep.subr.bf16.mxu1 %v1938_v59 }
  0xba   : > { %1257 = vmatmul.mubr.f32.gmra.mrb[18].mxu1 %v2230_v27  ;;  %1036 = vmatprep.mubr.f32.mxu0 %v2239_v30 }
  0xbb   : > { %1262 = vmatprep.mubr.f32.mxu1 %v2239_v30  ;;  %1869 = vmatpush1.bf16.msra.mxu0 %v1868_v63 }
  0xbc   : > { %1941 = vmatpush1.bf16.msra.mxu1 %v1940_v0 }
  0xbd   : > { %1037 = vmatmul.mubr.f32.gmra.mrb[20].mxu0 %v2247_v35 }
  0xbe   : > { %1263 = vmatmul.mubr.f32.gmra.mrb[20].mxu1 %v2247_v35  ;;  %1042 = vmatprep.mubr.f32.mxu0 %v2253_v36 }
  0xbf   : > { %1268 = vmatprep.mubr.f32.mxu1 %v2253_v36 }
  0xc1   : > { %1043 = vmatmul.mubr.f32.gmra.mrb[22].mxu0 %v2261_v37 }
  0xc2   : > { %1269 = vmatmul.mubr.f32.gmra.mrb[22].mxu1 %v2261_v37  ;;  %1048 = vmatprep.mubr.f32.mxu0 %v2267_v38 }
  0xc3   : > { %1274 = vmatprep.mubr.f32.mxu1 %v2267_v38 }
  0xc5   : > { %1049 = vmatmul.mubr.f32.gmra.mrb[24].mxu0 %v2275_v39 }
  0xc6   : > { %1275 = vmatmul.mubr.f32.gmra.mrb[24].mxu1 %v2275_v39  ;;  %1054 = vmatprep.mubr.f32.mxu0 %v2281_v40 }
  0xc7   : > { %1280 = vmatprep.mubr.f32.mxu1 %v2281_v40 }
  0xc9   : > { %1055 = vmatmul.mubr.f32.gmra.mrb[26].mxu0 %v2289_v41 }
  0xca   : > { %1281 = vmatmul.mubr.f32.gmra.mrb[26].mxu1 %v2289_v41  ;;  %1060 = vmatprep.mubr.f32.mxu0 %v2295_v42 }
  0xcb   : > { %1286 = vmatprep.mubr.f32.mxu1 %v2295_v42 }
  0xcd   : > { %1061 = vmatmul.mubr.f32.gmra.mrb[28].mxu0 %v2303_v43 }
  0xce   : > { %1287 = vmatmul.mubr.f32.gmra.mrb[28].mxu1 %v2303_v43  ;;  %1066 = vmatprep.mubr.f32.mxu0 %v2309_v44 }
  0xcf   : > { %1292 = vmatprep.mubr.f32.mxu1 %v2309_v44 }
  0xd0   : > { %v1471_v34 = vpop.permute.xlu0 %1470 }
  0xd1   : > { %1067 = vmatmul.mubr.f32.gmra.mrb[30].mxu0 %v2317_v45 }
  0xd2   : > { %1293 = vmatmul.mubr.f32.gmra.mrb[30].mxu1 %v2317_v45  ;;  %1137 = vmatprep.mubr.f32.mxu0 %v2028_v53 }
  0xd3   : > { %1363 = vmatprep.mubr.f32.mxu1 %v2028_v53 }
  0xd5   : > { %1635 = vmatmul.mubr.msk.f32.vlgmr.msra.gmra.mrb[16].mxu0 %vm483_vm0, %v2328_v50 }
  0xd6   : > { %1643 = vmatmul.mubr.msk.f32.vlgmr.msra.gmra.mrb[16].mxu1 %vm483_vm0, %v2328_v50  ;;  %1143 = vmatprep.mubr.f32.mxu0 %v2028_v53 }
  0xd7   : > { %1369 = vmatprep.mubr.f32.mxu1 %v2028_v53 }
  0xd9   : > { %1636 = vmatmul.mubr.msk.f32.gmra.mrb[18].mxu0 %vm483_vm0, %v2356_v5 }
  0xda   : > { %1644 = vmatmul.mubr.msk.f32.gmra.mrb[18].mxu1 %vm483_vm0, %v2356_v5  ;;  %1149 = vmatprep.mubr.f32.mxu0 %v2028_v53 }
  0xdb   : > { %1375 = vmatprep.mubr.f32.mxu1 %v2028_v53 }
  0xdd   : > { %1637 = vmatmul.mubr.msk.f32.gmra.mrb[20].mxu0 %vm483_vm0, %v2375_v20 }
  0xde   : > { %1645 = vmatmul.mubr.msk.f32.gmra.mrb[20].mxu1 %vm483_vm0, %v2375_v20  ;;  %1155 = vmatprep.mubr.f32.mxu0 %v2028_v53 }
  0xdf   : > { %1381 = vmatprep.mubr.f32.mxu1 %v2028_v53 }
  0xe1   : > { %1638 = vmatmul.mubr.msk.f32.gmra.mrb[22].mxu0 %vm483_vm0, %v2394_v46 }
  0xe2   : > { %1646 = vmatmul.mubr.msk.f32.gmra.mrb[22].mxu1 %vm483_vm0, %v2394_v46  ;;  %1161 = vmatprep.mubr.f32.mxu0 %v2028_v53 }
  0xe3   : > { %1387 = vmatprep.mubr.f32.mxu1 %v2028_v53 }
  0xe5   : > { %1639 = vmatmul.mubr.msk.f32.gmra.mrb[24].mxu0 %vm483_vm0, %v2413_v61 }
  0xe6   : > { %1647 = vmatmul.mubr.msk.f32.gmra.mrb[24].mxu1 %vm483_vm0, %v2413_v61  ;;  %1167 = vmatprep.mubr.f32.mxu0 %v2028_v53 }
  0xe7   : > { %1393 = vmatprep.mubr.f32.mxu1 %v2028_v53 }
  0xe9   : > { %1640 = vmatmul.mubr.msk.f32.gmra.mrb[26].mxu0 %vm483_vm0, %v2432_v11 }
  0xea   : > { %1648 = vmatmul.mubr.msk.f32.gmra.mrb[26].mxu1 %vm483_vm0, %v2432_v11  ;;  %1173 = vmatprep.mubr.f32.mxu0 %v2028_v53 }
  0xeb   : > { %1399 = vmatprep.mubr.f32.mxu1 %v2028_v53 }
  0xed   : > { %1641 = vmatmul.mubr.msk.f32.gmra.mrb[28].mxu0 %vm483_vm0, %v2451_v28 }
  0xee   : > { %1649 = vmatmul.mubr.msk.f32.gmra.mrb[28].mxu1 %vm483_vm0, %v2451_v28  ;;  %1179 = vmatprep.mubr.f32.mxu0 %v2028_v53 }
  0xef   : > { %1405 = vmatprep.mubr.f32.mxu1 %v2028_v53 }
  0xf1   : > { %1642 = vmatmul.mubr.msk.f32.gmra.mrb[30].mxu0 %vm483_vm0, %v2472_v58 }
  0xf2   : > { %1650 = vmatmul.mubr.msk.f32.gmra.mrb[30].mxu1 %vm483_vm0, %v2472_v58 }
 0x148   : > { %v687_v13 = vpop.f32.mrb[0].mxu0 }
 0x149   : > { %v913_v17 = vpop.f32.mrb[0].mxu1  ;;  %v689_v27 = vpop.f32.mrb[1].mxu0 }
 0x14a   : > { %v1412_v30 = vmax.f32 %v687_v13, %v913_v17  ;;  %v915_v35 = vpop.f32.mrb[1].mxu1  ;;  %v1476_v17 = vpop.permute.xlu0 %1475 }
 0x14b   : > { %v1413_v36 = vmax.f32 %v689_v27, %v915_v35 }
 0x14c   : > { %v693_v37 = vpop.f32.mrb[2].mxu0 }
 0x14d   : > { %v919_v38 = vpop.f32.mrb[2].mxu1  ;;  %v695_v39 = vpop.f32.mrb[3].mxu0 }
 0x14e   : > { %v1414_v40 = vmax.f32 %v693_v37, %v919_v38  ;;  %v921_v41 = vpop.f32.mrb[3].mxu1 }
 0x14f   : > { %v1415_v42 = vmax.f32 %v695_v39, %v921_v41 }
 0x150   : > { %v2655_v43 = vpop.f32.mrb[4].mxu0 }
 0x151   : > { %v2657_v44 = vpop.f32.mrb[4].mxu1  ;;  %v2659_v45 = vpop.f32.mrb[5].mxu0 }
 0x152   : > { %v1416_v50 = vmax.f32 %v2655_v43, %v2657_v44  ;;  %v2663_v53 = vpop.f32.mrb[5].mxu1 }
 0x153   : > { %v1417_v5 = vmax.f32 %v2659_v45, %v2663_v53 }
 0x154   : > { %v2667_v20 = vpop.f32.mrb[6].mxu0 }
 0x155   : > { %v2669_v46 = vpop.f32.mrb[6].mxu1  ;;  %v2671_v61 = vpop.f32.mrb[7].mxu0 }
 0x156   : > { %v1418_v11 = vmax.f32 %v2667_v20, %v2669_v46  ;;  %v2675_v28 = vpop.f32.mrb[7].mxu1 }
 0x157   : > { %v1419_v58 = vmax.f32 %v2671_v61, %v2675_v28 }
 0x158   : > { %v2679_v1 = vpop.f32.mrb[8].mxu0 }
 0x159   : > { %v2681_v2 = vpop.f32.mrb[8].mxu1  ;;  %v2683_v3 = vpop.f32.mrb[9].mxu0 }
 0x15a   : > { %v1420_v4 = vmax.f32 %v2679_v1, %v2681_v2  ;;  %v2687_v6 = vpop.f32.mrb[9].mxu1 }
 0x15b   : > { %v1421_v7 = vmax.f32 %v2683_v3, %v2687_v6 }
 0x15c   : > { %v2691_v8 = vpop.f32.mrb[10].mxu0 }
 0x15d   : > { %v2693_v9 = vpop.f32.mrb[10].mxu1  ;;  %v2695_v10 = vpop.f32.mrb[11].mxu0 }
 0x15e   : > { %v1422_v12 = vmax.f32 %v2691_v8, %v2693_v9  ;;  %v2699_v14 = vpop.f32.mrb[11].mxu1 }
 0x15f   : > { %v1423_v15 = vmax.f32 %v2695_v10, %v2699_v14 }
 0x160   : > { %v2703_v16 = vpop.f32.mrb[12].mxu0 }
 0x161   : > { %v2705_v18 = vpop.f32.mrb[12].mxu1  ;;  %v2707_v19 = vpop.f32.mrb[13].mxu0 }
 0x162   : > { %v1424_v21 = vmax.f32 %v2703_v16, %v2705_v18  ;;  %v2711_v22 = vpop.f32.mrb[13].mxu1 }
 0x163   : > { %v1425_v23 = vmax.f32 %v2707_v19, %v2711_v22 }
 0x164   : > { %v2715_v24 = vpop.f32.mrb[14].mxu0 }
 0x165   : > { %v2717_v25 = vpop.f32.mrb[14].mxu1  ;;  %v2719_v26 = vpop.f32.mrb[15].mxu0 }
 0x166   : > { %v1426_v29 = vmax.f32 %v2715_v24, %v2717_v25  ;;  %v2723_v31 = vpop.f32.mrb[15].mxu1 }
 0x167   : > { %v1427_v32 = vmax.f32 %v2719_v26, %v2723_v31 }
 0x1a8   : > { %v1139_v33 = vpop.f32.mrb[16].mxu0 }
 0x1a9   : > { %v1428_v47 = vmax.f32 %v1412_v30, %v1139_v33  ;;  %v1365_v48 = vpop.f32.mrb[16].mxu1  ;;  %v1141_v49 = vpop.f32.mrb[17].mxu0 }
 0x1aa   : > { %v1429_v51 = vmax.f32 %v1413_v36, %v1141_v49  ;;  %v1367_v52 = vpop.f32.mrb[17].mxu1  ;;  %v1481_v33 = vpop.permute.xlu1 %1480 }
 0x1ab   : > { %v1444_v54 = vmax.f32 %v1428_v47, %v1365_v48 }
 0x1ac   : > { %v1445_v55 = vmax.f32 %v1429_v51, %v1367_v52  ;;  %v1145_v56 = vpop.f32.mrb[18].mxu0 }
 0x1ad   : > { %v1508_v57 = vadd.f32 %v1471_v34, %v1444_v54  ;;  %v1430_v59 = vmax.f32 %v1414_v40, %v1145_v56  ;;  %v1371_v60 = vpop.f32.mrb[18].mxu1  ;;  %v1147_v62 = vpop.f32.mrb[19].mxu0 }
 0x1ae   : > { %v1509_v63 = vadd.f32 %v1471_v34, %v1445_v55  ;;  %v1431_v0 = vmax.f32 %v1415_v42, %v1147_v62  ;;  %v1373_v13 = vpop.f32.mrb[19].mxu1  ;;  %v1486_v62 = vpop.permute.xlu1 %1485 }
 0x1af   : > { %v1524_v27 = vmax.f32 %v1508_v57, 0.0  ;;  %v1446_v30 = vmax.f32 %v1430_v59, %v1371_v60 }
 0x1b0   : > { %v1525_v35 = vmax.f32 %v1509_v63, 0.0  ;;  %v1447_v36 = vmax.f32 %v1431_v0, %v1373_v13  ;;  %v1151_v37 = vpop.f32.mrb[20].mxu0 }
 0x1b1   : > { %1540 = vst [vmem:[%s2731_s11] sm:$0xff] %v1524_v27  ;;  %v1510_v38 = vadd.f32 %v1476_v17, %v1446_v30  ;;  %v1432_v39 = vmax.f32 %v1416_v50, %v1151_v37  ;;  %v1377_v40 = vpop.f32.mrb[20].mxu1  ;;  %v1153_v41 = vpop.f32.mrb[21].mxu0 }
 0x1b2   : > { %1541 = vst [vmem:[%s2731_s11 + $0x8] sm:$0xff] %v1525_v35  ;;  %v1511_v43 = vadd.f32 %v1476_v17, %v1447_v36  ;;  %v1433_v42 = vmax.f32 %v1417_v5, %v1153_v41  ;;  %v1379_v44 = vpop.f32.mrb[21].mxu1  ;;  %v1491_v35 = vpop.permute.xlu0 %1490 }
 0x1b3   : > { %v1526_v34 = vmax.f32 %v1510_v38, 0.0  ;;  %v1448_v47 = vmax.f32 %v1432_v39, %v1377_v40  ;;  %v1496_v40 = vpop.permute.xlu1 %1495 }
 0x1b4   : > { %v1527_v48 = vmax.f32 %v1511_v43, 0.0  ;;  %v1449_v49 = vmax.f32 %v1433_v42, %v1379_v44  ;;  %v1157_v51 = vpop.f32.mrb[22].mxu0 }
 0x1b5   : > { %1542 = vst [vmem:[%s2731_s11 + $0x10] sm:$0xff] %v1526_v34  ;;  %v1512_v52 = vadd.f32 %v1481_v33, %v1448_v47  ;;  %v1434_v50 = vmax.f32 %v1418_v11, %v1157_v51  ;;  %v1383_v54 = vpop.f32.mrb[22].mxu1  ;;  %v1159_v55 = vpop.f32.mrb[23].mxu0 }
 0x1b6   : > { %1543 = vst [vmem:[%s2731_s11 + $0x18] sm:$0xff] %v1527_v48  ;;  %v1513_v45 = vadd.f32 %v1481_v33, %v1449_v49  ;;  %v1435_v53 = vmax.f32 %v1419_v58, %v1159_v55  ;;  %v1385_v5 = vpop.f32.mrb[23].mxu1  ;;  %v1501_v48 = vpop.permute.xlu0 %1500 }
 0x1b7   : > { %v1528_v56 = vmax.f32 %v1512_v52, 0.0  ;;  %v1450_v57 = vmax.f32 %v1434_v50, %v1383_v54  ;;  %v1506_v55 = vpop.permute.xlu1 %1505 }
 0x1b8   : > { %v1529_v59 = vmax.f32 %v1513_v45, 0.0  ;;  %v1451_v60 = vmax.f32 %v1435_v53, %v1385_v5  ;;  %v1163_v63 = vpop.f32.mrb[24].mxu0 }
 0x1b9   : > { %1544 = vst [vmem:[%s2731_s11 + $0x20] sm:$0xff] %v1528_v56  ;;  %v1514_v20 = vadd.f32 %v1486_v62, %v1450_v57  ;;  %v1436_v46 = vmax.f32 %v1420_v4, %v1163_v63  ;;  %v1389_v11 = vpop.f32.mrb[24].mxu1  ;;  %v1165_v0 = vpop.f32.mrb[25].mxu0 }
 0x1ba   : > { %1545 = vst [vmem:[%s2731_s11 + $0x28] sm:$0xff] %v1529_v59  ;;  %v1515_v61 = vadd.f32 %v1486_v62, %v1451_v60  ;;  %v1437_v28 = vmax.f32 %v1421_v7, %v1165_v0  ;;  %v1391_v58 = vpop.f32.mrb[25].mxu1 }
 0x1bb   : > { %v1530_v13 = vmax.f32 %v1514_v20, 0.0  ;;  %v1452_v17 = vmax.f32 %v1436_v46, %v1389_v11 }
 0x1bc   : > { %v1531_v27 = vmax.f32 %v1515_v61, 0.0  ;;  %v1453_v30 = vmax.f32 %v1437_v28, %v1391_v58  ;;  %v1169_v36 = vpop.f32.mrb[26].mxu0 }
 0x1bd   : > { %1546 = vst [vmem:[%s2731_s11 + $0x30] sm:$0xff] %v1530_v13  ;;  %v1516_v1 = vadd.f32 %v1491_v35, %v1452_v17  ;;  %v1438_v2 = vmax.f32 %v1422_v12, %v1169_v36  ;;  %v1395_v4 = vpop.f32.mrb[26].mxu1  ;;  %v1171_v37 = vpop.f32.mrb[27].mxu0 }
 0x1be   : > { %1547 = vst [vmem:[%s2731_s11 + $0x38] sm:$0xff] %v1531_v27  ;;  %v1517_v3 = vadd.f32 %v1491_v35, %v1453_v30  ;;  %v1439_v6 = vmax.f32 %v1423_v15, %v1171_v37  ;;  %v1397_v7 = vpop.f32.mrb[27].mxu1 }
 0x1bf   : > { %v1532_v38 = vmax.f32 %v1516_v1, 0.0  ;;  %v1454_v39 = vmax.f32 %v1438_v2, %v1395_v4 }
 0x1c0   : > { %v1533_v41 = vmax.f32 %v1517_v3, 0.0  ;;  %v1455_v43 = vmax.f32 %v1439_v6, %v1397_v7  ;;  %v1175_v42 = vpop.f32.mrb[28].mxu0 }
 0x1c1   : > { %1548 = vst [vmem:[%s2731_s11 + $0x40] sm:$0xff] %v1532_v38  ;;  %v1518_v8 = vadd.f32 %v1496_v40, %v1454_v39  ;;  %v1440_v9 = vmax.f32 %v1424_v21, %v1175_v42  ;;  %v1401_v12 = vpop.f32.mrb[28].mxu1  ;;  %v1177_v44 = vpop.f32.mrb[29].mxu0 }
 0x1c2   : > { %1549 = vst [vmem:[%s2731_s11 + $0x48] sm:$0xff] %v1533_v41  ;;  %v1519_v10 = vadd.f32 %v1496_v40, %v1455_v43  ;;  %v1441_v14 = vmax.f32 %v1425_v23, %v1177_v44  ;;  %v1403_v15 = vpop.f32.mrb[29].mxu1 }
 0x1c3   : > { %v1534_v33 = vmax.f32 %v1518_v8, 0.0  ;;  %v1456_v34 = vmax.f32 %v1440_v9, %v1401_v12 }
 0x1c4   : > { %v1535_v47 = vmax.f32 %v1519_v10, 0.0  ;;  %v1457_v49 = vmax.f32 %v1441_v14, %v1403_v15  ;;  %v1181_v51 = vpop.f32.mrb[30].mxu0 }
 0x1c5   : > { %1550 = vst [vmem:[%s2731_s11 + $0x50] sm:$0xff] %v1534_v33  ;;  %v1520_v16 = vadd.f32 %v1501_v48, %v1456_v34  ;;  %v1442_v18 = vmax.f32 %v1426_v29, %v1181_v51  ;;  %v1407_v21 = vpop.f32.mrb[30].mxu1  ;;  %v1183_v52 = vpop.f32.mrb[31].mxu0 }
 0x1c6   : > { %1551 = vst [vmem:[%s2731_s11 + $0x58] sm:$0xff] %v1535_v47  ;;  %v1521_v19 = vadd.f32 %v1501_v48, %v1457_v49  ;;  %v1443_v22 = vmax.f32 %v1427_v32, %v1183_v52  ;;  %v1409_v23 = vpop.f32.mrb[31].mxu1 }
 0x1c7   : > { %v1536_v50 = vmax.f32 %v1520_v16, 0.0  ;;  %v1458_v54 = vmax.f32 %v1442_v18, %v1407_v21 }
 0x1c8   : > { %v1537_v45 = vmax.f32 %v1521_v19, 0.0  ;;  %v1459_v53 = vmax.f32 %v1443_v22, %v1409_v23 }
 0x1c9   : > { %1552 = vst [vmem:[%s2731_s11 + $0x60] sm:$0xff] %v1536_v50  ;;  %v1522_v5 = vadd.f32 %v1506_v55, %v1458_v54 }
 0x1ca   : > { %1553 = vst [vmem:[%s2731_s11 + $0x68] sm:$0xff] %v1537_v45  ;;  %v1523_v24 = vadd.f32 %v1506_v55, %v1459_v53 }
 0x1cb   : > { %v1538_v25 = vmax.f32 %v1522_v5, 0.0 }
 0x1cc   : > { %v1539_v29 = vmax.f32 %v1523_v24, 0.0 }
 0x1cd   : > { %1554 = vst [vmem:[%s2731_s11 + $0x70] sm:$0xff] %v1538_v25 }
 0x1ce   : > { %1555 = vst [vmem:[%s2731_s11 + $0x78] sm:$0xff] %v1539_v29 }
 0x1cf PF: > { %s13_s12 = sadd.s32 1, %s2026_s12  }
 0x1d0   : > { %p10_p4 = scmp.ge.s32.totalorder %s13_s12, 4  }
 0x1d2   :  { %12 = sbr.rel (!%p10_p4) target bundleno = 1 (0x1), region = 62 }

// kernel: simple_cnn_forward.5
= control target key start
LH: loop header
LB: loop body
LE: loop exit
PB: predicated region body
PF: predicated region fallthrough
CT: control target
= control target key end

     0   :  { %10 = vsyncpa [#allocation4], 0  ;;  %s8149_s18 = smov 0   ;;  %s8839_s0 = inlined_call_operand.vmem [shape: f32[2,16384], index: 0, kind: input, shape index: {}]   ;;  %s8840_s1 = inlined_call_operand.vmem [shape: bf16[16384,128], index: 1, kind: input, shape index: {}]   ;;  %s8841_s2 = inlined_call_operand.vmem [shape: f32[1,128], index: 2, kind: input, shape index: {}]   ;;  %s8842_s3 = inlined_call_operand.vmem [shape: f32[128,40], index: 3, kind: input, shape index: {}]   ;;  %s8843_s4 = inlined_call_operand.vmem [shape: f32[1,40], index: 4, kind: input, shape index: {}]   ;;  %s8844_s5 = inlined_call_operand.hbm [shape: f32[2,40], index: 5, kind: output, shape index: {}]  }
   0x1 LB: > { %s8155_s19 = sadd.s32 4294967295, %s8111_s18   ;;  %p6222_p0 = scmp.ge.s32.totalorder %s8111_s18, 1  ;;  %s8111_s18 = sphi %s8149_s18, %s16_s18  }
   0x2   : > { %p195_p1 = scmp.lt.s32.totalorder %s8111_s18, 3 }
   0x4   : > { %p196_p2 = pnand %p6222_p0, %p195_p1 }
   0x5   : > { %s6223_s20 = sshll.u32 (!%p196_p2), %s8155_s19, 6  ;;  %s6225_s21 = sshll.u32 (!%p196_p2), %s8155_s19, 10 }
   0x6   : > { %199 = sbr.rel (%p196_p2) target bundleno = 1010 (0x3f2), region = 40  ;;  %p224_p3 = scmp.lt.s32.totalorder (!%p196_p2), %s6223_s20, 127 }
   0x7   : > { %p230_p4 = scmp.lt.s32.totalorder (!%p196_p2), %s6225_s21, 2047  ;;  %p6227_p5 = scmp.ne.s32.totalorder (!%p196_p2), %s8155_s19, 0 }
   0xd   : > { %s8846_s20 = smov (!%p224_p3, %s6223_s20), 127  ;;  %s8848_s21 = smov (!%p230_p4, %s6225_s21), 2047 }
   0xe   : > { %s6224_s22 = sshll.u32 %s8846_s20, 1  ;;  %s6226_s26 = sshll.u32 %s8848_s21, 2  ;;  %v8113_v0 = vmov (!%p6227_p5), 0.0  }
   0xf   : > { %s8164_s25 = scalar_lea.vmem %s8839_s0, %s6224_s22  ;;  %s8169_s29 = scalar_lea.vmem %s8840_s1, %s6226_s26  ;;  %240 = vst [vmem:[#allocation2] sm:$0x3] (!%p6227_p5), %v8113_v0 }
  0x10   : > { %239 = sbr.rel (%p6227_p5) target bundleno = 23 (0x17), region = 44 }
  0x17 PF: > { %v7547_v1 = vld [vmem:[%s8169_s29 + $0x40] sm:$0xff]   ;;  %v7551_v5 = vld [vmem:[%s8169_s29 + $0x48] sm:$0xff]   ;;  %v7555_v9 = vld [vmem:[%s8169_s29 + $0x50] sm:$0xff]   ;;  %v278_v29 = vlaneseq  ;;  %v8114_v37 = vmov 1983009808   ;;  %p6740_p6 = scmp.ne.s32.totalorder %s8155_s19, 1 }
  0x18   : > { %v7548_v2 = vld [vmem:[%s8169_s29 + $0xc0] sm:$0xff]   ;;  %6747 = vmatprep.subr.bf16.mxu0 %v7547_v1  ;;  %v7552_v6 = vld [vmem:[%s8169_s29 + $0xc8] sm:$0xff]   ;;  %v7556_v10 = vld [vmem:[%s8169_s29 + $0xd0] sm:$0xff]   ;;  %v276_v38 = vunpack.c.l.s4 %v8114_v37  ;;  %vm8116_vm0 = vmmov (!%p6740_p6), 0   ;;  %vm6159_vm1 = vcmask (!%p6740_p6), 320512  }
  0x19   : > { %v7549_v3 = vld [vmem:[%s8169_s29] sm:$0xff]   ;;  %6769 = vmatprep.subr.bf16.mxu1 %v7548_v2  ;;  %v7553_v7 = vld [vmem:[%s8169_s29 + $0x8] sm:$0xff]   ;;  %v7557_v11 = vld [vmem:[%s8169_s29 + $0x10] sm:$0xff]   ;;  %v279_v34 = vshrl.u32 %v278_v29, 7 }
  0x1a   : > { %v7550_v4 = vld [vmem:[%s8169_s29 + $0x80] sm:$0xff]   ;;  %6748 = vmatpush3.bf16.msra.mxu0 %v7549_v3  ;;  %v7554_v8 = vld [vmem:[%s8169_s29 + $0x88] sm:$0xff]   ;;  %v7558_v12 = vld [vmem:[%s8169_s29 + $0x90] sm:$0xff]   ;;  %v277_v40 = vunpack.c.0.s8 %v276_v38 }
  0x1b   : > { %6770 = vmatpush3.bf16.msra.mxu1 %v7550_v4  ;;  %6749 = vmatprep.subr.bf16.mxu0 %v7551_v5  ;;  %v7559_v13 = vld [vmem:[%s8169_s29 + $0x58] sm:$0xff]   ;;  %v7563_v17 = vld [vmem:[%s8169_s29 + $0x60] sm:$0xff]   ;;  %v7567_v21 = vld [vmem:[%s8169_s29 + $0x68] sm:$0xff]  }
  0x1c   : > { %6771 = vmatprep.subr.bf16.mxu1 %v7552_v6  ;;  %v7560_v14 = vld [vmem:[%s8169_s29 + $0xd8] sm:$0xff]   ;;  %v7564_v18 = vld [vmem:[%s8169_s29 + $0xe0] sm:$0xff]   ;;  %v7568_v22 = vld [vmem:[%s8169_s29 + $0xe8] sm:$0xff]   ;;  %v8207_v42 = vsub.s32 %v277_v40, %v279_v34 }
  0x1d   : > { %v7561_v15 = vld [vmem:[%s8169_s29 + $0x18] sm:$0xff]   ;;  %v7565_v19 = vld [vmem:[%s8169_s29 + $0x20] sm:$0xff]   ;;  %v7569_v23 = vld [vmem:[%s8169_s29 + $0x28] sm:$0xff]  }
  0x1e   : > { %6750 = vmatpush3.bf16.msra.mxu0 %v7553_v7  ;;  %v7562_v16 = vld [vmem:[%s8169_s29 + $0x98] sm:$0xff]   ;;  %v7566_v20 = vld [vmem:[%s8169_s29 + $0xa0] sm:$0xff]   ;;  %v7570_v24 = vld [vmem:[%s8169_s29 + $0xa8] sm:$0xff]  }
  0x1f   : > { %6772 = vmatpush3.bf16.msra.mxu1 %v7554_v8  ;;  %6751 = vmatprep.subr.bf16.mxu0 %v7555_v9  ;;  %v7571_v25 = vld [vmem:[%s8169_s29 + $0x70] sm:$0xff]   ;;  %v7575_v30 = vld [vmem:[%s8169_s29 + $0x78] sm:$0xff]   ;;  %v242_v35 = vld [vmem:[%s8164_s25] sm:$0xff] }
  0x20   : > { %6773 = vmatprep.subr.bf16.mxu1 %v7556_v10  ;;  %v7572_v26 = vld [vmem:[%s8169_s29 + $0xf0] sm:$0xff]   ;;  %v7576_v31 = vld [vmem:[%s8169_s29 + $0xf8] sm:$0xff]   ;;  %v7580_v36 = vld [vmem:[%s8169_s29 + $0x140] sm:$0xff]   ;;  %v274_v41 = vcombine.high %v242_v35, %v242_v35  ;;  %v281_v43 = vrot.slane %v242_v35, %v8207_v42 }
  0x21   : > { %v7573_v27 = vld [vmem:[%s8169_s29 + $0x30] sm:$0xff]   ;;  %v7577_v32 = vld [vmem:[%s8169_s29 + $0x38] sm:$0xff]   ;;  %v7581_v39 = vld [vmem:[%s8169_s29 + $0x1c0] sm:$0xff]  }
  0x22   : > { %6752 = vmatpush3.bf16.msra.mxu0 %v7557_v11  ;;  %v7574_v28 = vld [vmem:[%s8169_s29 + $0xb0] sm:$0xff]   ;;  %v7578_v33 = vld [vmem:[%s8169_s29 + $0xb8] sm:$0xff]   ;;  %v288_v44 = vrot.slane %v274_v41, %v8207_v42  ;;  %v289_v45 = vcombine.high %v281_v43, %v281_v43  ;;  %v7582_v47 = vld [vmem:[%s8169_s29 + $0x100] sm:$0xff]   ;;  %v610_v48 = vpack.c.bf16 %v281_v43, %v281_v43 }
  0x23   : > { %6774 = vmatpush3.bf16.msra.mxu1 %v7558_v12  ;;  %6753 = vmatprep.subr.bf16.mxu0 %v7559_v13  ;;  %v7583_v50 = vld [vmem:[%s8169_s29 + $0x180] sm:$0xff]   ;;  %v7584_v53 = vld [vmem:[%s8169_s29 + $0x148] sm:$0xff]   ;;  %v7588_v57 = vld [vmem:[%s8169_s29 + $0x150] sm:$0xff]  }
  0x24   : > { %6775 = vmatprep.subr.bf16.mxu1 %v7560_v14  ;;  %v290_v46 = vcombine.high %v288_v44, %v288_v44  ;;  %v612_v49 = vpack.c.bf16 %v288_v44, %v288_v44  ;;  %v611_v51 = vpack.c.bf16 %v289_v45, %v289_v45  ;;  %v7585_v54 = vld [vmem:[%s8169_s29 + $0x1c8] sm:$0xff]   ;;  %v7589_v58 = vld [vmem:[%s8169_s29 + $0x1d0] sm:$0xff]   ;;  %v7592_v61 = vld [vmem:[%s8169_s29 + $0x158] sm:$0xff]  }
  0x25   : > { %v7586_v55 = vld [vmem:[%s8169_s29 + $0x108] sm:$0xff]   ;;  %v7590_v59 = vld [vmem:[%s8169_s29 + $0x110] sm:$0xff]   ;;  %v7593_v62 = vld [vmem:[%s8169_s29 + $0x1d8] sm:$0xff]  }
  0x26   : > { %6754 = vmatpush3.bf16.msra.mxu0 %v7561_v15  ;;  %v613_v52 = vpack.c.bf16 %v290_v46, %v290_v46  ;;  %4802 = vmatprep.mubr.bf16.mxu0 %v611_v51  ;;  %v7587_v56 = vld [vmem:[%s8169_s29 + $0x188] sm:$0xff]   ;;  %v7591_v60 = vld [vmem:[%s8169_s29 + $0x190] sm:$0xff]   ;;  %v7594_v63 = vld [vmem:[%s8169_s29 + $0x118] sm:$0xff]  }
  0x27   : > { %6776 = vmatpush3.bf16.msra.mxu1 %v7562_v16  ;;  %6755 = vmatprep.subr.bf16.mxu0 %v7563_v17  ;;  %v7595_v0 = vld [vmem:[%s8169_s29 + $0x198] sm:$0xff]   ;;  %v7596_v1 = vld [vmem:[%s8169_s29 + $0x160] sm:$0xff]   ;;  %v7600_v5 = vld [vmem:[%s8169_s29 + $0x168] sm:$0xff]  }
  0x28   : > { %6777 = vmatprep.subr.bf16.mxu1 %v7564_v18  ;;  %4842 = vmatprep.mubr.bf16.mxu1 %v613_v52  ;;  %v7597_v2 = vld [vmem:[%s8169_s29 + $0x1e0] sm:$0xff]   ;;  %v7601_v6 = vld [vmem:[%s8169_s29 + $0x1e8] sm:$0xff]   ;;  %v7604_v9 = vld [vmem:[%s8169_s29 + $0x170] sm:$0xff]  }
  0x29   : > { %v7598_v3 = vld [vmem:[%s8169_s29 + $0x120] sm:$0xff]   ;;  %v7602_v7 = vld [vmem:[%s8169_s29 + $0x128] sm:$0xff]   ;;  %v7605_v10 = vld [vmem:[%s8169_s29 + $0x1f0] sm:$0xff]  }
  0x2a   : > { %6756 = vmatpush3.bf16.msra.mxu0 %v7565_v19  ;;  %v7599_v4 = vld [vmem:[%s8169_s29 + $0x1a0] sm:$0xff]   ;;  %v7603_v8 = vld [vmem:[%s8169_s29 + $0x1a8] sm:$0xff]   ;;  %v7606_v12 = vld [vmem:[%s8169_s29 + $0x130] sm:$0xff]  }
  0x2b   : > { %6778 = vmatpush3.bf16.msra.mxu1 %v7566_v20  ;;  %6757 = vmatprep.subr.bf16.mxu0 %v7567_v21  ;;  %v243_v11 = vld [vmem:[%s8164_s25 + $0x8] sm:$0xff]  ;;  %v7607_v15 = vld [vmem:[%s8169_s29 + $0x1b0] sm:$0xff]   ;;  %v7608_v16 = vld [vmem:[%s8169_s29 + $0x178] sm:$0xff]  }
  0x2c   : > { %6779 = vmatprep.subr.bf16.mxu1 %v7568_v22  ;;  %v298_v13 = vrot.slane %v243_v11, %v8207_v42  ;;  %v291_v14 = vcombine.high %v243_v11, %v243_v11  ;;  %v7609_v19 = vld [vmem:[%s8169_s29 + $0x1f8] sm:$0xff]   ;;  %v7620_v34 = vld [vmem:[%s8169_s29 + $0x288] sm:$0xff]   ;;  %v7621_v35 = vld [vmem:[%s8169_s29 + $0x250] sm:$0xff]  }
  0x2d   : > { %v7610_v20 = vld [vmem:[%s8169_s29 + $0x138] sm:$0xff]   ;;  %v7623_v37 = vld [vmem:[%s8169_s29 + $0x210] sm:$0xff]   ;;  %v7629_v44 = vld [vmem:[%s8169_s29 + $0x260] sm:$0xff]  }
  0x2e   : > { %6758 = vmatpush3.bf16.msra.mxu0 %v7569_v23  ;;  %v306_v17 = vcombine.high %v298_v13, %v298_v13  ;;  %v305_v18 = vrot.slane %v291_v14, %v8207_v42  ;;  %v7611_v23 = vld [vmem:[%s8169_s29 + $0x1b8] sm:$0xff]   ;;  %v7624_v38 = vld [vmem:[%s8169_s29 + $0x290] sm:$0xff]   ;;  %v7630_v45 = vld [vmem:[%s8169_s29 + $0x2e0] sm:$0xff]  }
  0x2f   : > { %6780 = vmatpush3.bf16.msra.mxu1 %v7570_v24  ;;  %6759 = vmatprep.subr.bf16.mxu0 %v7571_v25  ;;  %v7613_v25 = vld [vmem:[%s8169_s29 + $0x240] sm:$0xff]   ;;  %v7626_v40 = vld [vmem:[%s8169_s29 + $0x2d8] sm:$0xff]   ;;  %v7636_v51 = vld [vmem:[%s8169_s29 + $0x2a8] sm:$0xff]  }
  0x30   : > { %6781 = vmatprep.subr.bf16.mxu1 %v7572_v26  ;;  %v615_v21 = vpack.c.bf16 %v306_v17, %v306_v17  ;;  %v307_v22 = vcombine.high %v305_v18, %v305_v18  ;;  %v7614_v26 = vld [vmem:[%s8169_s29 + $0x2c0] sm:$0xff]   ;;  %v616_v29 = vpack.c.bf16 %v305_v18, %v305_v18  ;;  %v7627_v41 = vld [vmem:[%s8169_s29 + $0x218] sm:$0xff]   ;;  %v7637_v52 = vld [vmem:[%s8169_s29 + $0x270] sm:$0xff]  }
  0x31   : > { %v7628_v43 = vld [vmem:[%s8169_s29 + $0x298] sm:$0xff]   ;;  %v7631_v46 = vld [vmem:[%s8169_s29 + $0x220] sm:$0xff]   ;;  %v7651_v11 = vld [vmem:[%s8169_s29 + $0x3c8] sm:$0xff]  }
  0x32   : > { %6760 = vmatpush3.bf16.msra.mxu0 %v7573_v27  ;;  %v617_v24 = vpack.c.bf16 %v307_v22, %v307_v22  ;;  %v7615_v27 = vld [vmem:[%s8169_s29 + $0x200] sm:$0xff]   ;;  %v7654_v14 = vld [vmem:[%s8169_s29 + $0x350] sm:$0xff]   ;;  %v7658_v18 = vld [vmem:[%s8169_s29 + $0x358] sm:$0xff]  }
  0x33   : > { %6782 = vmatpush3.bf16.msra.mxu1 %v7574_v28  ;;  %6761 = vmatprep.subr.bf16.mxu0 %v7575_v30  ;;  %v614_v28 = vpack.c.bf16 %v298_v13, %v298_v13  ;;  %v7616_v30 = vld [vmem:[%s8169_s29 + $0x280] sm:$0xff]   ;;  %v7653_v13 = vld [vmem:[%s8169_s29 + $0x388] sm:$0xff]   ;;  %v7657_v17 = vld [vmem:[%s8169_s29 + $0x390] sm:$0xff]  }
  0x34   : > { %6783 = vmatprep.subr.bf16.mxu1 %v7576_v31  ;;  %v7617_v31 = vld [vmem:[%s8169_s29 + $0x248] sm:$0xff]   ;;  %v7662_v22 = vld [vmem:[%s8169_s29 + $0x360] sm:$0xff]  }
  0x36   : > { %6762 = vmatpush3.bf16.msra.mxu0 %v7577_v32  ;;  %v7618_v32 = vld [vmem:[%s8169_s29 + $0x2c8] sm:$0xff]  }
  0x37   : > { %6784 = vmatpush3.bf16.msra.mxu1 %v7578_v33  ;;  %6791 = vmatprep.subr.bf16.mxu0 %v7580_v36  ;;  %v7619_v33 = vld [vmem:[%s8169_s29 + $0x208] sm:$0xff]   ;;  %v7622_v36 = vld [vmem:[%s8169_s29 + $0x2d0] sm:$0xff]  }
  0x38   : > { %6813 = vmatprep.subr.bf16.mxu1 %v7581_v39  ;;  %v7625_v39 = vld [vmem:[%s8169_s29 + $0x258] sm:$0xff]  }
  0x39   : > { %4803 = vmatmul.mubr.bf16.vlgmr.msra.gmra.mrb[0].mxu0 %v610_v48  ;;  %v7633_v48 = vld [vmem:[%s8169_s29 + $0x268] sm:$0xff]  }
  0x3a   : > { %4843 = vmatmul.mubr.bf16.vlgmr.msra.gmra.mrb[0].mxu1 %v612_v49  ;;  %6792 = vmatpush3.bf16.msra.mxu0 %v7582_v47  ;;  %v7632_v47 = vld [vmem:[%s8169_s29 + $0x2a0] sm:$0xff]   ;;  %v7634_v49 = vld [vmem:[%s8169_s29 + $0x2e8] sm:$0xff]  }
  0x3b   : > { %6814 = vmatpush3.bf16.msra.mxu1 %v7583_v50  ;;  %6793 = vmatprep.subr.bf16.mxu0 %v7584_v53  ;;  %v7635_v50 = vld [vmem:[%s8169_s29 + $0x228] sm:$0xff]   ;;  %v7638_v53 = vld [vmem:[%s8169_s29 + $0x2f0] sm:$0xff]  }
  0x3c   : > { %6815 = vmatprep.subr.bf16.mxu1 %v7585_v54  ;;  %4882 = vmatprep.mubr.bf16.mxu0 %v615_v21  ;;  %v244_v54 = vld [vmem:[%s8164_s25 + $0x10] sm:$0xff]  ;;  %v7661_v21 = vld [vmem:[%s8169_s29 + $0x398] sm:$0xff]  }
  0x3d   : > { %4922 = vmatprep.mubr.bf16.mxu1 %v617_v24  ;;  %v7664_v24 = vld [vmem:[%s8169_s29 + $0x320] sm:$0xff]  }
  0x3e   : > { %6794 = vmatpush3.bf16.msra.mxu0 %v7586_v55  ;;  %v7639_v55 = vld [vmem:[%s8169_s29 + $0x230] sm:$0xff]  }
  0x3f   : > { %6816 = vmatpush3.bf16.msra.mxu1 %v7587_v56  ;;  %6795 = vmatprep.subr.bf16.mxu0 %v7588_v57  ;;  %v315_v56 = vrot.slane %v244_v54, %v8207_v42  ;;  %v308_v57 = vcombine.high %v244_v54, %v244_v54  ;;  %v7684_v54 = vld [vmem:[%s8169_s29 + $0x4c8] sm:$0xff]  }
  0x40   : > { %6817 = vmatprep.subr.bf16.mxu1 %v7589_v58  ;;  %v7640_v58 = vld [vmem:[%s8169_s29 + $0x2b0] sm:$0xff]  }
  0x42   : > { %6796 = vmatpush3.bf16.msra.mxu0 %v7590_v59  ;;  %v7641_v59 = vld [vmem:[%s8169_s29 + $0x278] sm:$0xff]  }
  0x43   : > { %6818 = vmatpush3.bf16.msra.mxu1 %v7591_v60  ;;  %6797 = vmatprep.subr.bf16.mxu0 %v7592_v61  ;;  %v323_v60 = vcombine.high %v315_v56, %v315_v56  ;;  %v322_v61 = vrot.slane %v308_v57, %v8207_v42  ;;  %v7687_v57 = vld [vmem:[%s8169_s29 + $0x450] sm:$0xff]  }
  0x44   : > { %6819 = vmatprep.subr.bf16.mxu1 %v7593_v62  ;;  %v7642_v62 = vld [vmem:[%s8169_s29 + $0x2f8] sm:$0xff]  }
  0x46   : > { %6798 = vmatpush3.bf16.msra.mxu0 %v7594_v63  ;;  %v7643_v63 = vld [vmem:[%s8169_s29 + $0x238] sm:$0xff]  }
  0x47   : > { %6820 = vmatpush3.bf16.msra.mxu1 %v7595_v0  ;;  %6799 = vmatprep.subr.bf16.mxu0 %v7596_v1  ;;  %v619_v0 = vpack.c.bf16 %v323_v60, %v323_v60  ;;  %v324_v1 = vcombine.high %v322_v61, %v322_v61  ;;  %v7690_v60 = vld [vmem:[%s8169_s29 + $0x490] sm:$0xff]  }
  0x48   : > { %6821 = vmatprep.subr.bf16.mxu1 %v7597_v2  ;;  %v7644_v2 = vld [vmem:[%s8169_s29 + $0x2b8] sm:$0xff]  }
  0x4a   : > { %6800 = vmatpush3.bf16.msra.mxu0 %v7598_v3  ;;  %v621_v3 = vpack.c.bf16 %v324_v1, %v324_v1  ;;  %v7695_v1 = vld [vmem:[%s8169_s29 + $0x460] sm:$0xff]  }
  0x4b   : > { %6822 = vmatpush3.bf16.msra.mxu1 %v7599_v4  ;;  %6801 = vmatprep.subr.bf16.mxu0 %v7600_v5  ;;  %v7646_v4 = vld [vmem:[%s8169_s29 + $0x340] sm:$0xff]  }
  0x4c   : > { %6823 = vmatprep.subr.bf16.mxu1 %v7601_v6  ;;  %v7647_v5 = vld [vmem:[%s8169_s29 + $0x3c0] sm:$0xff]  }
  0x4d   : > { %v7648_v6 = vld [vmem:[%s8169_s29 + $0x300] sm:$0xff]  }
  0x4e   : > { %6802 = vmatpush3.bf16.msra.mxu0 %v7602_v7  ;;  %v618_v7 = vpack.c.bf16 %v315_v56, %v315_v56  ;;  %v7686_v56 = vld [vmem:[%s8169_s29 + $0x488] sm:$0xff]  }
  0x4f   : > { %6824 = vmatpush3.bf16.msra.mxu1 %v7603_v8  ;;  %6803 = vmatprep.subr.bf16.mxu0 %v7604_v9  ;;  %v620_v8 = vpack.c.bf16 %v322_v61, %v322_v61  ;;  %v7649_v9 = vld [vmem:[%s8169_s29 + $0x380] sm:$0xff]   ;;  %v7691_v61 = vld [vmem:[%s8169_s29 + $0x458] sm:$0xff]  }
  0x50   : > { %6825 = vmatprep.subr.bf16.mxu1 %v7605_v10  ;;  %v7650_v10 = vld [vmem:[%s8169_s29 + $0x348] sm:$0xff]  }
  0x52   : > { %6804 = vmatpush3.bf16.msra.mxu0 %v7606_v12  ;;  %v7652_v12 = vld [vmem:[%s8169_s29 + $0x308] sm:$0xff]  }
  0x53   : > { %6826 = vmatpush3.bf16.msra.mxu1 %v7607_v15  ;;  %6805 = vmatprep.subr.bf16.mxu0 %v7608_v16  ;;  %v7655_v15 = vld [vmem:[%s8169_s29 + $0x3d0] sm:$0xff]  }
  0x54   : > { %6827 = vmatprep.subr.bf16.mxu1 %v7609_v19  ;;  %v7656_v16 = vld [vmem:[%s8169_s29 + $0x310] sm:$0xff]   ;;  %v7659_v19 = vld [vmem:[%s8169_s29 + $0x3d8] sm:$0xff]  }
  0x56   : > { %6806 = vmatpush3.bf16.msra.mxu0 %v7610_v20  ;;  %v7660_v20 = vld [vmem:[%s8169_s29 + $0x318] sm:$0xff]  }
  0x57   : > { %6828 = vmatpush3.bf16.msra.mxu1 %v7611_v23  ;;  %6835 = vmatprep.subr.bf16.mxu0 %v7613_v25  ;;  %v7663_v23 = vld [vmem:[%s8169_s29 + $0x3e0] sm:$0xff]  }
  0x58   : > { %6857 = vmatprep.subr.bf16.mxu1 %v7614_v26  ;;  %v7665_v25 = vld [vmem:[%s8169_s29 + $0x3a0] sm:$0xff]   ;;  %v7666_v26 = vld [vmem:[%s8169_s29 + $0x368] sm:$0xff]  }
  0x59   : > { %4883 = vmatmul.mubr.bf16.vlgmr.msra.gmra.mrb[4].mxu0 %v614_v28  ;;  %v7668_v28 = vld [vmem:[%s8169_s29 + $0x328] sm:$0xff]  }
  0x5a   : > { %4923 = vmatmul.mubr.bf16.vlgmr.msra.gmra.mrb[4].mxu1 %v616_v29  ;;  %6836 = vmatpush3.bf16.msra.mxu0 %v7615_v27  ;;  %v7667_v27 = vld [vmem:[%s8169_s29 + $0x3e8] sm:$0xff]  }
  0x5b   : > { %6858 = vmatpush3.bf16.msra.mxu1 %v7616_v30  ;;  %6837 = vmatprep.subr.bf16.mxu0 %v7617_v31  ;;  %v7669_v29 = vld [vmem:[%s8169_s29 + $0x3a8] sm:$0xff]   ;;  %v7670_v30 = vld [vmem:[%s8169_s29 + $0x370] sm:$0xff]  }
  0x5c   : > { %6859 = vmatprep.subr.bf16.mxu1 %v7618_v32  ;;  %4962 = vmatprep.mubr.bf16.mxu0 %v619_v0  ;;  %v7671_v31 = vld [vmem:[%s8169_s29 + $0x3f0] sm:$0xff]   ;;  %v7694_v0 = vld [vmem:[%s8169_s29 + $0x498] sm:$0xff]  }
  0x5d   : > { %5002 = vmatprep.mubr.bf16.mxu1 %v621_v3  ;;  %v7672_v32 = vld [vmem:[%s8169_s29 + $0x330] sm:$0xff]   ;;  %v7697_v3 = vld [vmem:[%s8169_s29 + $0x420] sm:$0xff]  }
  0x5e   : > { %6838 = vmatpush3.bf16.msra.mxu0 %v7619_v33  ;;  %v245_v33 = vld [vmem:[%s8164_s25 + $0x18] sm:$0xff] }
  0x5f   : > { %6860 = vmatpush3.bf16.msra.mxu1 %v7620_v34  ;;  %6839 = vmatprep.subr.bf16.mxu0 %v7621_v35  ;;  %v7673_v34 = vld [vmem:[%s8169_s29 + $0x3b0] sm:$0xff]   ;;  %v332_v35 = vrot.slane %v245_v33, %v8207_v42 }
  0x60   : > { %6861 = vmatprep.subr.bf16.mxu1 %v7622_v36  ;;  %v325_v36 = vcombine.high %v245_v33, %v245_v33  ;;  %v7718_v33 = vld [vmem:[%s8169_s29 + $0x508] sm:$0xff]  }
  0x62   : > { %6840 = vmatpush3.bf16.msra.mxu0 %v7623_v37  ;;  %v7674_v37 = vld [vmem:[%s8169_s29 + $0x378] sm:$0xff]  }
  0x63   : > { %6862 = vmatpush3.bf16.msra.mxu1 %v7624_v38  ;;  %6841 = vmatprep.subr.bf16.mxu0 %v7625_v39  ;;  %v7675_v38 = vld [vmem:[%s8169_s29 + $0x3f8] sm:$0xff]   ;;  %v340_v39 = vcombine.high %v332_v35, %v332_v35 }
  0x64   : > { %6863 = vmatprep.subr.bf16.mxu1 %v7626_v40  ;;  %v339_v40 = vrot.slane %v325_v36, %v8207_v42  ;;  %v7721_v36 = vld [vmem:[%s8169_s29 + $0x5d0] sm:$0xff]  }
  0x66   : > { %6842 = vmatpush3.bf16.msra.mxu0 %v7627_v41  ;;  %v7676_v41 = vld [vmem:[%s8169_s29 + $0x338] sm:$0xff]  }
  0x67   : > { %6864 = vmatpush3.bf16.msra.mxu1 %v7628_v43  ;;  %6843 = vmatprep.subr.bf16.mxu0 %v7629_v44  ;;  %v7677_v43 = vld [vmem:[%s8169_s29 + $0x3b8] sm:$0xff]   ;;  %v623_v44 = vpack.c.bf16 %v340_v39, %v340_v39 }
  0x68   : > { %6865 = vmatprep.subr.bf16.mxu1 %v7630_v45  ;;  %v341_v45 = vcombine.high %v339_v40, %v339_v40  ;;  %v7724_v39 = vld [vmem:[%s8169_s29 + $0x558] sm:$0xff]  }
  0x6a   : > { %6844 = vmatpush3.bf16.msra.mxu0 %v7631_v46  ;;  %v7679_v46 = vld [vmem:[%s8169_s29 + $0x440] sm:$0xff]  }
  0x6b   : > { %6866 = vmatpush3.bf16.msra.mxu1 %v7632_v47  ;;  %6845 = vmatprep.subr.bf16.mxu0 %v7633_v48  ;;  %v625_v47 = vpack.c.bf16 %v341_v45, %v341_v45  ;;  %v7680_v48 = vld [vmem:[%s8169_s29 + $0x4c0] sm:$0xff]  }
  0x6c   : > { %6867 = vmatprep.subr.bf16.mxu1 %v7634_v49  ;;  %v7681_v49 = vld [vmem:[%s8169_s29 + $0x400] sm:$0xff]  }
  0x6d   : > { %v7729_v45 = vld [vmem:[%s8169_s29 + $0x5e0] sm:$0xff]  }
  0x6e   : > { %6846 = vmatpush3.bf16.msra.mxu0 %v7635_v50  ;;  %v622_v50 = vpack.c.bf16 %v332_v35, %v332_v35  ;;  %v7720_v35 = vld [vmem:[%s8169_s29 + $0x550] sm:$0xff]  }
  0x6f   : > { %6868 = vmatpush3.bf16.msra.mxu1 %v7636_v51  ;;  %6847 = vmatprep.subr.bf16.mxu0 %v7637_v52  ;;  %v624_v51 = vpack.c.bf16 %v339_v40, %v339_v40  ;;  %v7682_v52 = vld [vmem:[%s8169_s29 + $0x480] sm:$0xff]   ;;  %v7725_v40 = vld [vmem:[%s8169_s29 + $0x5d8] sm:$0xff]  }
  0x70   : > { %6869 = vmatprep.subr.bf16.mxu1 %v7638_v53  ;;  %v7683_v53 = vld [vmem:[%s8169_s29 + $0x448] sm:$0xff]  }
  0x72   : > { %6848 = vmatpush3.bf16.msra.mxu0 %v7639_v55  ;;  %v7685_v55 = vld [vmem:[%s8169_s29 + $0x408] sm:$0xff]  }
  0x73   : > { %6870 = vmatpush3.bf16.msra.mxu1 %v7640_v58  ;;  %6849 = vmatprep.subr.bf16.mxu0 %v7641_v59  ;;  %v7688_v58 = vld [vmem:[%s8169_s29 + $0x4d0] sm:$0xff]  }
  0x74   : > { %6871 = vmatprep.subr.bf16.mxu1 %v7642_v62  ;;  %v7689_v59 = vld [vmem:[%s8169_s29 + $0x410] sm:$0xff]   ;;  %v7692_v62 = vld [vmem:[%s8169_s29 + $0x4d8] sm:$0xff]  }
  0x76   : > { %6850 = vmatpush3.bf16.msra.mxu0 %v7643_v63  ;;  %v7693_v63 = vld [vmem:[%s8169_s29 + $0x418] sm:$0xff]  }
  0x77   : > { %6872 = vmatpush3.bf16.msra.mxu1 %v7644_v2  ;;  %6879 = vmatprep.subr.bf16.mxu0 %v7646_v4  ;;  %v7696_v2 = vld [vmem:[%s8169_s29 + $0x4e0] sm:$0xff]  }
  0x78   : > { %6901 = vmatprep.subr.bf16.mxu1 %v7647_v5  ;;  %v7698_v4 = vld [vmem:[%s8169_s29 + $0x4a0] sm:$0xff]   ;;  %v7699_v5 = vld [vmem:[%s8169_s29 + $0x468] sm:$0xff]  }
  0x79   : > { %4963 = vmatmul.mubr.bf16.vlgmr.msra.gmra.mrb[8].mxu0 %v618_v7  ;;  %v7701_v7 = vld [vmem:[%s8169_s29 + $0x428] sm:$0xff]  }
  0x7a   : > { %5003 = vmatmul.mubr.bf16.vlgmr.msra.gmra.mrb[8].mxu1 %v620_v8  ;;  %6880 = vmatpush3.bf16.msra.mxu0 %v7648_v6  ;;  %v7700_v6 = vld [vmem:[%s8169_s29 + $0x4e8] sm:$0xff]  }
  0x7b   : > { %6902 = vmatpush3.bf16.msra.mxu1 %v7649_v9  ;;  %6881 = vmatprep.subr.bf16.mxu0 %v7650_v10  ;;  %v7702_v8 = vld [vmem:[%s8169_s29 + $0x4a8] sm:$0xff]   ;;  %v7703_v9 = vld [vmem:[%s8169_s29 + $0x470] sm:$0xff]  }
  0x7c   : > { %6903 = vmatprep.subr.bf16.mxu1 %v7651_v11  ;;  %5042 = vmatprep.mubr.bf16.mxu0 %v623_v44  ;;  %v7704_v10 = vld [vmem:[%s8169_s29 + $0x4f0] sm:$0xff]   ;;  %v7728_v44 = vld [vmem:[%s8169_s29 + $0x560] sm:$0xff]  }
  0x7d   : > { %5082 = vmatprep.mubr.bf16.mxu1 %v625_v47  ;;  %v7705_v11 = vld [vmem:[%s8169_s29 + $0x430] sm:$0xff]   ;;  %v7731_v47 = vld [vmem:[%s8169_s29 + $0x5a0] sm:$0xff]  }
  0x7e   : > { %6882 = vmatpush3.bf16.msra.mxu0 %v7652_v12  ;;  %v246_v12 = vld [vmem:[%s8164_s25 + $0x20] sm:$0xff] }
  0x7f   : > { %6904 = vmatpush3.bf16.msra.mxu1 %v7653_v13  ;;  %6883 = vmatprep.subr.bf16.mxu0 %v7654_v14  ;;  %v7706_v13 = vld [vmem:[%s8169_s29 + $0x4b0] sm:$0xff]   ;;  %v349_v14 = vrot.slane %v246_v12, %v8207_v42 }
  0x80   : > { %6905 = vmatprep.subr.bf16.mxu1 %v7655_v15  ;;  %v342_v15 = vcombine.high %v246_v12, %v246_v12  ;;  %v7751_v12 = vld [vmem:[%s8169_s29 + $0x608] sm:$0xff]  }
  0x82   : > { %6884 = vmatpush3.bf16.msra.mxu0 %v7656_v16  ;;  %v7707_v16 = vld [vmem:[%s8169_s29 + $0x478] sm:$0xff]  }
  0x83   : > { %6906 = vmatpush3.bf16.msra.mxu1 %v7657_v17  ;;  %6885 = vmatprep.subr.bf16.mxu0 %v7658_v18  ;;  %v7708_v17 = vld [vmem:[%s8169_s29 + $0x4f8] sm:$0xff]   ;;  %v357_v18 = vcombine.high %v349_v14, %v349_v14 }
  0x84   : > { %6907 = vmatprep.subr.bf16.mxu1 %v7659_v19  ;;  %v356_v19 = vrot.slane %v342_v15, %v8207_v42  ;;  %v7754_v15 = vld [vmem:[%s8169_s29 + $0x6d0] sm:$0xff]  }
  0x86   : > { %6886 = vmatpush3.bf16.msra.mxu0 %v7660_v20  ;;  %v7709_v20 = vld [vmem:[%s8169_s29 + $0x438] sm:$0xff]  }
  0x87   : > { %6908 = vmatpush3.bf16.msra.mxu1 %v7661_v21  ;;  %6887 = vmatprep.subr.bf16.mxu0 %v7662_v22  ;;  %v7710_v21 = vld [vmem:[%s8169_s29 + $0x4b8] sm:$0xff]   ;;  %v627_v22 = vpack.c.bf16 %v357_v18, %v357_v18 }
  0x88   : > { %6909 = vmatprep.subr.bf16.mxu1 %v7663_v23  ;;  %v358_v23 = vcombine.high %v356_v19, %v356_v19  ;;  %v7757_v18 = vld [vmem:[%s8169_s29 + $0x658] sm:$0xff]  }
  0x8a   : > { %6888 = vmatpush3.bf16.msra.mxu0 %v7664_v24  ;;  %v7712_v24 = vld [vmem:[%s8169_s29 + $0x540] sm:$0xff]  }
  0x8b   : > { %6910 = vmatpush3.bf16.msra.mxu1 %v7665_v25  ;;  %6889 = vmatprep.subr.bf16.mxu0 %v7666_v26  ;;  %v629_v25 = vpack.c.bf16 %v358_v23, %v358_v23  ;;  %v7713_v26 = vld [vmem:[%s8169_s29 + $0x5c0] sm:$0xff]  }
  0x8c   : > { %6911 = vmatprep.subr.bf16.mxu1 %v7667_v27  ;;  %v7714_v27 = vld [vmem:[%s8169_s29 + $0x500] sm:$0xff]  }
  0x8d   : > { %v7762_v23 = vld [vmem:[%s8169_s29 + $0x6e0] sm:$0xff]  }
  0x8e   : > { %6890 = vmatpush3.bf16.msra.mxu0 %v7668_v28  ;;  %v626_v28 = vpack.c.bf16 %v349_v14, %v349_v14  ;;  %v7753_v14 = vld [vmem:[%s8169_s29 + $0x650] sm:$0xff]  }
  0x8f   : > { %6912 = vmatpush3.bf16.msra.mxu1 %v7669_v29  ;;  %6891 = vmatprep.subr.bf16.mxu0 %v7670_v30  ;;  %v628_v29 = vpack.c.bf16 %v356_v19, %v356_v19  ;;  %v7715_v30 = vld [vmem:[%s8169_s29 + $0x580] sm:$0xff]   ;;  %v7758_v19 = vld [vmem:[%s8169_s29 + $0x6d8] sm:$0xff]  }
  0x90   : > { %6913 = vmatprep.subr.bf16.mxu1 %v7671_v31  ;;  %v7716_v31 = vld [vmem:[%s8169_s29 + $0x548] sm:$0xff]  }
  0x92   : > { %6892 = vmatpush3.bf16.msra.mxu0 %v7672_v32  ;;  %v7717_v32 = vld [vmem:[%s8169_s29 + $0x5c8] sm:$0xff]  }
  0x93   : > { %6914 = vmatpush3.bf16.msra.mxu1 %v7673_v34  ;;  %6893 = vmatprep.subr.bf16.mxu0 %v7674_v37  ;;  %v7719_v34 = vld [vmem:[%s8169_s29 + $0x588] sm:$0xff]   ;;  %v7722_v37 = vld [vmem:[%s8169_s29 + $0x510] sm:$0xff]  }
  0x94   : > { %6915 = vmatprep.subr.bf16.mxu1 %v7675_v38  ;;  %v7723_v38 = vld [vmem:[%s8169_s29 + $0x590] sm:$0xff]  }
  0x96   : > { %6894 = vmatpush3.bf16.msra.mxu0 %v7676_v41  ;;  %v7726_v41 = vld [vmem:[%s8169_s29 + $0x518] sm:$0xff]  }
  0x97   : > { %6916 = vmatpush3.bf16.msra.mxu1 %v7677_v43  ;;  %6923 = vmatprep.subr.bf16.mxu0 %v7679_v46  ;;  %v7727_v43 = vld [vmem:[%s8169_s29 + $0x598] sm:$0xff]   ;;  %v7730_v46 = vld [vmem:[%s8169_s29 + $0x520] sm:$0xff]  }
  0x98   : > { %6945 = vmatprep.subr.bf16.mxu1 %v7680_v48  ;;  %v7732_v48 = vld [vmem:[%s8169_s29 + $0x568] sm:$0xff]  }
  0x99   : > { %5043 = vmatmul.mubr.bf16.vlgmr.msra.gmra.mrb[12].mxu0 %v622_v50  ;;  %v7734_v50 = vld [vmem:[%s8169_s29 + $0x528] sm:$0xff]  }
  0x9a   : > { %5083 = vmatmul.mubr.bf16.vlgmr.msra.gmra.mrb[12].mxu1 %v624_v51  ;;  %6924 = vmatpush3.bf16.msra.mxu0 %v7681_v49  ;;  %v7733_v49 = vld [vmem:[%s8169_s29 + $0x5e8] sm:$0xff]  }
  0x9b   : > { %6946 = vmatpush3.bf16.msra.mxu1 %v7682_v52  ;;  %6925 = vmatprep.subr.bf16.mxu0 %v7683_v53  ;;  %v7735_v51 = vld [vmem:[%s8169_s29 + $0x5a8] sm:$0xff]   ;;  %v7736_v52 = vld [vmem:[%s8169_s29 + $0x570] sm:$0xff]  }
  0x9c   : > { %6947 = vmatprep.subr.bf16.mxu1 %v7684_v54  ;;  %5122 = vmatprep.mubr.bf16.mxu0 %v627_v22  ;;  %v7737_v53 = vld [vmem:[%s8169_s29 + $0x5f0] sm:$0xff]   ;;  %v7761_v22 = vld [vmem:[%s8169_s29 + $0x660] sm:$0xff]  }
  0x9d   : > { %5162 = vmatprep.mubr.bf16.mxu1 %v629_v25  ;;  %v7738_v54 = vld [vmem:[%s8169_s29 + $0x530] sm:$0xff]   ;;  %v7764_v25 = vld [vmem:[%s8169_s29 + $0x6a0] sm:$0xff]  }
  0x9e   : > { %6926 = vmatpush3.bf16.msra.mxu0 %v7685_v55  ;;  %v247_v55 = vld [vmem:[%s8164_s25 + $0x28] sm:$0xff] }
  0x9f   : > { %6948 = vmatpush3.bf16.msra.mxu1 %v7686_v56  ;;  %6927 = vmatprep.subr.bf16.mxu0 %v7687_v57  ;;  %v7739_v56 = vld [vmem:[%s8169_s29 + $0x5b0] sm:$0xff]   ;;  %v366_v57 = vrot.slane %v247_v55, %v8207_v42 }
  0xa0   : > { %6949 = vmatprep.subr.bf16.mxu1 %v7688_v58  ;;  %v359_v58 = vcombine.high %v247_v55, %v247_v55  ;;  %v7784_v55 = vld [vmem:[%s8169_s29 + $0x708] sm:$0xff]  }
  0xa2   : > { %6928 = vmatpush3.bf16.msra.mxu0 %v7689_v59  ;;  %v7740_v59 = vld [vmem:[%s8169_s29 + $0x578] sm:$0xff]  }
  0xa3   : > { %6950 = vmatpush3.bf16.msra.mxu1 %v7690_v60  ;;  %6929 = vmatprep.subr.bf16.mxu0 %v7691_v61  ;;  %v7741_v60 = vld [vmem:[%s8169_s29 + $0x5f8] sm:$0xff]   ;;  %v374_v61 = vcombine.high %v366_v57, %v366_v57 }
  0xa4   : > { %6951 = vmatprep.subr.bf16.mxu1 %v7692_v62  ;;  %v373_v62 = vrot.slane %v359_v58, %v8207_v42  ;;  %v7787_v58 = vld [vmem:[%s8169_s29 + $0x7d0] sm:$0xff]  }
  0xa6   : > { %6930 = vmatpush3.bf16.msra.mxu0 %v7693_v63  ;;  %v7742_v63 = vld [vmem:[%s8169_s29 + $0x538] sm:$0xff]  }
  0xa7   : > { %6952 = vmatpush3.bf16.msra.mxu1 %v7694_v0  ;;  %6931 = vmatprep.subr.bf16.mxu0 %v7695_v1  ;;  %v7743_v0 = vld [vmem:[%s8169_s29 + $0x5b8] sm:$0xff]   ;;  %v631_v1 = vpack.c.bf16 %v374_v61, %v374_v61 }
  0xa8   : > { %6953 = vmatprep.subr.bf16.mxu1 %v7696_v2  ;;  %v375_v2 = vcombine.high %v373_v62, %v373_v62  ;;  %v7790_v61 = vld [vmem:[%s8169_s29 + $0x758] sm:$0xff]  }
  0xaa   : > { %6932 = vmatpush3.bf16.msra.mxu0 %v7697_v3  ;;  %v7745_v3 = vld [vmem:[%s8169_s29 + $0x640] sm:$0xff]  }
  0xab   : > { %6954 = vmatpush3.bf16.msra.mxu1 %v7698_v4  ;;  %6933 = vmatprep.subr.bf16.mxu0 %v7699_v5  ;;  %v633_v4 = vpack.c.bf16 %v375_v2, %v375_v2  ;;  %v7746_v5 = vld [vmem:[%s8169_s29 + $0x6c0] sm:$0xff]  }
  0xac   : > { %6955 = vmatprep.subr.bf16.mxu1 %v7700_v6  ;;  %v7747_v6 = vld [vmem:[%s8169_s29 + $0x600] sm:$0xff]  }
  0xad   : > { %v7795_v2 = vld [vmem:[%s8169_s29 + $0x7e0] sm:$0xff]  }
  0xae   : > { %6934 = vmatpush3.bf16.msra.mxu0 %v7701_v7  ;;  %v630_v7 = vpack.c.bf16 %v366_v57, %v366_v57  ;;  %v7786_v57 = vld [vmem:[%s8169_s29 + $0x750] sm:$0xff]  }
  0xaf   : > { %6956 = vmatpush3.bf16.msra.mxu1 %v7702_v8  ;;  %6935 = vmatprep.subr.bf16.mxu0 %v7703_v9  ;;  %v632_v8 = vpack.c.bf16 %v373_v62, %v373_v62  ;;  %v7748_v9 = vld [vmem:[%s8169_s29 + $0x680] sm:$0xff]   ;;  %v7791_v62 = vld [vmem:[%s8169_s29 + $0x7d8] sm:$0xff]  }
  0xb0   : > { %6957 = vmatprep.subr.bf16.mxu1 %v7704_v10  ;;  %v7749_v10 = vld [vmem:[%s8169_s29 + $0x648] sm:$0xff]  }
  0xb2   : > { %6936 = vmatpush3.bf16.msra.mxu0 %v7705_v11  ;;  %v7750_v11 = vld [vmem:[%s8169_s29 + $0x6c8] sm:$0xff]  }
  0xb3   : > { %6958 = vmatpush3.bf16.msra.mxu1 %v7706_v13  ;;  %6937 = vmatprep.subr.bf16.mxu0 %v7707_v16  ;;  %v7752_v13 = vld [vmem:[%s8169_s29 + $0x688] sm:$0xff]   ;;  %v7755_v16 = vld [vmem:[%s8169_s29 + $0x610] sm:$0xff]  }
  0xb4   : > { %6959 = vmatprep.subr.bf16.mxu1 %v7708_v17  ;;  %v7756_v17 = vld [vmem:[%s8169_s29 + $0x690] sm:$0xff]  }
  0xb6   : > { %6938 = vmatpush3.bf16.msra.mxu0 %v7709_v20  ;;  %v7759_v20 = vld [vmem:[%s8169_s29 + $0x618] sm:$0xff]  }
  0xb7   : > { %6960 = vmatpush3.bf16.msra.mxu1 %v7710_v21  ;;  %6967 = vmatprep.subr.bf16.mxu0 %v7712_v24  ;;  %v7760_v21 = vld [vmem:[%s8169_s29 + $0x698] sm:$0xff]   ;;  %v7763_v24 = vld [vmem:[%s8169_s29 + $0x620] sm:$0xff]  }
  0xb8   : > { %6989 = vmatprep.subr.bf16.mxu1 %v7713_v26  ;;  %v7765_v26 = vld [vmem:[%s8169_s29 + $0x668] sm:$0xff]  }
  0xb9   : > { %5123 = vmatmul.mubr.bf16.vlgmr.msra.gmra.mrb[16].mxu0 %v626_v28  ;;  %v7767_v28 = vld [vmem:[%s8169_s29 + $0x628] sm:$0xff]  }
  0xba   : > { %5163 = vmatmul.mubr.bf16.vlgmr.msra.gmra.mrb[16].mxu1 %v628_v29  ;;  %6968 = vmatpush3.bf16.msra.mxu0 %v7714_v27  ;;  %v7766_v27 = vld [vmem:[%s8169_s29 + $0x6e8] sm:$0xff]  }
  0xbb   : > { %6990 = vmatpush3.bf16.msra.mxu1 %v7715_v30  ;;  %6969 = vmatprep.subr.bf16.mxu0 %v7716_v31  ;;  %v7768_v29 = vld [vmem:[%s8169_s29 + $0x6a8] sm:$0xff]   ;;  %v7769_v30 = vld [vmem:[%s8169_s29 + $0x670] sm:$0xff]  }
  0xbc   : > { %6991 = vmatprep.subr.bf16.mxu1 %v7717_v32  ;;  %5202 = vmatprep.mubr.bf16.mxu0 %v631_v1  ;;  %v7770_v31 = vld [vmem:[%s8169_s29 + $0x6f0] sm:$0xff]   ;;  %v7794_v1 = vld [vmem:[%s8169_s29 + $0x760] sm:$0xff]  }
  0xbd   : > { %5242 = vmatprep.mubr.bf16.mxu1 %v633_v4  ;;  %v7771_v32 = vld [vmem:[%s8169_s29 + $0x630] sm:$0xff]   ;;  %v7797_v4 = vld [vmem:[%s8169_s29 + $0x7a0] sm:$0xff]  }
  0xbe   : > { %6970 = vmatpush3.bf16.msra.mxu0 %v7718_v33  ;;  %v7772_v33 = vld [vmem:[%s8169_s29 + $0x6b0] sm:$0xff]  }
  0xbf   : > { %6992 = vmatpush3.bf16.msra.mxu1 %v7719_v34  ;;  %6971 = vmatprep.subr.bf16.mxu0 %v7720_v35  ;;  %v248_v34 = vld [vmem:[%s8164_s25 + $0x30] sm:$0xff]  ;;  %v7773_v35 = vld [vmem:[%s8169_s29 + $0x678] sm:$0xff]  }
  0xc0   : > { %6993 = vmatprep.subr.bf16.mxu1 %v7721_v36  ;;  %v383_v36 = vrot.slane %v248_v34, %v8207_v42 }
  0xc2   : > { %6972 = vmatpush3.bf16.msra.mxu0 %v7722_v37  ;;  %v376_v37 = vcombine.high %v248_v34, %v248_v34  ;;  %v7811_v34 = vld [vmem:[%s8169_s29 + $0x840] sm:$0xff]  }
  0xc3   : > { %6994 = vmatpush3.bf16.msra.mxu1 %v7723_v38  ;;  %6973 = vmatprep.subr.bf16.mxu0 %v7724_v39  ;;  %v7774_v38 = vld [vmem:[%s8169_s29 + $0x6f8] sm:$0xff]  }
  0xc4   : > { %6995 = vmatprep.subr.bf16.mxu1 %v7725_v40  ;;  %v7775_v39 = vld [vmem:[%s8169_s29 + $0x638] sm:$0xff]   ;;  %v391_v40 = vcombine.high %v383_v36, %v383_v36 }
  0xc6   : > { %6974 = vmatpush3.bf16.msra.mxu0 %v7726_v41  ;;  %v390_v41 = vrot.slane %v376_v37, %v8207_v42  ;;  %v7813_v37 = vld [vmem:[%s8169_s29 + $0x800] sm:$0xff]  }
  0xc7   : > { %6996 = vmatpush3.bf16.msra.mxu1 %v7727_v43  ;;  %6975 = vmatprep.subr.bf16.mxu0 %v7728_v44  ;;  %v7776_v43 = vld [vmem:[%s8169_s29 + $0x6b8] sm:$0xff]   ;;  %v635_v44 = vpack.c.bf16 %v391_v40, %v391_v40 }
  0xc8   : > { %6997 = vmatprep.subr.bf16.mxu1 %v7729_v45  ;;  %v392_v45 = vcombine.high %v390_v41, %v390_v41 }
  0xca   : > { %6976 = vmatpush3.bf16.msra.mxu0 %v7730_v46  ;;  %v7778_v46 = vld [vmem:[%s8169_s29 + $0x740] sm:$0xff]  }
  0xcb   : > { %6998 = vmatpush3.bf16.msra.mxu1 %v7731_v47  ;;  %6977 = vmatprep.subr.bf16.mxu0 %v7732_v48  ;;  %v7779_v47 = vld [vmem:[%s8169_s29 + $0x7c0] sm:$0xff]   ;;  %v637_v48 = vpack.c.bf16 %v392_v45, %v392_v45  ;;  %v7817_v45 = vld [vmem:[%s8169_s29 + $0x808] sm:$0xff]  }
  0xcc   : > { %6999 = vmatprep.subr.bf16.mxu1 %v7733_v49  ;;  %v7780_v49 = vld [vmem:[%s8169_s29 + $0x700] sm:$0xff]  }
  0xce   : > { %6978 = vmatpush3.bf16.msra.mxu0 %v7734_v50  ;;  %v634_v50 = vpack.c.bf16 %v383_v36, %v383_v36  ;;  %v7812_v36 = vld [vmem:[%s8169_s29 + $0x8c0] sm:$0xff]  }
  0xcf   : > { %7000 = vmatpush3.bf16.msra.mxu1 %v7735_v51  ;;  %6979 = vmatprep.subr.bf16.mxu0 %v7736_v52  ;;  %v636_v51 = vpack.c.bf16 %v390_v41, %v390_v41  ;;  %v7781_v52 = vld [vmem:[%s8169_s29 + $0x780] sm:$0xff]  }
  0xd0   : > { %7001 = vmatprep.subr.bf16.mxu1 %v7737_v53  ;;  %v7782_v53 = vld [vmem:[%s8169_s29 + $0x748] sm:$0xff]   ;;  %v7814_v41 = vld [vmem:[%s8169_s29 + $0x880] sm:$0xff]  }
  0xd2   : > { %6980 = vmatpush3.bf16.msra.mxu0 %v7738_v54  ;;  %v7783_v54 = vld [vmem:[%s8169_s29 + $0x7c8] sm:$0xff]  }
  0xd3   : > { %7002 = vmatpush3.bf16.msra.mxu1 %v7739_v56  ;;  %6981 = vmatprep.subr.bf16.mxu0 %v7740_v59  ;;  %v7785_v56 = vld [vmem:[%s8169_s29 + $0x788] sm:$0xff]   ;;  %v7788_v59 = vld [vmem:[%s8169_s29 + $0x710] sm:$0xff]  }
  0xd4   : > { %7003 = vmatprep.subr.bf16.mxu1 %v7741_v60  ;;  %v7789_v60 = vld [vmem:[%s8169_s29 + $0x790] sm:$0xff]  }
  0xd6   : > { %6982 = vmatpush3.bf16.msra.mxu0 %v7742_v63  ;;  %v7792_v63 = vld [vmem:[%s8169_s29 + $0x718] sm:$0xff]  }
  0xd7   : > { %7004 = vmatpush3.bf16.msra.mxu1 %v7743_v0  ;;  %7011 = vmatprep.subr.bf16.mxu0 %v7745_v3  ;;  %v7793_v0 = vld [vmem:[%s8169_s29 + $0x798] sm:$0xff]   ;;  %v7796_v3 = vld [vmem:[%s8169_s29 + $0x720] sm:$0xff]  }
  0xd8   : > { %7033 = vmatprep.subr.bf16.mxu1 %v7746_v5  ;;  %v7798_v5 = vld [vmem:[%s8169_s29 + $0x768] sm:$0xff]  }
  0xd9   : > { %5203 = vmatmul.mubr.bf16.vlgmr.msra.gmra.mrb[20].mxu0 %v630_v7  ;;  %v7800_v7 = vld [vmem:[%s8169_s29 + $0x728] sm:$0xff]  }
  0xda   : > { %5243 = vmatmul.mubr.bf16.vlgmr.msra.gmra.mrb[20].mxu1 %v632_v8  ;;  %7012 = vmatpush3.bf16.msra.mxu0 %v7747_v6  ;;  %v7799_v6 = vld [vmem:[%s8169_s29 + $0x7e8] sm:$0xff]  }
  0xdb   : > { %7034 = vmatpush3.bf16.msra.mxu1 %v7748_v9  ;;  %7013 = vmatprep.subr.bf16.mxu0 %v7749_v10  ;;  %v7801_v8 = vld [vmem:[%s8169_s29 + $0x7a8] sm:$0xff]   ;;  %v7802_v9 = vld [vmem:[%s8169_s29 + $0x770] sm:$0xff]  }
  0xdc   : > { %7035 = vmatprep.subr.bf16.mxu1 %v7750_v11  ;;  %5282 = vmatprep.mubr.bf16.mxu0 %v635_v44  ;;  %v7803_v10 = vld [vmem:[%s8169_s29 + $0x7f0] sm:$0xff]   ;;  %v7816_v44 = vld [vmem:[%s8169_s29 + $0x8c8] sm:$0xff]  }
  0xdd   : > { %5322 = vmatprep.mubr.bf16.mxu1 %v637_v48  ;;  %v7820_v48 = vld [vmem:[%s8169_s29 + $0x8d0] sm:$0xff]  }
  0xde   : > { %7014 = vmatpush3.bf16.msra.mxu0 %v7751_v12 }
  0xdf   : > { %7036 = vmatpush3.bf16.msra.mxu1 %v7752_v13  ;;  %7015 = vmatprep.subr.bf16.mxu0 %v7753_v14  ;;  %v7804_v13 = vld [vmem:[%s8169_s29 + $0x730] sm:$0xff]  }
  0xe0   : > { %7037 = vmatprep.subr.bf16.mxu1 %v7754_v15  ;;  %v7805_v14 = vld [vmem:[%s8169_s29 + $0x7b0] sm:$0xff]  }
  0xe2   : > { %7016 = vmatpush3.bf16.msra.mxu0 %v7755_v16 }
  0xe3   : > { %7038 = vmatpush3.bf16.msra.mxu1 %v7756_v17  ;;  %7017 = vmatprep.subr.bf16.mxu0 %v7757_v18  ;;  %v7806_v17 = vld [vmem:[%s8169_s29 + $0x778] sm:$0xff]  }
  0xe4   : > { %7039 = vmatprep.subr.bf16.mxu1 %v7758_v19  ;;  %v7807_v18 = vld [vmem:[%s8169_s29 + $0x7f8] sm:$0xff]  }
  0xe5   : > { %v249_v19 = vld [vmem:[%s8164_s25 + $0x38] sm:$0xff] }
  0xe6   : > { %7018 = vmatpush3.bf16.msra.mxu0 %v7759_v20 }
  0xe7   : > { %7040 = vmatpush3.bf16.msra.mxu1 %v7760_v21  ;;  %7019 = vmatprep.subr.bf16.mxu0 %v7761_v22 }
  0xe8   : > { %7041 = vmatprep.subr.bf16.mxu1 %v7762_v23 }
  0xea   : > { %7020 = vmatpush3.bf16.msra.mxu0 %v7763_v24  ;;  %v400_v24 = vrot.slane %v249_v19, %v8207_v42 }
  0xeb   : > { %7042 = vmatpush3.bf16.msra.mxu1 %v7764_v25  ;;  %7021 = vmatprep.subr.bf16.mxu0 %v7765_v26 }
  0xec   : > { %7043 = vmatprep.subr.bf16.mxu1 %v7766_v27  ;;  %v393_v27 = vcombine.high %v249_v19, %v249_v19  ;;  %v7841_v19 = vld [vmem:[%s8169_s29 + $0x838] sm:$0xff]  }
  0xee   : > { %7022 = vmatpush3.bf16.msra.mxu0 %v7767_v28 }
  0xef   : > { %7044 = vmatpush3.bf16.msra.mxu1 %v7768_v29  ;;  %7023 = vmatprep.subr.bf16.mxu0 %v7769_v30  ;;  %v7808_v29 = vld [vmem:[%s8169_s29 + $0x738] sm:$0xff]   ;;  %v408_v30 = vcombine.high %v400_v24, %v400_v24 }
  0xf0   : > { %7045 = vmatprep.subr.bf16.mxu1 %v7770_v31  ;;  %v7809_v31 = vld [vmem:[%s8169_s29 + $0x7b8] sm:$0xff]  }
  0xf2   : > { %7024 = vmatpush3.bf16.msra.mxu0 %v7771_v32  ;;  %v407_v32 = vrot.slane %v393_v27, %v8207_v42  ;;  %v7845_v27 = vld [vmem:[%s8169_s29 + $0x9c0] sm:$0xff]  }
  0xf3   : > { %7046 = vmatpush3.bf16.msra.mxu1 %v7772_v33  ;;  %7025 = vmatprep.subr.bf16.mxu0 %v7773_v35  ;;  %v639_v33 = vpack.c.bf16 %v408_v30, %v408_v30 }
  0xf4   : > { %7047 = vmatprep.subr.bf16.mxu1 %v7774_v38  ;;  %v409_v35 = vcombine.high %v407_v32, %v407_v32  ;;  %v640_v40 = vpack.c.bf16 %v407_v32, %v407_v32  ;;  %v7847_v32 = vld [vmem:[%s8169_s29 + $0x980] sm:$0xff]  }
  0xf6   : > { %7026 = vmatpush3.bf16.msra.mxu0 %v7775_v39  ;;  %v641_v38 = vpack.c.bf16 %v409_v35, %v409_v35  ;;  %v638_v39 = vpack.c.bf16 %v400_v24, %v400_v24  ;;  %v7844_v24 = vld [vmem:[%s8169_s29 + $0x940] sm:$0xff]   ;;  %v7850_v35 = vld [vmem:[%s8169_s29 + $0x908] sm:$0xff]  }
  0xf7   : > { %7048 = vmatpush3.bf16.msra.mxu1 %v7776_v43  ;;  %7055 = vmatprep.subr.bf16.mxu0 %v7778_v46  ;;  %v7815_v43 = vld [vmem:[%s8169_s29 + $0x848] sm:$0xff]  }
  0xf8   : > { %7077 = vmatprep.subr.bf16.mxu1 %v7779_v47  ;;  %v7818_v46 = vld [vmem:[%s8169_s29 + $0x888] sm:$0xff]   ;;  %v7819_v47 = vld [vmem:[%s8169_s29 + $0x850] sm:$0xff]  }
  0xf9   : > { %5283 = vmatmul.mubr.bf16.vlgmr.msra.gmra.mrb[24].mxu0 %v634_v50  ;;  %v7822_v50 = vld [vmem:[%s8169_s29 + $0x890] sm:$0xff]  }
  0xfa   : > { %5323 = vmatmul.mubr.bf16.vlgmr.msra.gmra.mrb[24].mxu1 %v636_v51  ;;  %7056 = vmatpush3.bf16.msra.mxu0 %v7780_v49  ;;  %v7821_v49 = vld [vmem:[%s8169_s29 + $0x810] sm:$0xff]   ;;  %v7823_v51 = vld [vmem:[%s8169_s29 + $0x858] sm:$0xff]  }
  0xfb   : > { %7078 = vmatpush3.bf16.msra.mxu1 %v7781_v52  ;;  %7057 = vmatprep.subr.bf16.mxu0 %v7782_v53  ;;  %v7824_v52 = vld [vmem:[%s8169_s29 + $0x8d8] sm:$0xff]  }
  0xfc   : > { %7079 = vmatprep.subr.bf16.mxu1 %v7783_v54  ;;  %5362 = vmatprep.mubr.bf16.mxu0 %v639_v33  ;;  %v7825_v53 = vld [vmem:[%s8169_s29 + $0x818] sm:$0xff]   ;;  %v7848_v33 = vld [vmem:[%s8169_s29 + $0x948] sm:$0xff]  }
  0xfd   : > { %5402 = vmatprep.mubr.bf16.mxu1 %v641_v38  ;;  %v7826_v54 = vld [vmem:[%s8169_s29 + $0x898] sm:$0xff]   ;;  %v7853_v38 = vld [vmem:[%s8169_s29 + $0x9d0] sm:$0xff]  }
  0xfe   : > { %7058 = vmatpush3.bf16.msra.mxu0 %v7784_v55  ;;  %v7827_v55 = vld [vmem:[%s8169_s29 + $0x860] sm:$0xff]  }
  0xff   : > { %7080 = vmatpush3.bf16.msra.mxu1 %v7785_v56  ;;  %7059 = vmatprep.subr.bf16.mxu0 %v7786_v57  ;;  %v7828_v56 = vld [vmem:[%s8169_s29 + $0x8e0] sm:$0xff]  }
 0x100   : > { %7081 = vmatprep.subr.bf16.mxu1 %v7787_v58  ;;  %v7829_v57 = vld [vmem:[%s8169_s29 + $0x820] sm:$0xff]  }
 0x101   : > { %v7830_v58 = vld [vmem:[%s8169_s29 + $0x8a0] sm:$0xff]  }
 0x102   : > { %7060 = vmatpush3.bf16.msra.mxu0 %v7788_v59  ;;  %v7831_v59 = vld [vmem:[%s8169_s29 + $0x868] sm:$0xff]  }
 0x103   : > { %7082 = vmatpush3.bf16.msra.mxu1 %v7789_v60  ;;  %7061 = vmatprep.subr.bf16.mxu0 %v7790_v61  ;;  %v7832_v60 = vld [vmem:[%s8169_s29 + $0x8e8] sm:$0xff]  }
 0x104   : > { %7083 = vmatprep.subr.bf16.mxu1 %v7791_v62  ;;  %v7833_v61 = vld [vmem:[%s8169_s29 + $0x828] sm:$0xff]  }
 0x105   : > { %v7834_v62 = vld [vmem:[%s8169_s29 + $0x8a8] sm:$0xff]  }
 0x106   : > { %7062 = vmatpush3.bf16.msra.mxu0 %v7792_v63  ;;  %v7835_v63 = vld [vmem:[%s8169_s29 + $0x870] sm:$0xff]  }
 0x107   : > { %7084 = vmatpush3.bf16.msra.mxu1 %v7793_v0  ;;  %7063 = vmatprep.subr.bf16.mxu0 %v7794_v1  ;;  %v7836_v0 = vld [vmem:[%s8169_s29 + $0x8f0] sm:$0xff]  }
 0x108   : > { %7085 = vmatprep.subr.bf16.mxu1 %v7795_v2 }
 0x10a   : > { %7064 = vmatpush3.bf16.msra.mxu0 %v7796_v3  ;;  %v7837_v3 = vld [vmem:[%s8169_s29 + $0x830] sm:$0xff]  }
 0x10b   : > { %7086 = vmatpush3.bf16.msra.mxu1 %v7797_v4  ;;  %7065 = vmatprep.subr.bf16.mxu0 %v7798_v5  ;;  %v7838_v4 = vld [vmem:[%s8169_s29 + $0x8b0] sm:$0xff]  }
 0x10c   : > { %7087 = vmatprep.subr.bf16.mxu1 %v7799_v6  ;;  %v6763_v11 = vpop.f32.mrb[0].mxu0 }
 0x10d   : > { %v6785_v12 = vpop.f32.mrb[0].mxu1  ;;  %v6764_v15 = vpop.f32.mrb[1].mxu0 }
 0x10e   : > { %v6786_v16 = vpop.f32.mrb[1].mxu1  ;;  %v6765_v20 = vadd.f32 %v6764_v15, %v6763_v11  ;;  %v6766_v22 = vpop.f32.mrb[2].mxu0  ;;  %7066 = vmatpush3.bf16.msra.mxu0 %v7800_v7  ;;  %v7839_v7 = vld [vmem:[%s8169_s29 + $0x878] sm:$0xff]  }
 0x10f   : > { %v6787_v21 = vadd.f32 %v6786_v16, %v6785_v12  ;;  %v6788_v23 = vpop.f32.mrb[2].mxu1  ;;  %7088 = vmatpush3.bf16.msra.mxu1 %v7801_v8  ;;  %v6767_v25 = vpop.f32.mrb[3].mxu0  ;;  %7067 = vmatprep.subr.bf16.mxu0 %v7802_v9  ;;  %v7840_v12 = vld [vmem:[%s8169_s29 + $0x8f8] sm:$0xff]  }
 0x110   : > { %v6789_v26 = vpop.f32.mrb[3].mxu1  ;;  %7089 = vmatprep.subr.bf16.mxu1 %v7803_v10 }
 0x111   : > { %v8451_v28 = vadd.f32 %v6787_v21, %v6765_v20  ;;  %v7842_v20 = vld [vmem:[%s8169_s29 + $0x8b8] sm:$0xff]  }
 0x112   : > { %7068 = vmatpush3.bf16.msra.mxu0 %v7804_v13  ;;  %v250_v13 = vld [vmem:[%s8164_s25 + $0x40] sm:$0xff] }
 0x113   : > { %7090 = vmatpush3.bf16.msra.mxu1 %v7805_v14  ;;  %7069 = vmatprep.subr.bf16.mxu0 %v7806_v17  ;;  %v417_v16 = vrot.slane %v250_v13, %v8207_v42  ;;  %v410_v17 = vcombine.high %v250_v13, %v250_v13 }
 0x114   : > { %7091 = vmatprep.subr.bf16.mxu1 %v7807_v18 }
 0x115   : > { %v425_v21 = vcombine.high %v417_v16, %v417_v16  ;;  %v424_v22 = vrot.slane %v410_v17, %v8207_v42  ;;  %v642_v30 = vpack.c.bf16 %v417_v16, %v417_v16  ;;  %v7878_v16 = vld [vmem:[%s8169_s29 + $0xac0] sm:$0xff]  }
 0x116   : > { %7070 = vmatpush3.bf16.msra.mxu0 %v7808_v29 }
 0x117   : > { %7092 = vmatpush3.bf16.msra.mxu1 %v7809_v31  ;;  %7099 = vmatprep.subr.bf16.mxu0 %v7811_v34  ;;  %v643_v25 = vpack.c.bf16 %v425_v21, %v425_v21  ;;  %v426_v26 = vcombine.high %v424_v22, %v424_v22  ;;  %v644_v31 = vpack.c.bf16 %v424_v22, %v424_v22  ;;  %v7849_v34 = vld [vmem:[%s8169_s29 + $0x9c8] sm:$0xff]   ;;  %v7880_v22 = vld [vmem:[%s8169_s29 + $0xa80] sm:$0xff]  }
 0x118   : > { %7121 = vmatprep.subr.bf16.mxu1 %v7812_v36  ;;  %v7851_v36 = vld [vmem:[%s8169_s29 + $0x988] sm:$0xff]  }
 0x119   : > { %5363 = vmatmul.mubr.bf16.vlgmr.msra.gmra.mrb[28].mxu0 %v638_v39  ;;  %v645_v29 = vpack.c.bf16 %v426_v26, %v426_v26  ;;  %v7854_v39 = vld [vmem:[%s8169_s29 + $0x910] sm:$0xff]   ;;  %v7883_v26 = vld [vmem:[%s8169_s29 + $0xa08] sm:$0xff]  }
 0x11a   : > { %5403 = vmatmul.mubr.bf16.vlgmr.msra.gmra.mrb[28].mxu1 %v640_v40  ;;  %7100 = vmatpush3.bf16.msra.mxu0 %v7813_v37  ;;  %v7852_v37 = vld [vmem:[%s8169_s29 + $0x950] sm:$0xff]  }
 0x11b   : > { %7122 = vmatpush3.bf16.msra.mxu1 %v7814_v41  ;;  %7101 = vmatprep.subr.bf16.mxu0 %v7815_v43  ;;  %v7855_v40 = vld [vmem:[%s8169_s29 + $0x990] sm:$0xff]   ;;  %v7856_v41 = vld [vmem:[%s8169_s29 + $0x958] sm:$0xff]  }
 0x11c   : > { %7123 = vmatprep.subr.bf16.mxu1 %v7816_v44  ;;  %5442 = vmatprep.mubr.bf16.mxu0 %v643_v25  ;;  %v7857_v43 = vld [vmem:[%s8169_s29 + $0x9d8] sm:$0xff]   ;;  %v7882_v25 = vld [vmem:[%s8169_s29 + $0xac8] sm:$0xff]  }
 0x11d   : > { %5482 = vmatprep.mubr.bf16.mxu1 %v645_v29  ;;  %v7858_v44 = vld [vmem:[%s8169_s29 + $0x918] sm:$0xff]   ;;  %v7886_v29 = vld [vmem:[%s8169_s29 + $0xad0] sm:$0xff]  }
 0x11e   : > { %7102 = vmatpush3.bf16.msra.mxu0 %v7817_v45  ;;  %v7859_v45 = vld [vmem:[%s8169_s29 + $0x998] sm:$0xff]  }
 0x11f   : > { %7124 = vmatpush3.bf16.msra.mxu1 %v7818_v46  ;;  %7103 = vmatprep.subr.bf16.mxu0 %v7819_v47  ;;  %v7860_v46 = vld [vmem:[%s8169_s29 + $0x960] sm:$0xff]  }
 0x120   : > { %7125 = vmatprep.subr.bf16.mxu1 %v7820_v48  ;;  %v7861_v47 = vld [vmem:[%s8169_s29 + $0x9e0] sm:$0xff]  }
 0x121   : > { %v7862_v48 = vld [vmem:[%s8169_s29 + $0x920] sm:$0xff]  }
 0x122   : > { %7104 = vmatpush3.bf16.msra.mxu0 %v7821_v49  ;;  %v7863_v49 = vld [vmem:[%s8169_s29 + $0x9a0] sm:$0xff]  }
 0x123   : > { %7126 = vmatpush3.bf16.msra.mxu1 %v7822_v50  ;;  %7105 = vmatprep.subr.bf16.mxu0 %v7823_v51  ;;  %v7864_v50 = vld [vmem:[%s8169_s29 + $0x968] sm:$0xff]  }
 0x124   : > { %7127 = vmatprep.subr.bf16.mxu1 %v7824_v52  ;;  %v7865_v51 = vld [vmem:[%s8169_s29 + $0x9e8] sm:$0xff]  }
 0x125   : > { %v7866_v52 = vld [vmem:[%s8169_s29 + $0x928] sm:$0xff]  }
 0x126   : > { %7106 = vmatpush3.bf16.msra.mxu0 %v7825_v53  ;;  %v7867_v53 = vld [vmem:[%s8169_s29 + $0x9a8] sm:$0xff]  }
 0x127   : > { %7128 = vmatpush3.bf16.msra.mxu1 %v7826_v54  ;;  %7107 = vmatprep.subr.bf16.mxu0 %v7827_v55  ;;  %v7868_v54 = vld [vmem:[%s8169_s29 + $0x970] sm:$0xff]  }
 0x128   : > { %7129 = vmatprep.subr.bf16.mxu1 %v7828_v56  ;;  %v7869_v55 = vld [vmem:[%s8169_s29 + $0x9f0] sm:$0xff]  }
 0x12a   : > { %7108 = vmatpush3.bf16.msra.mxu0 %v7829_v57 }
 0x12b   : > { %7130 = vmatpush3.bf16.msra.mxu1 %v7830_v58  ;;  %7109 = vmatprep.subr.bf16.mxu0 %v7831_v59  ;;  %v7870_v58 = vld [vmem:[%s8169_s29 + $0x930] sm:$0xff]  }
 0x12c   : > { %7131 = vmatprep.subr.bf16.mxu1 %v7832_v60  ;;  %v6807_v1 = vpop.f32.mrb[4].mxu0  ;;  %v7871_v59 = vld [vmem:[%s8169_s29 + $0x9b0] sm:$0xff]  }
 0x12d   : > { %v6829_v2 = vpop.f32.mrb[4].mxu1  ;;  %v6808_v5 = vpop.f32.mrb[5].mxu0 }
 0x12e   : > { %v6830_v6 = vpop.f32.mrb[5].mxu1  ;;  %v6809_v8 = vadd.f32 %v6808_v5, %v6807_v1  ;;  %v6810_v10 = vpop.f32.mrb[6].mxu0  ;;  %7110 = vmatpush3.bf16.msra.mxu0 %v7833_v61 }
 0x12f   : > { %v6831_v9 = vadd.f32 %v6830_v6, %v6829_v2  ;;  %v6832_v11 = vpop.f32.mrb[6].mxu1  ;;  %7132 = vmatpush3.bf16.msra.mxu1 %v7834_v62  ;;  %v6811_v14 = vpop.f32.mrb[7].mxu0  ;;  %7111 = vmatprep.subr.bf16.mxu0 %v7835_v63  ;;  %v7872_v2 = vld [vmem:[%s8169_s29 + $0x978] sm:$0xff]  }
 0x130   : > { %v6833_v15 = vpop.f32.mrb[7].mxu1  ;;  %7133 = vmatprep.subr.bf16.mxu1 %v7836_v0  ;;  %v4885_v18 = vadd.f32 %v6809_v8, %v8451_v28  ;;  %v7846_v28 = vld [vmem:[%s8169_s29 + $0x900] sm:$0xff]   ;;  %v7874_v8 = vld [vmem:[%s8169_s29 + $0x938] sm:$0xff]  }
 0x131   : > { %v7877_v15 = vld [vmem:[%s8169_s29 + $0xa40] sm:$0xff]  }
 0x132   : > { %v8492_v23 = vadd.f32 %v6831_v9, %v4885_v18  ;;  %7112 = vmatpush3.bf16.msra.mxu0 %v7837_v3  ;;  %v7873_v3 = vld [vmem:[%s8169_s29 + $0x9f8] sm:$0xff]  }
 0x133   : > { %7134 = vmatpush3.bf16.msra.mxu1 %v7838_v4  ;;  %7113 = vmatprep.subr.bf16.mxu0 %v7839_v7  ;;  %v251_v7 = vld [vmem:[%s8164_s25 + $0x48] sm:$0xff] }
 0x134   : > { %7135 = vmatprep.subr.bf16.mxu1 %v7840_v12  ;;  %v434_v9 = vrot.slane %v251_v7, %v8207_v42  ;;  %v427_v10 = vcombine.high %v251_v7, %v251_v7  ;;  %v7875_v12 = vld [vmem:[%s8169_s29 + $0x9b8] sm:$0xff]   ;;  %v7911_v7 = vld [vmem:[%s8169_s29 + $0xbc0] sm:$0xff]  }
 0x136   : > { %7114 = vmatpush3.bf16.msra.mxu0 %v7841_v19  ;;  %v442_v13 = vcombine.high %v434_v9, %v434_v9  ;;  %v441_v14 = vrot.slane %v427_v10, %v8207_v42  ;;  %v646_v19 = vpack.c.bf16 %v434_v9, %v434_v9  ;;  %v7912_v9 = vld [vmem:[%s8169_s29 + $0xb00] sm:$0xff]  }
 0x137   : > { %7136 = vmatpush3.bf16.msra.mxu1 %v7842_v20  ;;  %7143 = vmatprep.subr.bf16.mxu0 %v7844_v24  ;;  %v7879_v20 = vld [vmem:[%s8169_s29 + $0xa00] sm:$0xff]   ;;  %v7881_v24 = vld [vmem:[%s8169_s29 + $0xa48] sm:$0xff]  }
 0x138   : > { %7165 = vmatprep.subr.bf16.mxu1 %v7845_v27  ;;  %v647_v17 = vpack.c.bf16 %v442_v13, %v442_v13  ;;  %v443_v18 = vcombine.high %v441_v14, %v441_v14  ;;  %v648_v21 = vpack.c.bf16 %v441_v14, %v441_v14  ;;  %v7884_v27 = vld [vmem:[%s8169_s29 + $0xa88] sm:$0xff]  }
 0x139   : > { %5443 = vmatmul.mubr.bf16.vlgmr.msra.gmra.mrb[32].mxu0 %v642_v30  ;;  %v7887_v30 = vld [vmem:[%s8169_s29 + $0xa10] sm:$0xff]   ;;  %v7914_v14 = vld [vmem:[%s8169_s29 + $0xb48] sm:$0xff]  }
 0x13a   : > { %5483 = vmatmul.mubr.bf16.vlgmr.msra.gmra.mrb[32].mxu1 %v644_v31  ;;  %7144 = vmatpush3.bf16.msra.mxu0 %v7846_v28  ;;  %v7885_v28 = vld [vmem:[%s8169_s29 + $0xa50] sm:$0xff]  }
 0x13b   : > { %7166 = vmatpush3.bf16.msra.mxu1 %v7847_v32  ;;  %7145 = vmatprep.subr.bf16.mxu0 %v7848_v33  ;;  %v7888_v31 = vld [vmem:[%s8169_s29 + $0xa90] sm:$0xff]   ;;  %v7889_v32 = vld [vmem:[%s8169_s29 + $0xa58] sm:$0xff]  }
 0x13c   : > { %7167 = vmatprep.subr.bf16.mxu1 %v7849_v34  ;;  %5522 = vmatprep.mubr.bf16.mxu0 %v647_v17  ;;  %v7890_v33 = vld [vmem:[%s8169_s29 + $0xad8] sm:$0xff]   ;;  %v7916_v17 = vld [vmem:[%s8169_s29 + $0xb08] sm:$0xff]  }
 0x13d   : > { %v7891_v34 = vld [vmem:[%s8169_s29 + $0xa18] sm:$0xff]  }
 0x13e   : > { %7146 = vmatpush3.bf16.msra.mxu0 %v7850_v35  ;;  %v7892_v35 = vld [vmem:[%s8169_s29 + $0xa98] sm:$0xff]  }
 0x13f   : > { %7168 = vmatpush3.bf16.msra.mxu1 %v7851_v36  ;;  %7147 = vmatprep.subr.bf16.mxu0 %v7852_v37  ;;  %v7893_v36 = vld [vmem:[%s8169_s29 + $0xa60] sm:$0xff]  }
 0x140   : > { %7169 = vmatprep.subr.bf16.mxu1 %v7853_v38  ;;  %v7894_v37 = vld [vmem:[%s8169_s29 + $0xae0] sm:$0xff]  }
 0x141   : > { %v7895_v38 = vld [vmem:[%s8169_s29 + $0xa20] sm:$0xff]  }
 0x142   : > { %7148 = vmatpush3.bf16.msra.mxu0 %v7854_v39  ;;  %v7896_v39 = vld [vmem:[%s8169_s29 + $0xaa0] sm:$0xff]  }
 0x143   : > { %7170 = vmatpush3.bf16.msra.mxu1 %v7855_v40  ;;  %7149 = vmatprep.subr.bf16.mxu0 %v7856_v41  ;;  %v7897_v40 = vld [vmem:[%s8169_s29 + $0xa68] sm:$0xff]  }
 0x144   : > { %7171 = vmatprep.subr.bf16.mxu1 %v7857_v43  ;;  %v7898_v41 = vld [vmem:[%s8169_s29 + $0xae8] sm:$0xff]  }
 0x145   : > { %v7899_v43 = vld [vmem:[%s8169_s29 + $0xa28] sm:$0xff]  }
 0x146   : > { %7150 = vmatpush3.bf16.msra.mxu0 %v7858_v44  ;;  %v7900_v44 = vld [vmem:[%s8169_s29 + $0xaa8] sm:$0xff]  }
 0x147   : > { %7172 = vmatpush3.bf16.msra.mxu1 %v7859_v45  ;;  %7151 = vmatprep.subr.bf16.mxu0 %v7860_v46  ;;  %v7901_v45 = vld [vmem:[%s8169_s29 + $0xa70] sm:$0xff]  }
 0x148   : > { %7173 = vmatprep.subr.bf16.mxu1 %v7861_v47 }
 0x14a   : > { %7152 = vmatpush3.bf16.msra.mxu0 %v7862_v48  ;;  %v7902_v48 = vld [vmem:[%s8169_s29 + $0xaf0] sm:$0xff]  }
 0x14b   : > { %7174 = vmatpush3.bf16.msra.mxu1 %v7863_v49  ;;  %7153 = vmatprep.subr.bf16.mxu0 %v7864_v50  ;;  %v7903_v49 = vld [vmem:[%s8169_s29 + $0xa30] sm:$0xff]  }
 0x14c   : > { %7175 = vmatprep.subr.bf16.mxu1 %v7865_v51  ;;  %v6851_v56 = vpop.f32.mrb[8].mxu0 }
 0x14d   : > { %v6873_v57 = vpop.f32.mrb[8].mxu1  ;;  %v6852_v60 = vpop.f32.mrb[9].mxu0 }
 0x14e   : > { %v6874_v61 = vpop.f32.mrb[9].mxu1  ;;  %v6853_v62 = vadd.f32 %v6852_v60, %v6851_v56  ;;  %v6854_v0 = vpop.f32.mrb[10].mxu0  ;;  %7154 = vmatpush3.bf16.msra.mxu0 %v7866_v52  ;;  %v7904_v52 = vld [vmem:[%s8169_s29 + $0xab0] sm:$0xff]  }
 0x14f   : > { %v6875_v63 = vadd.f32 %v6874_v61, %v6873_v57  ;;  %v6876_v1 = vpop.f32.mrb[10].mxu1  ;;  %7176 = vmatpush3.bf16.msra.mxu1 %v7867_v53  ;;  %v6855_v4 = vpop.f32.mrb[11].mxu0  ;;  %7155 = vmatprep.subr.bf16.mxu0 %v7868_v54  ;;  %v7905_v57 = vld [vmem:[%s8169_s29 + $0xa78] sm:$0xff]  }
 0x150   : > { %v6877_v5 = vpop.f32.mrb[11].mxu1  ;;  %7177 = vmatprep.subr.bf16.mxu1 %v7869_v55  ;;  %v4965_v6 = vadd.f32 %v6853_v62, %v8492_v23  ;;  %v649_v23 = vpack.c.bf16 %v443_v18, %v443_v18  ;;  %v7907_v62 = vld [vmem:[%s8169_s29 + $0xa38] sm:$0xff]   ;;  %v7910_v4 = vld [vmem:[%s8169_s29 + $0xb40] sm:$0xff]   ;;  %v7917_v18 = vld [vmem:[%s8169_s29 + $0xb88] sm:$0xff]  }
 0x151   : > { %v7908_v1 = vld [vmem:[%s8169_s29 + $0xab8] sm:$0xff]  }
 0x152   : > { %v8528_v11 = vadd.f32 %v6875_v63, %v4965_v6  ;;  %7156 = vmatpush3.bf16.msra.mxu0 %v7870_v58  ;;  %5562 = vmatprep.mubr.bf16.mxu1 %v649_v23  ;;  %v7906_v58 = vld [vmem:[%s8169_s29 + $0xaf8] sm:$0xff]   ;;  %v252_v63 = vld [vmem:[%s8164_s25 + $0x50] sm:$0xff] }
 0x153   : > { %7178 = vmatpush3.bf16.msra.mxu1 %v7871_v59  ;;  %7157 = vmatprep.subr.bf16.mxu0 %v7872_v2  ;;  %v451_v2 = vrot.slane %v252_v63, %v8207_v42  ;;  %v7922_v23 = vld [vmem:[%s8169_s29 + $0xb58] sm:$0xff]  }
 0x154   : > { %7179 = vmatprep.subr.bf16.mxu1 %v7873_v3  ;;  %v444_v3 = vcombine.high %v252_v63, %v252_v63 }
 0x155   : > { %v459_v5 = vcombine.high %v451_v2, %v451_v2 }
 0x156   : > { %7158 = vmatpush3.bf16.msra.mxu0 %v7874_v8  ;;  %v458_v6 = vrot.slane %v444_v3, %v8207_v42  ;;  %v650_v8 = vpack.c.bf16 %v451_v2, %v451_v2  ;;  %v7945_v2 = vld [vmem:[%s8169_s29 + $0xc00] sm:$0xff]  }
 0x157   : > { %7180 = vmatpush3.bf16.msra.mxu1 %v7875_v12  ;;  %7187 = vmatprep.subr.bf16.mxu0 %v7877_v15  ;;  %v651_v10 = vpack.c.bf16 %v459_v5, %v459_v5  ;;  %v7913_v12 = vld [vmem:[%s8169_s29 + $0xb80] sm:$0xff]  }
 0x158   : > { %7209 = vmatprep.subr.bf16.mxu1 %v7878_v16  ;;  %v652_v13 = vpack.c.bf16 %v458_v6, %v458_v6  ;;  %v7915_v16 = vld [vmem:[%s8169_s29 + $0xbc8] sm:$0xff]  }
 0x159   : > { %5523 = vmatmul.mubr.bf16.vlgmr.msra.gmra.mrb[36].mxu0 %v646_v19  ;;  %v7918_v19 = vld [vmem:[%s8169_s29 + $0xb50] sm:$0xff]  }
 0x15a   : > { %5563 = vmatmul.mubr.bf16.vlgmr.msra.gmra.mrb[36].mxu1 %v648_v21  ;;  %7188 = vmatpush3.bf16.msra.mxu0 %v7879_v20  ;;  %v7919_v20 = vld [vmem:[%s8169_s29 + $0xbd0] sm:$0xff]  }
 0x15b   : > { %7210 = vmatpush3.bf16.msra.mxu1 %v7880_v22  ;;  %7189 = vmatprep.subr.bf16.mxu0 %v7881_v24  ;;  %v7920_v21 = vld [vmem:[%s8169_s29 + $0xb10] sm:$0xff]   ;;  %v7923_v24 = vld [vmem:[%s8169_s29 + $0xbd8] sm:$0xff]  }
 0x15c   : > { %7211 = vmatprep.subr.bf16.mxu1 %v7882_v25  ;;  %5602 = vmatprep.mubr.bf16.mxu0 %v651_v10  ;;  %v7921_v22 = vld [vmem:[%s8169_s29 + $0xb90] sm:$0xff]   ;;  %v7924_v25 = vld [vmem:[%s8169_s29 + $0xb18] sm:$0xff]   ;;  %v7950_v10 = vld [vmem:[%s8169_s29 + $0xc88] sm:$0xff]  }
 0x15e   : > { %7190 = vmatpush3.bf16.msra.mxu0 %v7883_v26  ;;  %v7925_v26 = vld [vmem:[%s8169_s29 + $0xb98] sm:$0xff]  }
 0x15f   : > { %7212 = vmatpush3.bf16.msra.mxu1 %v7884_v27  ;;  %7191 = vmatprep.subr.bf16.mxu0 %v7885_v28  ;;  %v7926_v27 = vld [vmem:[%s8169_s29 + $0xb60] sm:$0xff]  }
 0x160   : > { %7213 = vmatprep.subr.bf16.mxu1 %v7886_v29  ;;  %v7927_v28 = vld [vmem:[%s8169_s29 + $0xbe0] sm:$0xff]  }
 0x161   : > { %v7928_v29 = vld [vmem:[%s8169_s29 + $0xb20] sm:$0xff]  }
 0x162   : > { %7192 = vmatpush3.bf16.msra.mxu0 %v7887_v30  ;;  %v7929_v30 = vld [vmem:[%s8169_s29 + $0xba0] sm:$0xff]  }
 0x163   : > { %7214 = vmatpush3.bf16.msra.mxu1 %v7888_v31  ;;  %7193 = vmatprep.subr.bf16.mxu0 %v7889_v32  ;;  %v7930_v31 = vld [vmem:[%s8169_s29 + $0xb68] sm:$0xff]  }
 0x164   : > { %7215 = vmatprep.subr.bf16.mxu1 %v7890_v33  ;;  %v7931_v32 = vld [vmem:[%s8169_s29 + $0xbe8] sm:$0xff]  }
 0x165   : > { %v7932_v33 = vld [vmem:[%s8169_s29 + $0xb28] sm:$0xff]  }
 0x166   : > { %7194 = vmatpush3.bf16.msra.mxu0 %v7891_v34  ;;  %v7933_v34 = vld [vmem:[%s8169_s29 + $0xba8] sm:$0xff]  }
 0x167   : > { %7216 = vmatpush3.bf16.msra.mxu1 %v7892_v35  ;;  %7195 = vmatprep.subr.bf16.mxu0 %v7893_v36  ;;  %v7934_v35 = vld [vmem:[%s8169_s29 + $0xb70] sm:$0xff]  }
 0x168   : > { %7217 = vmatprep.subr.bf16.mxu1 %v7894_v37 }
 0x16a   : > { %7196 = vmatpush3.bf16.msra.mxu0 %v7895_v38  ;;  %v7935_v38 = vld [vmem:[%s8169_s29 + $0xbf0] sm:$0xff]  }
 0x16b   : > { %7218 = vmatpush3.bf16.msra.mxu1 %v7896_v39  ;;  %7197 = vmatprep.subr.bf16.mxu0 %v7897_v40  ;;  %v7936_v39 = vld [vmem:[%s8169_s29 + $0xb30] sm:$0xff]  }
 0x16c   : > { %v6895_v46 = vpop.f32.mrb[12].mxu0  ;;  %7219 = vmatprep.subr.bf16.mxu1 %v7898_v41 }
 0x16d   : > { %v6917_v47 = vpop.f32.mrb[12].mxu1  ;;  %v6896_v50 = vpop.f32.mrb[13].mxu0 }
 0x16e   : > { %v6918_v51 = vpop.f32.mrb[13].mxu1  ;;  %v6897_v53 = vadd.f32 %v6896_v50, %v6895_v46  ;;  %v6898_v55 = vpop.f32.mrb[14].mxu0  ;;  %7198 = vmatpush3.bf16.msra.mxu0 %v7899_v43 }
 0x16f   : > { %v6919_v54 = vadd.f32 %v6918_v51, %v6917_v47  ;;  %v6920_v56 = vpop.f32.mrb[14].mxu1  ;;  %7220 = vmatpush3.bf16.msra.mxu1 %v7900_v44  ;;  %v6899_v59 = vpop.f32.mrb[15].mxu0  ;;  %7199 = vmatprep.subr.bf16.mxu0 %v7901_v45  ;;  %v7937_v47 = vld [vmem:[%s8169_s29 + $0xbb0] sm:$0xff]   ;;  %v253_v55 = vld [vmem:[%s8164_s25 + $0x58] sm:$0xff] }
 0x170   : > { %v6921_v60 = vpop.f32.mrb[15].mxu1  ;;  %v5045_v61 = vadd.f32 %v6897_v53, %v8528_v11  ;;  %7221 = vmatprep.subr.bf16.mxu1 %v7902_v48  ;;  %v460_v11 = vcombine.high %v458_v6, %v458_v6  ;;  %v7938_v48 = vld [vmem:[%s8169_s29 + $0xb78] sm:$0xff]   ;;  %v468_v56 = vrot.slane %v253_v55, %v8207_v42  ;;  %v7946_v6 = vld [vmem:[%s8169_s29 + $0xc80] sm:$0xff]  }
 0x171   : > { %v7940_v53 = vld [vmem:[%s8169_s29 + $0xb38] sm:$0xff]  }
 0x172   : > { %v8565_v0 = vadd.f32 %v6919_v54, %v5045_v61  ;;  %7200 = vmatpush3.bf16.msra.mxu0 %v7903_v49  ;;  %v653_v15 = vpack.c.bf16 %v460_v11, %v460_v11  ;;  %v7941_v59 = vld [vmem:[%s8169_s29 + $0xbb8] sm:$0xff]   ;;  %v476_v60 = vcombine.high %v468_v56, %v468_v56  ;;  %v654_v63 = vpack.c.bf16 %v468_v56, %v468_v56  ;;  %v7952_v11 = vld [vmem:[%s8169_s29 + $0xcd0] sm:$0xff]  }
 0x173   : > { %7222 = vmatpush3.bf16.msra.mxu1 %v7904_v52  ;;  %7201 = vmatprep.subr.bf16.mxu0 %v7905_v57  ;;  %v7939_v52 = vld [vmem:[%s8169_s29 + $0xbf8] sm:$0xff]   ;;  %v461_v57 = vcombine.high %v253_v55, %v253_v55  ;;  %v7978_v55 = vld [vmem:[%s8169_s29 + $0xd00] sm:$0xff]  }
 0x174   : > { %7223 = vmatprep.subr.bf16.mxu1 %v7906_v58  ;;  %5642 = vmatprep.mubr.bf16.mxu1 %v653_v15  ;;  %v7943_v58 = vld [vmem:[%s8169_s29 + $0xc40] sm:$0xff]   ;;  %v7956_v15 = vld [vmem:[%s8169_s29 + $0xcd8] sm:$0xff]  }
 0x175   : > { %v475_v61 = vrot.slane %v461_v57, %v8207_v42 }
 0x176   : > { %7202 = vmatpush3.bf16.msra.mxu0 %v7907_v62  ;;  %v7944_v62 = vld [vmem:[%s8169_s29 + $0xcc0] sm:$0xff]  }
 0x177   : > { %7224 = vmatpush3.bf16.msra.mxu1 %v7908_v1  ;;  %7231 = vmatprep.subr.bf16.mxu0 %v7910_v4  ;;  %v477_v1 = vcombine.high %v475_v61, %v475_v61  ;;  %v656_v3 = vpack.c.bf16 %v475_v61, %v475_v61  ;;  %v7947_v4 = vld [vmem:[%s8169_s29 + $0xc48] sm:$0xff]  }
 0x178   : > { %7253 = vmatprep.subr.bf16.mxu1 %v7911_v7  ;;  %v7948_v7 = vld [vmem:[%s8169_s29 + $0xcc8] sm:$0xff]  }
 0x179   : > { %5603 = vmatmul.mubr.bf16.vlgmr.msra.gmra.mrb[40].mxu0 %v650_v8  ;;  %v657_v5 = vpack.c.bf16 %v477_v1, %v477_v1  ;;  %v7949_v8 = vld [vmem:[%s8169_s29 + $0xc08] sm:$0xff]   ;;  %v7984_v1 = vld [vmem:[%s8169_s29 + $0xd50] sm:$0xff]  }
 0x17a   : > { %7232 = vmatpush3.bf16.msra.mxu0 %v7912_v9  ;;  %5643 = vmatmul.mubr.bf16.vlgmr.msra.gmra.mrb[40].mxu1 %v652_v13  ;;  %v7951_v9 = vld [vmem:[%s8169_s29 + $0xc50] sm:$0xff]   ;;  %v7955_v13 = vld [vmem:[%s8169_s29 + $0xc58] sm:$0xff]  }
 0x17b   : > { %7233 = vmatprep.subr.bf16.mxu0 %v7914_v14  ;;  %7254 = vmatpush3.bf16.msra.mxu1 %v7913_v12  ;;  %v7953_v12 = vld [vmem:[%s8169_s29 + $0xc10] sm:$0xff]  }
 0x17c   : > { %7255 = vmatprep.subr.bf16.mxu1 %v7915_v16  ;;  %5722 = vmatprep.mubr.bf16.mxu1 %v657_v5  ;;  %v7954_v14 = vld [vmem:[%s8169_s29 + $0xc90] sm:$0xff]   ;;  %v7957_v16 = vld [vmem:[%s8169_s29 + $0xc18] sm:$0xff]  }
 0x17d   : > { %v7988_v5 = vld [vmem:[%s8169_s29 + $0xd58] sm:$0xff]  }
 0x17e   : > { %7234 = vmatpush3.bf16.msra.mxu0 %v7916_v17  ;;  %v7959_v17 = vld [vmem:[%s8169_s29 + $0xc60] sm:$0xff]  }
 0x17f   : > { %7235 = vmatprep.subr.bf16.mxu0 %v7918_v19  ;;  %7256 = vmatpush3.bf16.msra.mxu1 %v7917_v18  ;;  %v7958_v18 = vld [vmem:[%s8169_s29 + $0xc98] sm:$0xff]   ;;  %v7960_v19 = vld [vmem:[%s8169_s29 + $0xce0] sm:$0xff]  }
 0x180   : > { %7257 = vmatprep.subr.bf16.mxu1 %v7919_v20  ;;  %v7961_v20 = vld [vmem:[%s8169_s29 + $0xc20] sm:$0xff]  }
 0x182   : > { %7236 = vmatpush3.bf16.msra.mxu0 %v7920_v21  ;;  %v7963_v21 = vld [vmem:[%s8169_s29 + $0xc68] sm:$0xff]  }
 0x183   : > { %7237 = vmatprep.subr.bf16.mxu0 %v7922_v23  ;;  %7258 = vmatpush3.bf16.msra.mxu1 %v7921_v22  ;;  %v7962_v22 = vld [vmem:[%s8169_s29 + $0xca0] sm:$0xff]   ;;  %v7964_v23 = vld [vmem:[%s8169_s29 + $0xce8] sm:$0xff]  }
 0x184   : > { %7259 = vmatprep.subr.bf16.mxu1 %v7923_v24  ;;  %v7965_v24 = vld [vmem:[%s8169_s29 + $0xc28] sm:$0xff]  }
 0x186   : > { %7238 = vmatpush3.bf16.msra.mxu0 %v7924_v25 }
 0x187   : > { %7239 = vmatprep.subr.bf16.mxu0 %v7926_v27  ;;  %7260 = vmatpush3.bf16.msra.mxu1 %v7925_v26  ;;  %v7966_v27 = vld [vmem:[%s8169_s29 + $0xca8] sm:$0xff]  }
 0x188   : > { %7261 = vmatprep.subr.bf16.mxu1 %v7927_v28  ;;  %v7967_v28 = vld [vmem:[%s8169_s29 + $0xc70] sm:$0xff]  }
 0x18a   : > { %7240 = vmatpush3.bf16.msra.mxu0 %v7928_v29 }
 0x18b   : > { %7241 = vmatprep.subr.bf16.mxu0 %v7930_v31  ;;  %7262 = vmatpush3.bf16.msra.mxu1 %v7929_v30 }
 0x18c   : > { %v6939_v36 = vpop.f32.mrb[16].mxu0  ;;  %7263 = vmatprep.subr.bf16.mxu1 %v7931_v32 }
 0x18d   : > { %v6961_v37 = vpop.f32.mrb[16].mxu1  ;;  %v6940_v40 = vpop.f32.mrb[17].mxu0 }
 0x18e   : > { %v6962_v41 = vpop.f32.mrb[17].mxu1  ;;  %v6941_v43 = vadd.f32 %v6940_v40, %v6939_v36  ;;  %v6942_v45 = vpop.f32.mrb[18].mxu0  ;;  %7242 = vmatpush3.bf16.msra.mxu0 %v7932_v33  ;;  %v7969_v36 = vld [vmem:[%s8169_s29 + $0xc30] sm:$0xff]  }
 0x18f   : > { %v6963_v44 = vadd.f32 %v6962_v41, %v6961_v37  ;;  %v6964_v46 = vpop.f32.mrb[18].mxu1  ;;  %v6943_v49 = vpop.f32.mrb[19].mxu0  ;;  %7243 = vmatprep.subr.bf16.mxu0 %v7934_v35  ;;  %7264 = vmatpush3.bf16.msra.mxu1 %v7933_v34  ;;  %v7968_v35 = vld [vmem:[%s8169_s29 + $0xcf0] sm:$0xff]   ;;  %v7971_v41 = vld [vmem:[%s8169_s29 + $0xc78] sm:$0xff]  }
 0x190   : > { %v6965_v50 = vpop.f32.mrb[19].mxu1  ;;  %v5125_v51 = vadd.f32 %v6941_v43, %v8565_v0  ;;  %7265 = vmatprep.subr.bf16.mxu1 %v7935_v38  ;;  %v655_v0 = vpack.c.bf16 %v476_v60, %v476_v60  ;;  %v7972_v43 = vld [vmem:[%s8169_s29 + $0xcf8] sm:$0xff]   ;;  %v254_v46 = vld [vmem:[%s8164_s25 + $0x60] sm:$0xff]  ;;  %v7980_v60 = vld [vmem:[%s8169_s29 + $0xd48] sm:$0xff]  }
 0x191   : > { %v7973_v45 = vld [vmem:[%s8169_s29 + $0xc38] sm:$0xff]   ;;  %v7976_v49 = vld [vmem:[%s8169_s29 + $0xd40] sm:$0xff]  }
 0x192   : > { %v8602_v54 = vadd.f32 %v6963_v44, %v5125_v51  ;;  %7244 = vmatpush3.bf16.msra.mxu0 %v7936_v39  ;;  %5682 = vmatprep.mubr.bf16.mxu0 %v655_v0  ;;  %v7970_v39 = vld [vmem:[%s8169_s29 + $0xcb0] sm:$0xff]   ;;  %v7974_v50 = vld [vmem:[%s8169_s29 + $0xcb8] sm:$0xff]   ;;  %v7983_v0 = vld [vmem:[%s8169_s29 + $0xd88] sm:$0xff]  }
 0x193   : > { %7245 = vmatprep.subr.bf16.mxu0 %v7938_v48  ;;  %7266 = vmatpush3.bf16.msra.mxu1 %v7937_v47  ;;  %v485_v47 = vrot.slane %v254_v46, %v8207_v42  ;;  %v478_v48 = vcombine.high %v254_v46, %v254_v46 }
 0x194   : > { %7267 = vmatprep.subr.bf16.mxu1 %v7939_v52 }
 0x195   : > { %v493_v51 = vcombine.high %v485_v47, %v485_v47  ;;  %v492_v52 = vrot.slane %v478_v48, %v8207_v42  ;;  %v8011_v48 = vld [vmem:[%s8169_s29 + $0xe00] sm:$0xff]  }
 0x196   : > { %7246 = vmatpush3.bf16.msra.mxu0 %v7940_v53  ;;  %v7977_v53 = vld [vmem:[%s8169_s29 + $0xdc0] sm:$0xff]  }
 0x197   : > { %7275 = vmatprep.subr.bf16.mxu0 %v7943_v58  ;;  %7268 = vmatpush3.bf16.msra.mxu1 %v7941_v59  ;;  %v659_v56 = vpack.c.bf16 %v493_v51, %v493_v51  ;;  %v494_v57 = vcombine.high %v492_v52, %v492_v52  ;;  %v7979_v58 = vld [vmem:[%s8169_s29 + $0xd80] sm:$0xff]   ;;  %v660_v59 = vpack.c.bf16 %v492_v52, %v492_v52 }
 0x198   : > { %7297 = vmatprep.subr.bf16.mxu1 %v7944_v62  ;;  %v7981_v62 = vld [vmem:[%s8169_s29 + $0xdc8] sm:$0xff]   ;;  %v8012_v52 = vld [vmem:[%s8169_s29 + $0xe80] sm:$0xff]  }
 0x199   : > { %5683 = vmatmul.mubr.bf16.vlgmr.msra.gmra.mrb[44].mxu0 %v654_v63  ;;  %v661_v61 = vpack.c.bf16 %v494_v57, %v494_v57  ;;  %v7982_v63 = vld [vmem:[%s8169_s29 + $0xd08] sm:$0xff]   ;;  %v8018_v57 = vld [vmem:[%s8169_s29 + $0xed0] sm:$0xff]  }
 0x19a   : > { %7276 = vmatpush3.bf16.msra.mxu0 %v7945_v2  ;;  %5723 = vmatmul.mubr.bf16.vlgmr.msra.gmra.mrb[44].mxu1 %v656_v3  ;;  %v7985_v2 = vld [vmem:[%s8169_s29 + $0xdd0] sm:$0xff]  }
 0x19b   : > { %7277 = vmatprep.subr.bf16.mxu0 %v7947_v4  ;;  %7298 = vmatpush3.bf16.msra.mxu1 %v7946_v6  ;;  %v7986_v3 = vld [vmem:[%s8169_s29 + $0xd10] sm:$0xff]   ;;  %v7989_v6 = vld [vmem:[%s8169_s29 + $0xdd8] sm:$0xff]  }
 0x19c   : > { %7299 = vmatprep.subr.bf16.mxu1 %v7948_v7  ;;  %5762 = vmatprep.mubr.bf16.mxu0 %v659_v56  ;;  %v7987_v4 = vld [vmem:[%s8169_s29 + $0xd90] sm:$0xff]   ;;  %v7990_v7 = vld [vmem:[%s8169_s29 + $0xd18] sm:$0xff]   ;;  %v8016_v56 = vld [vmem:[%s8169_s29 + $0xe88] sm:$0xff]  }
 0x19d   : > { %5802 = vmatprep.mubr.bf16.mxu1 %v661_v61  ;;  %v8022_v61 = vld [vmem:[%s8169_s29 + $0xed8] sm:$0xff]  }
 0x19e   : > { %7278 = vmatpush3.bf16.msra.mxu0 %v7949_v8  ;;  %v7991_v8 = vld [vmem:[%s8169_s29 + $0xd98] sm:$0xff]  }
 0x19f   : > { %7279 = vmatprep.subr.bf16.mxu0 %v7951_v9  ;;  %7300 = vmatpush3.bf16.msra.mxu1 %v7950_v10  ;;  %v7992_v9 = vld [vmem:[%s8169_s29 + $0xd60] sm:$0xff]  }
 0x1a0   : > { %7301 = vmatprep.subr.bf16.mxu1 %v7952_v11  ;;  %v7993_v10 = vld [vmem:[%s8169_s29 + $0xde0] sm:$0xff]  }
 0x1a1   : > { %v7994_v11 = vld [vmem:[%s8169_s29 + $0xd20] sm:$0xff]  }
 0x1a2   : > { %7280 = vmatpush3.bf16.msra.mxu0 %v7953_v12  ;;  %v7995_v12 = vld [vmem:[%s8169_s29 + $0xda0] sm:$0xff]  }
 0x1a3   : > { %7281 = vmatprep.subr.bf16.mxu0 %v7955_v13  ;;  %7302 = vmatpush3.bf16.msra.mxu1 %v7954_v14  ;;  %v7996_v13 = vld [vmem:[%s8169_s29 + $0xd68] sm:$0xff]  }
 0x1a4   : > { %7303 = vmatprep.subr.bf16.mxu1 %v7956_v15  ;;  %v7997_v14 = vld [vmem:[%s8169_s29 + $0xde8] sm:$0xff]  }
 0x1a5   : > { %v7998_v15 = vld [vmem:[%s8169_s29 + $0xd28] sm:$0xff]  }
 0x1a6   : > { %7282 = vmatpush3.bf16.msra.mxu0 %v7957_v16 }
 0x1a7   : > { %7283 = vmatprep.subr.bf16.mxu0 %v7959_v17  ;;  %7304 = vmatpush3.bf16.msra.mxu1 %v7958_v18  ;;  %v7999_v18 = vld [vmem:[%s8169_s29 + $0xda8] sm:$0xff]  }
 0x1a8   : > { %7305 = vmatprep.subr.bf16.mxu1 %v7960_v19  ;;  %v8000_v19 = vld [vmem:[%s8169_s29 + $0xd70] sm:$0xff]  }
 0x1aa   : > { %7284 = vmatpush3.bf16.msra.mxu0 %v7961_v20 }
 0x1ab   : > { %7285 = vmatprep.subr.bf16.mxu0 %v7963_v21  ;;  %7306 = vmatpush3.bf16.msra.mxu1 %v7962_v22 }
 0x1ac   : > { %v6983_v25 = vpop.f32.mrb[20].mxu0  ;;  %7307 = vmatprep.subr.bf16.mxu1 %v7964_v23 }
 0x1ad   : > { %v7005_v26 = vpop.f32.mrb[20].mxu1  ;;  %v6984_v29 = vpop.f32.mrb[21].mxu0 }
 0x1ae   : > { %v7006_v30 = vpop.f32.mrb[21].mxu1  ;;  %v6985_v31 = vadd.f32 %v6984_v29, %v6983_v25  ;;  %v6986_v33 = vpop.f32.mrb[22].mxu0  ;;  %7286 = vmatpush3.bf16.msra.mxu0 %v7965_v24 }
 0x1af   : > { %v7007_v32 = vadd.f32 %v7006_v30, %v7005_v26  ;;  %v7008_v34 = vpop.f32.mrb[22].mxu1  ;;  %v6987_v37 = vpop.f32.mrb[23].mxu0  ;;  %7287 = vmatprep.subr.bf16.mxu0 %v7967_v28  ;;  %7308 = vmatpush3.bf16.msra.mxu1 %v7966_v27  ;;  %v8001_v26 = vld [vmem:[%s8169_s29 + $0xdf0] sm:$0xff]  }
 0x1b0   : > { %v7009_v38 = vpop.f32.mrb[23].mxu1  ;;  %v5205_v40 = vadd.f32 %v6985_v31, %v8602_v54  ;;  %7309 = vmatprep.subr.bf16.mxu1 %v7968_v35  ;;  %v658_v54 = vpack.c.bf16 %v485_v47, %v485_v47  ;;  %v8002_v27 = vld [vmem:[%s8169_s29 + $0xd30] sm:$0xff]   ;;  %v8005_v34 = vld [vmem:[%s8169_s29 + $0xdf8] sm:$0xff]  }
 0x1b1   : > { %v8003_v31 = vld [vmem:[%s8169_s29 + $0xdb0] sm:$0xff]   ;;  %v8006_v35 = vld [vmem:[%s8169_s29 + $0xd38] sm:$0xff]  }
 0x1b2   : > { %v8639_v44 = vadd.f32 %v7007_v32, %v5205_v40  ;;  %7288 = vmatpush3.bf16.msra.mxu0 %v7969_v36  ;;  %v8004_v32 = vld [vmem:[%s8169_s29 + $0xd78] sm:$0xff]   ;;  %v255_v36 = vld [vmem:[%s8164_s25 + $0x68] sm:$0xff] }
 0x1b3   : > { %7289 = vmatprep.subr.bf16.mxu0 %v7971_v41  ;;  %7310 = vmatpush3.bf16.msra.mxu1 %v7970_v39  ;;  %v502_v37 = vrot.slane %v255_v36, %v8207_v42  ;;  %v495_v38 = vcombine.high %v255_v36, %v255_v36  ;;  %v8009_v39 = vld [vmem:[%s8169_s29 + $0xe40] sm:$0xff]   ;;  %v8007_v40 = vld [vmem:[%s8169_s29 + $0xdb8] sm:$0xff]  }
 0x1b4   : > { %7311 = vmatprep.subr.bf16.mxu1 %v7972_v43 }
 0x1b5   : > { %v510_v41 = vcombine.high %v502_v37, %v502_v37  ;;  %v509_v43 = vrot.slane %v495_v38, %v8207_v42  ;;  %v8044_v38 = vld [vmem:[%s8169_s29 + $0xf00] sm:$0xff]  }
 0x1b6   : > { %7290 = vmatpush3.bf16.msra.mxu0 %v7973_v45  ;;  %v662_v45 = vpack.c.bf16 %v502_v37, %v502_v37 }
 0x1b7   : > { %7319 = vmatprep.subr.bf16.mxu0 %v7976_v49  ;;  %7312 = vmatpush3.bf16.msra.mxu1 %v7974_v50  ;;  %v663_v46 = vpack.c.bf16 %v510_v41, %v510_v41  ;;  %v511_v47 = vcombine.high %v509_v43, %v509_v43  ;;  %v664_v49 = vpack.c.bf16 %v509_v43, %v509_v43  ;;  %v8013_v50 = vld [vmem:[%s8169_s29 + $0xe48] sm:$0xff]   ;;  %v8045_v43 = vld [vmem:[%s8169_s29 + $0xf80] sm:$0xff]  }
 0x1b8   : > { %7341 = vmatprep.subr.bf16.mxu1 %v7977_v53  ;;  %v8014_v53 = vld [vmem:[%s8169_s29 + $0xec8] sm:$0xff]  }
 0x1b9   : > { %5763 = vmatmul.mubr.bf16.vlgmr.msra.gmra.mrb[48].mxu0 %v658_v54  ;;  %v665_v51 = vpack.c.bf16 %v511_v47, %v511_v47  ;;  %v8015_v54 = vld [vmem:[%s8169_s29 + $0xe08] sm:$0xff]  }
 0x1ba   : > { %7320 = vmatpush3.bf16.msra.mxu0 %v7978_v55  ;;  %5803 = vmatmul.mubr.bf16.vlgmr.msra.gmra.mrb[48].mxu1 %v660_v59  ;;  %v8017_v55 = vld [vmem:[%s8169_s29 + $0xe50] sm:$0xff]   ;;  %v8021_v59 = vld [vmem:[%s8169_s29 + $0xe58] sm:$0xff]   ;;  %v8049_v47 = vld [vmem:[%s8169_s29 + $0xf88] sm:$0xff]  }
 0x1bb   : > { %7321 = vmatprep.subr.bf16.mxu0 %v7980_v60  ;;  %7342 = vmatpush3.bf16.msra.mxu1 %v7979_v58  ;;  %v8019_v58 = vld [vmem:[%s8169_s29 + $0xe10] sm:$0xff]  }
 0x1bc   : > { %7343 = vmatprep.subr.bf16.mxu1 %v7981_v62  ;;  %5842 = vmatprep.mubr.bf16.mxu0 %v663_v46  ;;  %v8020_v60 = vld [vmem:[%s8169_s29 + $0xe90] sm:$0xff]   ;;  %v8023_v62 = vld [vmem:[%s8169_s29 + $0xe18] sm:$0xff]  }
 0x1bd   : > { %5882 = vmatprep.mubr.bf16.mxu1 %v665_v51  ;;  %v8050_v46 = vld [vmem:[%s8169_s29 + $0xf50] sm:$0xff]  }
 0x1be   : > { %7322 = vmatpush3.bf16.msra.mxu0 %v7982_v63  ;;  %v8025_v63 = vld [vmem:[%s8169_s29 + $0xe60] sm:$0xff]   ;;  %v8053_v51 = vld [vmem:[%s8169_s29 + $0xf90] sm:$0xff]  }
 0x1bf   : > { %7323 = vmatprep.subr.bf16.mxu0 %v7984_v1  ;;  %7344 = vmatpush3.bf16.msra.mxu1 %v7983_v0  ;;  %v8024_v0 = vld [vmem:[%s8169_s29 + $0xe98] sm:$0xff]   ;;  %v8026_v1 = vld [vmem:[%s8169_s29 + $0xee0] sm:$0xff]  }
 0x1c0   : > { %7345 = vmatprep.subr.bf16.mxu1 %v7985_v2  ;;  %v8027_v2 = vld [vmem:[%s8169_s29 + $0xe20] sm:$0xff]  }
 0x1c2   : > { %7324 = vmatpush3.bf16.msra.mxu0 %v7986_v3  ;;  %v8029_v3 = vld [vmem:[%s8169_s29 + $0xe68] sm:$0xff]  }
 0x1c3   : > { %7325 = vmatprep.subr.bf16.mxu0 %v7988_v5  ;;  %7346 = vmatpush3.bf16.msra.mxu1 %v7987_v4  ;;  %v8028_v4 = vld [vmem:[%s8169_s29 + $0xea0] sm:$0xff]  }
 0x1c4   : > { %7347 = vmatprep.subr.bf16.mxu1 %v7989_v6 }
 0x1c6   : > { %7326 = vmatpush3.bf16.msra.mxu0 %v7990_v7  ;;  %v8030_v7 = vld [vmem:[%s8169_s29 + $0xee8] sm:$0xff]  }
 0x1c7   : > { %7327 = vmatprep.subr.bf16.mxu0 %v7992_v9  ;;  %7348 = vmatpush3.bf16.msra.mxu1 %v7991_v8  ;;  %v8031_v8 = vld [vmem:[%s8169_s29 + $0xe28] sm:$0xff]  }
 0x1c8   : > { %7349 = vmatprep.subr.bf16.mxu1 %v7993_v10 }
 0x1ca   : > { %7328 = vmatpush3.bf16.msra.mxu0 %v7994_v11  ;;  %v8032_v11 = vld [vmem:[%s8169_s29 + $0xea8] sm:$0xff]  }
 0x1cb   : > { %7329 = vmatprep.subr.bf16.mxu0 %v7996_v13  ;;  %7350 = vmatpush3.bf16.msra.mxu1 %v7995_v12 }
 0x1cc   : > { %v7027_v16 = vpop.f32.mrb[24].mxu0  ;;  %7351 = vmatprep.subr.bf16.mxu1 %v7997_v14 }
 0x1cd   : > { %v7049_v17 = vpop.f32.mrb[24].mxu1  ;;  %v7028_v20 = vpop.f32.mrb[25].mxu0 }
 0x1ce   : > { %v7050_v21 = vpop.f32.mrb[25].mxu1  ;;  %v7029_v22 = vadd.f32 %v7028_v20, %v7027_v16  ;;  %v7030_v24 = vpop.f32.mrb[26].mxu0  ;;  %7330 = vmatpush3.bf16.msra.mxu0 %v7998_v15  ;;  %v8033_v16 = vld [vmem:[%s8169_s29 + $0xe70] sm:$0xff]  }
 0x1cf   : > { %v7051_v23 = vadd.f32 %v7050_v21, %v7049_v17  ;;  %v7052_v25 = vpop.f32.mrb[26].mxu1  ;;  %v7031_v28 = vpop.f32.mrb[27].mxu0  ;;  %7331 = vmatprep.subr.bf16.mxu0 %v8000_v19  ;;  %7352 = vmatpush3.bf16.msra.mxu1 %v7999_v18  ;;  %v8034_v17 = vld [vmem:[%s8169_s29 + $0xef0] sm:$0xff]   ;;  %v8037_v24 = vld [vmem:[%s8169_s29 + $0xe78] sm:$0xff]  }
 0x1d0   : > { %v7053_v29 = vpop.f32.mrb[27].mxu1  ;;  %v5285_v30 = vadd.f32 %v7029_v22, %v8639_v44  ;;  %7353 = vmatprep.subr.bf16.mxu1 %v8001_v26  ;;  %v8010_v44 = vld [vmem:[%s8169_s29 + $0xec0] sm:$0xff]   ;;  %v8035_v21 = vld [vmem:[%s8169_s29 + $0xe30] sm:$0xff]   ;;  %v8038_v25 = vld [vmem:[%s8169_s29 + $0xef8] sm:$0xff]  }
 0x1d1   : > { %v8036_v22 = vld [vmem:[%s8169_s29 + $0xeb0] sm:$0xff]   ;;  %v8039_v26 = vld [vmem:[%s8169_s29 + $0xe38] sm:$0xff]  }
 0x1d2   : > { %v8676_v33 = vadd.f32 %v7051_v23, %v5285_v30  ;;  %7332 = vmatpush3.bf16.msra.mxu0 %v8002_v27  ;;  %v256_v27 = vld [vmem:[%s8164_s25 + $0x70] sm:$0xff]  ;;  %v8042_v30 = vld [vmem:[%s8169_s29 + $0xf40] sm:$0xff]  }
 0x1d3   : > { %7333 = vmatprep.subr.bf16.mxu0 %v8004_v32  ;;  %7354 = vmatpush3.bf16.msra.mxu1 %v8003_v31  ;;  %v519_v28 = vrot.slane %v256_v27, %v8207_v42  ;;  %v512_v29 = vcombine.high %v256_v27, %v256_v27  ;;  %v8040_v31 = vld [vmem:[%s8169_s29 + $0xeb8] sm:$0xff]  }
 0x1d4   : > { %7355 = vmatprep.subr.bf16.mxu1 %v8005_v34  ;;  %v8043_v34 = vld [vmem:[%s8169_s29 + $0xfc0] sm:$0xff]  }
 0x1d5   : > { %v527_v32 = vcombine.high %v519_v28, %v519_v28 }
 0x1d6   : > { %7334 = vmatpush3.bf16.msra.mxu0 %v8006_v35  ;;  %v666_v35 = vpack.c.bf16 %v519_v28, %v519_v28 }
 0x1d7   : > { %7363 = vmatprep.subr.bf16.mxu0 %v8009_v39  ;;  %7356 = vmatpush3.bf16.msra.mxu1 %v8007_v40  ;;  %v667_v36 = vpack.c.bf16 %v527_v32, %v527_v32  ;;  %v8046_v40 = vld [vmem:[%s8169_s29 + $0xf48] sm:$0xff]  }
 0x1d8   : > { %7385 = vmatprep.subr.bf16.mxu1 %v8010_v44  ;;  %v8047_v44 = vld [vmem:[%s8169_s29 + $0xfc8] sm:$0xff]  }
 0x1d9   : > { %5843 = vmatmul.mubr.bf16.vlgmr.msra.gmra.mrb[52].mxu0 %v662_v45  ;;  %v8048_v45 = vld [vmem:[%s8169_s29 + $0xf08] sm:$0xff]  }
 0x1da   : > { %7364 = vmatpush3.bf16.msra.mxu0 %v8011_v48  ;;  %5883 = vmatmul.mubr.bf16.vlgmr.msra.gmra.mrb[52].mxu1 %v664_v49  ;;  %v8051_v48 = vld [vmem:[%s8169_s29 + $0xfd0] sm:$0xff]  }
 0x1db   : > { %7365 = vmatprep.subr.bf16.mxu0 %v8013_v50  ;;  %7386 = vmatpush3.bf16.msra.mxu1 %v8012_v52  ;;  %v8052_v49 = vld [vmem:[%s8169_s29 + $0xf10] sm:$0xff]   ;;  %v8054_v50 = vld [vmem:[%s8169_s29 + $0xf58] sm:$0xff]  }
 0x1dc   : > { %7387 = vmatprep.subr.bf16.mxu1 %v8014_v53  ;;  %5922 = vmatprep.mubr.bf16.mxu0 %v667_v36  ;;  %v8055_v52 = vld [vmem:[%s8169_s29 + $0xfd8] sm:$0xff]  }
 0x1dd   : > { %v8056_v53 = vld [vmem:[%s8169_s29 + $0xf18] sm:$0xff]  }
 0x1de   : > { %7366 = vmatpush3.bf16.msra.mxu0 %v8015_v54  ;;  %v8058_v54 = vld [vmem:[%s8169_s29 + $0xf60] sm:$0xff]  }
 0x1df   : > { %7367 = vmatprep.subr.bf16.mxu0 %v8017_v55  ;;  %7388 = vmatpush3.bf16.msra.mxu1 %v8016_v56  ;;  %v8057_v55 = vld [vmem:[%s8169_s29 + $0xf98] sm:$0xff]   ;;  %v8059_v56 = vld [vmem:[%s8169_s29 + $0xfe0] sm:$0xff]  }
 0x1e0   : > { %7389 = vmatprep.subr.bf16.mxu1 %v8018_v57  ;;  %v8060_v57 = vld [vmem:[%s8169_s29 + $0xf20] sm:$0xff]  }
 0x1e2   : > { %7368 = vmatpush3.bf16.msra.mxu0 %v8019_v58  ;;  %v8062_v58 = vld [vmem:[%s8169_s29 + $0xf68] sm:$0xff]  }
 0x1e3   : > { %7369 = vmatprep.subr.bf16.mxu0 %v8021_v59  ;;  %7390 = vmatpush3.bf16.msra.mxu1 %v8020_v60  ;;  %v8061_v59 = vld [vmem:[%s8169_s29 + $0xfa0] sm:$0xff]  }
 0x1e4   : > { %7391 = vmatprep.subr.bf16.mxu1 %v8022_v61 }
 0x1e6   : > { %7370 = vmatpush3.bf16.msra.mxu0 %v8023_v62  ;;  %v8063_v62 = vld [vmem:[%s8169_s29 + $0xfe8] sm:$0xff]  }
 0x1e7   : > { %7371 = vmatprep.subr.bf16.mxu0 %v8025_v63  ;;  %7392 = vmatpush3.bf16.msra.mxu1 %v8024_v0 }
 0x1e8   : > { %7393 = vmatprep.subr.bf16.mxu1 %v8026_v1 }
 0x1ea   : > { %7372 = vmatpush3.bf16.msra.mxu0 %v8027_v2 }
 0x1eb   : > { %7373 = vmatprep.subr.bf16.mxu0 %v8029_v3  ;;  %7394 = vmatpush3.bf16.msra.mxu1 %v8028_v4 }
 0x1ec   : > { %v7071_v5 = vpop.f32.mrb[28].mxu0  ;;  %7395 = vmatprep.subr.bf16.mxu1 %v8030_v7 }
 0x1ed   : > { %v7093_v6 = vpop.f32.mrb[28].mxu1  ;;  %v7072_v9 = vpop.f32.mrb[29].mxu0 }
 0x1ee   : > { %v7094_v10 = vpop.f32.mrb[29].mxu1  ;;  %v7073_v12 = vadd.f32 %v7072_v9, %v7071_v5  ;;  %v7074_v14 = vpop.f32.mrb[30].mxu0  ;;  %7374 = vmatpush3.bf16.msra.mxu0 %v8031_v8  ;;  %v8064_v5 = vld [vmem:[%s8169_s29 + $0xf28] sm:$0xff]  }
 0x1ef   : > { %v7095_v13 = vadd.f32 %v7094_v10, %v7093_v6  ;;  %v7096_v15 = vpop.f32.mrb[30].mxu1  ;;  %v7075_v18 = vpop.f32.mrb[31].mxu0  ;;  %7375 = vmatprep.subr.bf16.mxu0 %v8033_v16  ;;  %7396 = vmatpush3.bf16.msra.mxu1 %v8032_v11  ;;  %v8066_v6 = vld [vmem:[%s8169_s29 + $0xf70] sm:$0xff]   ;;  %v8065_v10 = vld [vmem:[%s8169_s29 + $0xfa8] sm:$0xff]   ;;  %v8070_v14 = vld [vmem:[%s8169_s29 + $0xf78] sm:$0xff]  }
 0x1f0   : > { %v7097_v19 = vpop.f32.mrb[31].mxu1  ;;  %v5365_v20 = vadd.f32 %v7073_v12, %v8676_v33  ;;  %7397 = vmatprep.subr.bf16.mxu1 %v8034_v17  ;;  %v526_v33 = vrot.slane %v512_v29, %v8207_v42  ;;  %v8067_v11 = vld [vmem:[%s8169_s29 + $0xff0] sm:$0xff]   ;;  %v8071_v16 = vld [vmem:[%s8169_s29 + $0xff8] sm:$0xff]  }
 0x1f1   : > { %v8069_v15 = vld [vmem:[%s8169_s29 + $0xfb0] sm:$0xff]   ;;  %v8072_v17 = vld [vmem:[%s8169_s29 + $0xf38] sm:$0xff]  }
 0x1f2   : > { %v8713_v23 = vadd.f32 %v7095_v13, %v5365_v20  ;;  %7376 = vmatpush3.bf16.msra.mxu0 %v8035_v21  ;;  %v528_v37 = vcombine.high %v526_v33, %v526_v33  ;;  %v668_v39 = vpack.c.bf16 %v526_v33, %v526_v33  ;;  %v8068_v13 = vld [vmem:[%s8169_s29 + $0xf30] sm:$0xff]   ;;  %v257_v18 = vld [vmem:[%s8164_s25 + $0x78] sm:$0xff] }
 0x1f3   : > { %7377 = vmatprep.subr.bf16.mxu0 %v8037_v24  ;;  %7398 = vmatpush3.bf16.msra.mxu1 %v8036_v22  ;;  %v536_v19 = vrot.slane %v257_v18, %v8207_v42  ;;  %v529_v20 = vcombine.high %v257_v18, %v257_v18  ;;  %v8073_v21 = vld [vmem:[%s8169_s29 + $0xfb8] sm:$0xff]  }
 0x1f4   : > { %7399 = vmatprep.subr.bf16.mxu1 %v8038_v25  ;;  %v669_v41 = vpack.c.bf16 %v528_v37, %v528_v37 }
 0x1f5   : > { %v544_v22 = vcombine.high %v536_v19, %v536_v19  ;;  %v670_v24 = vpack.c.bf16 %v536_v19, %v536_v19 }
 0x1f6   : > { %7378 = vmatpush3.bf16.msra.mxu0 %v8039_v26  ;;  %5962 = vmatprep.mubr.bf16.mxu1 %v669_v41 }
 0x1f7   : > { %7407 = vmatprep.subr.bf16.mxu0 %v8042_v30  ;;  %7400 = vmatpush3.bf16.msra.mxu1 %v8040_v31  ;;  %v671_v25 = vpack.c.bf16 %v544_v22, %v544_v22 }
 0x1f8   : > { %7429 = vmatprep.subr.bf16.mxu1 %v8043_v34 }
 0x1f9   : > { %5923 = vmatmul.mubr.bf16.vlgmr.msra.gmra.mrb[56].mxu0 %v666_v35 }
 0x1fa   : > { %7408 = vmatpush3.bf16.msra.mxu0 %v8044_v38  ;;  %5963 = vmatmul.mubr.bf16.vlgmr.msra.gmra.mrb[56].mxu1 %v668_v39 }
 0x1fb   : > { %7409 = vmatprep.subr.bf16.mxu0 %v8046_v40  ;;  %7430 = vmatpush3.bf16.msra.mxu1 %v8045_v43 }
 0x1fc   : > { %7431 = vmatprep.subr.bf16.mxu1 %v8047_v44  ;;  %6002 = vmatprep.mubr.bf16.mxu0 %v671_v25 }
 0x1fe   : > { %7410 = vmatpush3.bf16.msra.mxu0 %v8048_v45 }
 0x1ff   : > { %7411 = vmatprep.subr.bf16.mxu0 %v8050_v46  ;;  %7432 = vmatpush3.bf16.msra.mxu1 %v8049_v47 }
 0x200   : > { %7433 = vmatprep.subr.bf16.mxu1 %v8051_v48 }
 0x202   : > { %7412 = vmatpush3.bf16.msra.mxu0 %v8052_v49 }
 0x203   : > { %7413 = vmatprep.subr.bf16.mxu0 %v8054_v50  ;;  %7434 = vmatpush3.bf16.msra.mxu1 %v8053_v51 }
 0x204   : > { %7435 = vmatprep.subr.bf16.mxu1 %v8055_v52 }
 0x206   : > { %7414 = vmatpush3.bf16.msra.mxu0 %v8056_v53 }
 0x207   : > { %7415 = vmatprep.subr.bf16.mxu0 %v8058_v54  ;;  %7436 = vmatpush3.bf16.msra.mxu1 %v8057_v55 }
 0x208   : > { %7437 = vmatprep.subr.bf16.mxu1 %v8059_v56 }
 0x20a   : > { %7416 = vmatpush3.bf16.msra.mxu0 %v8060_v57 }
 0x20b   : > { %7417 = vmatprep.subr.bf16.mxu0 %v8062_v58  ;;  %7438 = vmatpush3.bf16.msra.mxu1 %v8061_v59 }
 0x20c   : > { %v7115_v60 = vpop.f32.mrb[32].mxu0  ;;  %7439 = vmatprep.subr.bf16.mxu1 %v8063_v62 }
 0x20d   : > { %v7137_v61 = vpop.f32.mrb[32].mxu1  ;;  %v7116_v63 = vpop.f32.mrb[33].mxu0 }
 0x20e   : > { %v7138_v0 = vpop.f32.mrb[33].mxu1  ;;  %v7117_v1 = vadd.f32 %v7116_v63, %v7115_v60  ;;  %v7118_v3 = vpop.f32.mrb[34].mxu0  ;;  %7418 = vmatpush3.bf16.msra.mxu0 %v8064_v5 }
 0x20f   : > { %v7139_v2 = vadd.f32 %v7138_v0, %v7137_v61  ;;  %v7140_v4 = vpop.f32.mrb[34].mxu1  ;;  %v7119_v7 = vpop.f32.mrb[35].mxu0  ;;  %7419 = vmatprep.subr.bf16.mxu0 %v8066_v6  ;;  %7440 = vmatpush3.bf16.msra.mxu1 %v8065_v10 }
 0x210   : > { %v7141_v8 = vpop.f32.mrb[35].mxu1  ;;  %v5445_v9 = vadd.f32 %v7117_v1, %v8713_v23  ;;  %7441 = vmatprep.subr.bf16.mxu1 %v8067_v11  ;;  %v543_v23 = vrot.slane %v529_v20, %v8207_v42 }
 0x212   : > { %v5485_v12 = vadd.f32 %v7139_v2, %v5445_v9  ;;  %7420 = vmatpush3.bf16.msra.mxu0 %v8068_v13  ;;  %v545_v26 = vcombine.high %v543_v23, %v543_v23  ;;  %v672_v27 = vpack.c.bf16 %v543_v23, %v543_v23 }
 0x213   : > { %7421 = vmatprep.subr.bf16.mxu0 %v8070_v14  ;;  %7442 = vmatpush3.bf16.msra.mxu1 %v8069_v15 }
 0x214   : > { %7443 = vmatprep.subr.bf16.mxu1 %v8071_v16  ;;  %v673_v28 = vpack.c.bf16 %v545_v26, %v545_v26 }
 0x216   : > { %7422 = vmatpush3.bf16.msra.mxu0 %v8072_v17  ;;  %6042 = vmatprep.mubr.bf16.mxu1 %v673_v28 }
 0x217   : > { %7444 = vmatpush3.bf16.msra.mxu1 %v8073_v21 }
 0x219   : > { %6003 = vmatmul.mubr.bf16.vlgmr.msra.gmra.mrb[60].mxu0 %v670_v24 }
 0x21a   : > { %6043 = vmatmul.mubr.bf16.vlgmr.msra.gmra.mrb[60].mxu1 %v672_v27 }
 0x22c   : > { %v7159_v29 = vpop.f32.mrb[36].mxu0 }
 0x22d   : > { %v7181_v30 = vpop.f32.mrb[36].mxu1  ;;  %v7160_v31 = vpop.f32.mrb[37].mxu0 }
 0x22e   : > { %v7161_v32 = vadd.f32 %v7160_v31, %v7159_v29  ;;  %v7182_v33 = vpop.f32.mrb[37].mxu1  ;;  %v7162_v34 = vpop.f32.mrb[38].mxu0 }
 0x22f   : > { %v7183_v35 = vadd.f32 %v7182_v33, %v7181_v30  ;;  %v7184_v36 = vpop.f32.mrb[38].mxu1  ;;  %v7163_v42 = vpop.f32.mrb[39].mxu0 }
 0x230   : > { %v5525_v37 = vadd.f32 %v7161_v32, %v5485_v12  ;;  %v7185_v38 = vpop.f32.mrb[39].mxu1 }
 0x232   : > { %v5565_v39 = vadd.f32 %v7183_v35, %v5525_v37 }
 0x24c   : > { %v7203_v40 = vpop.f32.mrb[40].mxu0 }
 0x24d   : > { %v7204_v41 = vpop.f32.mrb[41].mxu0  ;;  %v7225_v43 = vpop.f32.mrb[40].mxu1 }
 0x24e   : > { %v7205_v44 = vadd.f32 %v7204_v41, %v7203_v40  ;;  %v7206_v45 = vpop.f32.mrb[42].mxu0  ;;  %v7226_v46 = vpop.f32.mrb[41].mxu1 }
 0x24f   : > { %v7207_v47 = vpop.f32.mrb[43].mxu0  ;;  %v7227_v49 = vadd.f32 %v7226_v46, %v7225_v43  ;;  %v7228_v50 = vpop.f32.mrb[42].mxu1 }
 0x250   : > { %v5605_v48 = vadd.f32 %v7205_v44, %v5565_v39  ;;  %v7229_v51 = vpop.f32.mrb[43].mxu1  ;;  %v241_v47 = vld [vmem:[#allocation2] sm:$0x3] }
 0x251   : > { %v6066_v51 = vld [vmem:[%s8842_s3] sm:$0xff] (!%p6740_p6) }
 0x252   : > { %v5645_v52 = vadd.f32 %v7227_v49, %v5605_v48 }
 0x26c   : > { %v7247_v53 = vpop.f32.mrb[44].mxu0 }
 0x26d   : > { %v7248_v54 = vpop.f32.mrb[45].mxu0  ;;  %v7269_v55 = vpop.f32.mrb[44].mxu1 }
 0x26e   : > { %v7249_v56 = vadd.f32 %v7248_v54, %v7247_v53  ;;  %v7250_v57 = vpop.f32.mrb[46].mxu0  ;;  %v7270_v58 = vpop.f32.mrb[45].mxu1  ;;  %v6068_v53 = vld [vmem:[%s8842_s3 + $0x10] sm:$0xff] (!%p6740_p6)  ;;  %v8115_v54 = vmov (!%p6740_p6), 0.0|0.0  }
 0x26f   : > { %v7251_v59 = vpop.f32.mrb[47].mxu0  ;;  %v7271_v61 = vadd.f32 %v7270_v58, %v7269_v55  ;;  %v7272_v62 = vpop.f32.mrb[46].mxu1  ;;  %7503 = vmatprep.subr.bf16.mxu0 (!%p6740_p6), %v8115_v54  ;;  %v8117_v57 = vmov (!%p6740_p6), 0.0  }
 0x270   : > { %v5685_v60 = vadd.f32 %v7249_v56, %v5645_v52  ;;  %v7273_v63 = vpop.f32.mrb[47].mxu1  ;;  %v6067_v52 = vld [vmem:[%s8842_s3 + $0x8] sm:$0xff] (!%p6740_p6)  ;;  %v6069_v56 = vld [vmem:[%s8842_s3 + $0x18] sm:$0xff] (!%p6740_p6)  ;;  %7500 = vmatprep.mubr.msk.f32.mxu0 (!%p6740_p6), %vm8116_vm0, %v8117_v57  ;;  %v6070_v59 = vld [vmem:[%s8842_s3 + $0x20] sm:$0xff] (!%p6740_p6) }
 0x271   : > { %v7504_v55 = vpack.c.bf16 (!%p6740_p6), %v6067_v52, %v6066_v51  ;;  %v7507_v58 = vpack.c.bf16 (!%p6740_p6), %v6069_v56, %v6068_v53  ;;  %v6072_v62 = vld [vmem:[%s8842_s3 + $0x30] sm:$0xff] (!%p6740_p6)  ;;  %v6073_v63 = vld [vmem:[%s8842_s3 + $0x38] sm:$0xff] (!%p6740_p6) }
 0x272   : > { %v5725_v0 = vadd.f32 %v7271_v61, %v5685_v60  ;;  %v6071_v60 = vld [vmem:[%s8842_s3 + $0x28] sm:$0xff] (!%p6740_p6) }
 0x273   : > { %7505 = vmatpush3.bf16.msra.mxu0 (!%p6740_p6), %v7504_v55  ;;  %v7510_v61 = vpack.c.bf16 (!%p6740_p6), %v6071_v60, %v6070_v59 }
 0x274   : > { %7506 = vmatprep.subr.bf16.mxu0 (!%p6740_p6), %v8115_v54 }
 0x277   : > { %7508 = vmatpush3.bf16.msra.mxu0 (!%p6740_p6), %v7507_v58 }
 0x278   : > { %7509 = vmatprep.subr.bf16.mxu0 (!%p6740_p6), %v8115_v54 }
 0x27b   : > { %7511 = vmatpush3.bf16.msra.mxu0 (!%p6740_p6), %v7510_v61 }
 0x27c   : > { %7512 = vmatprep.subr.bf16.mxu0 (!%p6740_p6), %v8115_v54 }
 0x28c   : > { %v7291_v1 = vpop.f32.mrb[48].mxu0 }
 0x28d   : > { %v7292_v2 = vpop.f32.mrb[49].mxu0  ;;  %v7313_v3 = vpop.f32.mrb[48].mxu1 }
 0x28e   : > { %v7293_v4 = vadd.f32 %v7292_v2, %v7291_v1  ;;  %v7294_v5 = vpop.f32.mrb[50].mxu0  ;;  %v7314_v6 = vpop.f32.mrb[49].mxu1  ;;  %v6074_v1 = vld [vmem:[%s8842_s3 + $0x40] sm:$0xff] (!%p6740_p6)  ;;  %v6075_v2 = vld [vmem:[%s8842_s3 + $0x48] sm:$0xff] (!%p6740_p6) }
 0x28f   : > { %v7295_v7 = vpop.f32.mrb[51].mxu0  ;;  %v7315_v9 = vadd.f32 %v7314_v6, %v7313_v3  ;;  %v7316_v10 = vpop.f32.mrb[50].mxu1  ;;  %v7516_v3 = vpack.c.bf16 (!%p6740_p6), %v6075_v2, %v6074_v1  ;;  %v6077_v5 = vld [vmem:[%s8842_s3 + $0x58] sm:$0xff] (!%p6740_p6) }
 0x290   : > { %v5765_v8 = vadd.f32 %v7293_v4, %v5725_v0  ;;  %v7317_v11 = vpop.f32.mrb[51].mxu1  ;;  %v7513_v0 = vpack.c.bf16 (!%p6740_p6), %v6073_v63, %v6072_v62  ;;  %v6076_v4 = vld [vmem:[%s8842_s3 + $0x50] sm:$0xff] (!%p6740_p6)  ;;  %v6078_v7 = vld [vmem:[%s8842_s3 + $0x60] sm:$0xff] (!%p6740_p6) }
 0x291   : > { %v7519_v6 = vpack.c.bf16 (!%p6740_p6), %v6077_v5, %v6076_v4  ;;  %v6741_v11 = vld [vmem:[%s8841_s2] ss:$0 sm:$0xff] (!%p6740_p6) }
 0x292   : > { %v5805_v12 = vadd.f32 %v7315_v9, %v5765_v8  ;;  %7514 = vmatpush3.bf16.msra.mxu0 (!%p6740_p6), %v7513_v0  ;;  %v6079_v8 = vld [vmem:[%s8842_s3 + $0x68] sm:$0xff] (!%p6740_p6) }
 0x293   : > { %7515 = vmatprep.subr.bf16.mxu0 (!%p6740_p6), %v8115_v54  ;;  %v7522_v9 = vpack.c.bf16 (!%p6740_p6), %v6079_v8, %v6078_v7 }
 0x296   : > { %7517 = vmatpush3.bf16.msra.mxu0 (!%p6740_p6), %v7516_v3 }
 0x297   : > { %7518 = vmatprep.subr.bf16.mxu0 (!%p6740_p6), %v8115_v54 }
 0x29a   : > { %7520 = vmatpush3.bf16.msra.mxu0 (!%p6740_p6), %v7519_v6 }
 0x29b   : > { %7521 = vmatprep.subr.bf16.mxu0 (!%p6740_p6), %v8115_v54 }
 0x29e   : > { %7523 = vmatpush3.bf16.msra.mxu0 (!%p6740_p6), %v7522_v9 }
 0x29f   : > { %7524 = vmatprep.subr.bf16.mxu0 (!%p6740_p6), %v8115_v54 }
 0x2ac   : > { %v7335_v13 = vpop.f32.mrb[52].mxu0 }
 0x2ad   : > { %v7336_v14 = vpop.f32.mrb[53].mxu0  ;;  %v7357_v15 = vpop.f32.mrb[52].mxu1 }
 0x2ae   : > { %v7337_v16 = vadd.f32 %v7336_v14, %v7335_v13  ;;  %v7338_v17 = vpop.f32.mrb[54].mxu0  ;;  %v7358_v18 = vpop.f32.mrb[53].mxu1  ;;  %v6081_v13 = vld [vmem:[%s8842_s3 + $0x78] sm:$0xff] (!%p6740_p6) }
 0x2af   : > { %v7339_v19 = vpop.f32.mrb[55].mxu0  ;;  %v7359_v21 = vadd.f32 %v7358_v18, %v7357_v15  ;;  %v7360_v22 = vpop.f32.mrb[54].mxu1  ;;  %v6742_v17 = vld [vmem:[%s8843_s4] ss:$0 sm:$0xff] (!%p6740_p6) }
 0x2b0   : > { %v5845_v20 = vadd.f32 %v7337_v16, %v5805_v12  ;;  %v7361_v23 = vpop.f32.mrb[55].mxu1  ;;  %v6080_v12 = vld [vmem:[%s8842_s3 + $0x70] sm:$0xff] (!%p6740_p6) }
 0x2b1   : > { %v7525_v15 = vpack.c.bf16 (!%p6740_p6), %v6081_v13, %v6080_v12 }
 0x2b2   : > { %v5885_v24 = vadd.f32 %v7359_v21, %v5845_v20 }
 0x2b3   : > { %7526 = vmatpush3.bf16.msra.mxu0 (!%p6740_p6), %v7525_v15 }
 0x2cc   : > { %v7379_v25 = vpop.f32.mrb[56].mxu0 }
 0x2cd   : > { %v7380_v26 = vpop.f32.mrb[57].mxu0  ;;  %v7401_v27 = vpop.f32.mrb[56].mxu1 }
 0x2ce   : > { %v7381_v28 = vadd.f32 %v7380_v26, %v7379_v25  ;;  %v7382_v29 = vpop.f32.mrb[58].mxu0  ;;  %v7402_v30 = vpop.f32.mrb[57].mxu1 }
 0x2cf   : > { %v7383_v31 = vpop.f32.mrb[59].mxu0  ;;  %v7403_v33 = vadd.f32 %v7402_v30, %v7401_v27  ;;  %v7404_v34 = vpop.f32.mrb[58].mxu1 }
 0x2d0   : > { %v5925_v32 = vadd.f32 %v7381_v28, %v5885_v24  ;;  %v7405_v35 = vpop.f32.mrb[59].mxu1 }
 0x2d2   : > { %v5965_v36 = vadd.f32 %v7403_v33, %v5925_v32 }
 0x2ec   : > { %v7423_v42 = vpop.f32.mrb[60].mxu0 }
 0x2ed   : > { %v7424_v37 = vpop.f32.mrb[61].mxu0  ;;  %v7445_v38 = vpop.f32.mrb[60].mxu1 }
 0x2ee   : > { %v7425_v39 = vadd.f32 %v7424_v37, %v7423_v42  ;;  %v7426_v40 = vpop.f32.mrb[62].mxu0  ;;  %v7446_v41 = vpop.f32.mrb[61].mxu1 }
 0x2ef   : > { %v7427_v43 = vpop.f32.mrb[63].mxu0  ;;  %v7447_v45 = vadd.f32 %v7446_v41, %v7445_v38  ;;  %v7448_v46 = vpop.f32.mrb[62].mxu1 }
 0x2f0   : > { %v6005_v44 = vadd.f32 %v7425_v39, %v5965_v36  ;;  %v7449_v48 = vpop.f32.mrb[63].mxu1  ;;  %6055 = sbr.rel (%p6740_p6) target bundleno = 985 (0x3d9), region = 48 }
 0x2f2   : > { %v6045_v49 = vadd.f32 %v7447_v45, %v6005_v44 }
 0x2f4   : > { %v6050_v50 = vadd.f32 %v6045_v49, %v241_v47 }
 0x2f6   : > { %6051 = vst [vmem:[#allocation2] sm:$0x3] %v6050_v50 }
 0x2fd   : > { %v6056_v10 = vld [vmem:[#allocation2] sm:$0x3] }
 0x2fe   : > { %v6064_v14 = vadd.f32 %v6741_v11, %v6056_v10 }
 0x300   : > { %v6065_v16 = vmax.f32 %v6064_v14, 0.0 }
 0x302   : > { %7501 = vmatmul.mubr.f32.vlgmr.msra.gmra.mrb[0].mxu0 %v6065_v16 }
 0x3d5   : > { %v6155_v18 = vpop.f32.mrb[0].mxu0 }
 0x3d6   : > { %v6156_v19 = vadd.f32 %v6742_v17, %v6155_v18  ;;  %v7502_v20 = vpop.f32.mrb[1].mxu0 }
 0x3d8   : > { %6160 = vst.msk [vmem:[#allocation3] sm:$0x3] %vm6159_vm1, %v6156_v19 }
 0x3d9 PF: > { %p7531_p7 = scmp.eq.s32.totalorder %s8155_s19, 1  ;;  %s8118_s20 = smov [#allocation3]  }
 0x3da   : > { %s6168_s21 = sshll.u32 %s8118_s20, 4  ;;  %s6169_s21 = int_to_ptr.vmem [resolvable:$true] %s6168_s21 }
 0x3db   : > { %s8075_s22 = scalar_lea.vmem %s6169_s21, 32  ;;  %p8082_p11 = scmp.lt.s32.totalorder %s6169_s21, %s6169_s21 }
 0x3dc   : > { %p8076_p8 = scmp.ne.s32.totalorder %s6169_s21, %s8075_s22  ;;  %p8083_p12 = scmp.lt.s32.totalorder %s8075_s22, %s8075_s22 }
 0x3de   : > { %p8077_p9 = pnand %p8076_p8, %p7531_p7  ;;  %p8084_p13 = por %p8083_p12, %p8082_p11 }
 0x3e0   : > { %p8078_p10 = pneg %p8077_p9 }
 0x3e2   : > { %p8085_p0 = pnand %p8084_p13, %p8078_p10 }
 0x3e4   : > { %8088 = shalt.err (!%p8085_p0)
}
 0x3e5   : > { %s8089_s25 = scalar_lea.hbm %s8844_s5, 32 }
 0x3e6   : > { %p8090_p1 = scmp.ne.s32.totalorder %s8844_s5, %s8089_s25  ;;  %p8095_p4 = scmp.lt.u32.totalorder %s8089_s25, %s8844_s5 }
 0x3e8   : > { %p8091_p2 = pnand %p8090_p1, %p7531_p7 }
 0x3ea   : > { %p8092_p3 = pneg %p8091_p2 }
 0x3ec   : > { %p8097_p5 = pnand %p8095_p4, %p8092_p3 }
 0x3ee   : > { %8100 = shalt.err (!%p8097_p5)
}
 0x3ef   : > { %7528 = dma.vmem_to_hbm [thread:$0]  (%p7531_p7), %s6169_s21, 32, %s8844_s5, [#allocation4]  }
 0x3f0   : > { %8106 = dma.done.wait (%p7531_p7), [#allocation4], 32  }
 0x3f1   : > { %8108 = vsyncadd (%p7531_p7), [#allocation4], 4294967264 }
 0x3f2 PF: > { %s16_s18 = sadd.s32 1, %s8111_s18  }
 0x3f3   : > { %p13_p6 = scmp.ge.s32.totalorder %s16_s18, 4  }
 0x3f5   :  { %15 = sbr.rel (!%p13_p6) target bundleno = 1 (0x1), region = 78 }
 0x3fc   :  { %6181 = vsyncpa [#allocation4], 1 }
 0x3fd   :  { %6183 = vsyncpa [#allocation4 + $0x1], 1 }

</bundles_post_ra>
